<compile_context>
chip_gen: v7x
topology: tpu7x:2x2x1
jax: 0.10.0
libtpu: 0.0.40
codegen_flags: <defaults>
</compile_context>

<pallas_src>
import functools
import math

import jax
import jax.numpy as jnp
from jax.experimental import pallas as pl
from jax.experimental.pallas import tpu as pltpu


def ner_cnn_kernel(x_ref, w2c_w_ref, w2c_b_ref, wcat_ref, conv_b_ref,
                   bn_scale_ref, bn_shift_ref, h2t_w_ref, h2t_b_ref, o_ref,
                   *, seq_len):
    rows = x_ref.shape[0]          # Bt * S flattened token rows (multiple of 128)
    cp = w2c_w_ref.shape[1]        # padded channel dim
    tp = h2t_w_ref.shape[1]        # padded tag dim (128)
    cdt = x_ref.dtype              # matmul compute dtype (bf16)

    # Sentence-boundary masks for the rolled conv taps, generated in-kernel
    # from one iota (no (R,1) input streams) and hoisted out of the layer loop.
    row_id = jax.lax.broadcasted_iota(jnp.int32, (rows, cp), 0)
    t_pos = row_id % seq_len
    nf = (t_pos != 0).astype(jnp.float32)             # 0.0 on sentence-first rows
    nl = (t_pos != seq_len - 1).astype(jnp.float32)   # 0.0 on sentence-last rows

    # word2cnn Linear + tanh  (bf16 MXU, f32 accumulate, f32 elementwise).
    h = jnp.tanh(
        jnp.dot(x_ref[...], w2c_w_ref[...],
                preferred_element_type=jnp.float32) + w2c_b_ref[...])   # (R, Cp)

    # 4 x [Conv1d(k=3,pad=1) -> ReLU -> Dropout(eval: id) -> BatchNorm1d(eval)]
    # The 3 conv taps are fused into one (R,Cp)@(Cp,3Cp) matmul; by linearity
    # the k=0 / k=2 taps are realised by rolling the matmul outputs one row
    # down / up and zeroing sentence-boundary rows.
    for l in range(4):
        z = jnp.dot(h.astype(cdt), wcat_ref[l],
                    preferred_element_type=jnp.float32)                 # (R, 3Cp)
        z0 = pltpu.roll(z[:, 0:cp], shift=1, axis=0) * nf               # x[t-1]
        z1 = z[:, cp:2 * cp]                                            # x[t]
        z2 = pltpu.roll(z[:, 2 * cp:3 * cp], shift=rows - 1, axis=0) * nl  # x[t+1]
        y = z0 + z1 + z2 + conv_b_ref[pl.ds(l, 1), :]
        y = jnp.maximum(y, 0.0)                                         # ReLU
        # TODO(synk): folding bn_scale into the next layer's bf16 conv weights
        # needs boundary-aware per-tap biases and saves no VPU ops in this
        # tap-separated formulation, so BN stays an explicit scale/shift.
        h = y * bn_scale_ref[pl.ds(l, 1), :] + bn_shift_ref[pl.ds(l, 1), :]

    # hidden2tag Linear (padded tag columns carry a -1e30 bias).
    logits = (jnp.dot(h.astype(cdt), h2t_w_ref[...],
                      preferred_element_type=jnp.float32)
              + h2t_b_ref[...])                                         # (R, Tp)

    # torch.max(feature_out, 1): first index of the max along the tag axis.
    # Done on the transposed (Tp, R) view so the per-token result is a
    # lane-dense (1, R) row for the store.
    lt = logits.T                                                       # (Tp, R)
    m = jnp.max(lt, axis=0, keepdims=True)                              # (1, R)
    idx = jax.lax.broadcasted_iota(jnp.int32, lt.shape, 0)
    cand = jnp.where(lt == m, idx, tp)                                  # sentinel Tp
    o_ref[0] = jnp.min(cand, axis=0, keepdims=True)                     # (1, R) int32


def _round_up(x, m):
    return (x + m - 1) // m * m


def _pad2(a, rows, cols, value=0.0):
    return jnp.pad(a, ((0, rows - a.shape[0]), (0, cols - a.shape[1])),
                   constant_values=value)


def _device_defaults():
    """(channel_align, rows_per_step, vmem_cap_bytes) per TPU generation."""
    kind = ""
    try:
        kind = jax.devices()[0].device_kind.lower()
    except Exception:
        pass
    if "v5 lite" in kind or "v5e" in kind or "v5lite" in kind:
        return 128, 512, 100 * 1024 * 1024          # v5e: 128-wide MXU, big VMEM
    if "v6" in kind:
        return 256, 1024, 100 * 1024 * 1024         # v6e: 256-wide MXU, big VMEM
    if "7" in kind:
        return 256, 1024, 48 * 1024 * 1024          # v7x: 64 MiB VMEM / TC
    return 128, 512, 48 * 1024 * 1024               # unknown: conservative


def ner_forward(word_inputs, mask, params, *, compute_dtype=jnp.bfloat16,
                rows_per_step=None):
    """word_inputs: (B, S) int32, mask: (B, S) bool/int -> tag_seq (B, S) int32."""
    B, S = word_inputs.shape
    E = params["embed"].shape[1]
    C = params["w2c_w"].shape[1]
    T = params["h2t_w"].shape[1]

    chan_align, rps_default, vmem_cap = _device_defaults()
    if rows_per_step is None:
        rows_per_step = rps_default

    Ep = _round_up(E, 128)
    Cp = _round_up(C, 128)
    if chan_align == 256:
        cp256 = _round_up(C, 256)
        if cp256 <= Cp + Cp // 4:      # pad to 256 only when already close to it
            Cp = cp256
    Tp = _round_up(T, 128)

    # ---- batch tiling: Bt sentences per grid step, flattened to R = Bt*S rows.
    # R is forced to a multiple of 128; Bt is capped so >=2 grid steps exist
    # when the batch allows (two TensorCores on v7x) and so that batch padding
    # never exceeds one row tile of waste.
    bt_mult = 128 // math.gcd(S, 128)
    Bt = max(1, rows_per_step // S)
    Bt = max(bt_mult, Bt // bt_mult * bt_mult)
    Bt = min(Bt, _round_up(B, bt_mult))
    if B >= 2 * bt_mult:
        Bt = min(Bt, _round_up(pl.cdiv(B, 2), bt_mult))
    G = pl.cdiv(B, Bt)
    Bpad = G * Bt
    R = Bt * S

    wi = word_inputs
    if Bpad != B:
        wi = jnp.pad(wi, ((0, Bpad - B), (0, 0)))

    # Embedding gather stays as XLA glue; pad E -> Ep (lane-dense K) and flatten
    # (Bpad, S, Ep) -> (Bpad*S, Ep).
    embed_p = jnp.pad(params["embed"], ((0, 0), (0, Ep - E)))
    emb = jnp.take(embed_p, wi, axis=0).reshape(Bpad * S, Ep).astype(compute_dtype)

    # ---- fold & pad weights (E -> Ep, channels -> Cp, tags -> Tp); matmul
    # operands in bf16, biases / BN affine stay f32 (VPU path).
    w2c_w = _pad2(params["w2c_w"], Ep, Cp).astype(compute_dtype)
    w2c_b = _pad2(params["w2c_b"], 1, Cp).astype(jnp.float32)

    cw = jnp.pad(params["conv_w"], ((0, 0), (0, 0), (0, Cp - C), (0, Cp - C)))
    wcat = jnp.concatenate([cw[:, 0], cw[:, 1], cw[:, 2]],
                           axis=-1).astype(compute_dtype)            # (4, Cp, 3Cp)
    conv_b = jnp.pad(params["conv_b"],
                     ((0, 0), (0, Cp - C))).astype(jnp.float32)

    eps = 1e-5
    bn_scale = params["bn_gamma"] / jnp.sqrt(params["bn_var"] + eps)
    bn_shift = params["bn_beta"] - params["bn_mean"] * bn_scale
    bn_scale = jnp.pad(bn_scale, ((0, 0), (0, Cp - C)),
                       constant_values=1.0).astype(jnp.float32)
    bn_shift = jnp.pad(bn_shift, ((0, 0), (0, Cp - C))).astype(jnp.float32)

    h2t_w = _pad2(params["h2t_w"], Cp, Tp).astype(compute_dtype)
    h2t_b = _pad2(params["h2t_b"], 1, Tp, value=-1e30).astype(jnp.float32)

    itemsize = jnp.dtype(compute_dtype).itemsize
    weight_bytes = ((w2c_w.size + wcat.size + h2t_w.size) * itemsize
                    + (w2c_b.size + conv_b.size + bn_scale.size
                       + bn_shift.size + h2t_b.size) * 4)
    stream_bytes = 2 * R * Ep * itemsize + 2 * R * 4       # double-buffered emb + out
    act_bytes = R * (8 * Cp + 3 * Tp + Ep) * 4              # rough live f32 temporaries
    vmem_limit = int(min(max((weight_bytes + stream_bytes + act_bytes) * 5 // 4,
                             32 * 1024 * 1024), vmem_cap))

    flops = 2 * Bpad * S * (Ep * Cp + 4 * 3 * Cp * Cp + Cp * Tp)
    bytes_accessed = emb.size * itemsize + Bpad * S * 4 + weight_bytes

    const = pl.Buffered(1)   # weights never change across the grid: single-buffer

    out = pl.pallas_call(
        functools.partial(ner_cnn_kernel, seq_len=S),
        out_shape=jax.ShapeDtypeStruct((G, 1, R), jnp.int32),
        grid=(G,),
        in_specs=[
            pl.BlockSpec((R, Ep), lambda i: (i, 0)),                     # flat embeddings
            pl.BlockSpec((Ep, Cp), lambda i: (0, 0), pipeline_mode=const),       # word2cnn W
            pl.BlockSpec((1, Cp), lambda i: (0, 0), pipeline_mode=const),        # word2cnn b
            pl.BlockSpec((4, Cp, 3 * Cp), lambda i: (0, 0, 0), pipeline_mode=const),  # fused conv W
            pl.BlockSpec((4, Cp), lambda i: (0, 0), pipeline_mode=const),        # conv b
            pl.BlockSpec((4, Cp), lambda i: (0, 0), pipeline_mode=const),        # BN scale
            pl.BlockSpec((4, Cp), lambda i: (0, 0), pipeline_mode=const),        # BN shift
            pl.BlockSpec((Cp, Tp), lambda i: (0, 0), pipeline_mode=const),       # hidden2tag W
            pl.BlockSpec((1, Tp), lambda i: (0, 0), pipeline_mode=const),        # hidden2tag b
        ],
        out_specs=pl.BlockSpec((1, 1, R), lambda i: (i, 0, 0)),
        compiler_params=pltpu.CompilerParams(
            dimension_semantics=("parallel",),
            vmem_limit_bytes=vmem_limit),
        cost_estimate=pl.CostEstimate(
            flops=int(flops),
            transcendentals=int(Bpad * S * Cp),
            bytes_accessed=int(bytes_accessed)),
    )(emb, w2c_w, w2c_b, wcat, conv_b, bn_scale, bn_shift, h2t_w, h2t_b)

    tags = out.reshape(Bpad, S)[:B]
    # tag_seq = mask.long() * tag_seq  (kept in the wrapper: lane-dense output).
    return tags * mask.astype(jnp.int32)


def ner_reference_logits(word_inputs, params, *, compute_dtype=jnp.bfloat16):
    """Pure-JAX reference with the same bf16-matmul / f32-accumulate recipe."""
    cdt = compute_dtype
    emb = jnp.take(params["embed"], word_inputs, axis=0).astype(cdt)
    h = jnp.tanh(jnp.dot(emb, params["w2c_w"].astype(cdt),
                         preferred_element_type=jnp.float32)
                 + params["w2c_b"])                               # (B, S, C)
    eps = 1e-5
    bn_scale = params["bn_gamma"] / jnp.sqrt(params["bn_var"] + eps)
    bn_shift = params["bn_beta"] - params["bn_mean"] * bn_scale
    w = params["conv_w"].astype(cdt)
    for l in range(4):
        hc = h.astype(cdt)
        zp = jnp.zeros_like(hc[:, :1, :])
        h_prev = jnp.concatenate([zp, hc[:, :-1, :]], axis=1)
        h_next = jnp.concatenate([hc[:, 1:, :], zp], axis=1)
        y = (jnp.dot(h_prev, w[l, 0], preferred_element_type=jnp.float32)
             + jnp.dot(hc, w[l, 1], preferred_element_type=jnp.float32)
             + jnp.dot(h_next, w[l, 2], preferred_element_type=jnp.float32)
             + params["conv_b"][l])
        y = jnp.maximum(y, 0.0)
        h = y * bn_scale[l] + bn_shift[l]
    logits = (jnp.dot(h.astype(cdt), params["h2t_w"].astype(cdt),
                      preferred_element_type=jnp.float32) + params["h2t_b"])
    return logits


def init_params(key, vocab, E, H, tag_num):
    C = 2 * H
    ks = jax.random.split(key, 11)
    scale = jnp.sqrt(3.0 / E)
    embed = jax.random.uniform(ks[0], (vocab, E), jnp.float32, -scale, scale)
    embed = embed.at[0].set(0.0)                                  # padding_idx=0
    return {
        "embed": embed,
        "w2c_w": jax.random.normal(ks[1], (E, C), jnp.float32) * 0.1,
        "w2c_b": jax.random.normal(ks[2], (1, C), jnp.float32) * 0.1,
        # conv_w layout: (layer, tap k, C_in, C_out) == PyTorch (C_out, C_in, k).T
        "conv_w": jax.random.normal(ks[3], (4, 3, C, C), jnp.float32) * 0.05,
        "conv_b": jax.random.normal(ks[4], (4, C), jnp.float32) * 0.1,
        "bn_gamma": 1.0 + 0.1 * jax.random.normal(ks[5], (4, C), jnp.float32),
        "bn_beta": 0.1 * jax.random.normal(ks[6], (4, C), jnp.float32),
        "bn_mean": 0.1 * jax.random.normal(ks[7], (4, C), jnp.float32),
        "bn_var": jax.random.uniform(ks[8], (4, C), jnp.float32, 0.5, 1.5),
        "h2t_w": jax.random.normal(ks[9], (C, tag_num), jnp.float32) * 0.1,
        "h2t_b": jax.random.normal(ks[10], (1, tag_num), jnp.float32) * 0.1,
    }


if __name__ == "__main__":
    B, S, E, H, tag_num, vocab = 2, 8, 32, 32, 8, 50
    key = jax.random.PRNGKey(0)
    kp, kw = jax.random.split(key, 2)

    params = init_params(kp, vocab, E, H, tag_num)

    word_inputs = jax.random.randint(kw, (B, S), 1, vocab, dtype=jnp.int32)
    # Zero out some trailing positions to emulate padding (mask = word_inputs > 0).
    pad_len = jnp.array([0, 3])
    pos = jnp.arange(S)[None, :]
    word_inputs = jnp.where(pos < (S - pad_len)[:, None], word_inputs, 0)
    mask = word_inputs > 0

    tag_seq = ner_forward(word_inputs, mask, params)
    tag_seq = jax.block_until_ready(tag_seq)

    logits_ref = ner_reference_logits(word_inputs, params)
    tag_ref = jnp.argmax(logits_ref, axis=-1).astype(jnp.int32) * mask.astype(jnp.int32)

    assert tag_seq.shape == (B, S)
    assert tag_seq.dtype == jnp.int32
    # Exact match, except tokens whose top-2 logits are within numerical noise
    # (kernel and reference both use bf16 matmuls with f32 accumulation).
    top2 = jax.lax.top_k(logits_ref, 2)[0]
    near_tie = (top2[..., 0] - top2[..., 1]) < 1e-3
    ok = (tag_seq == tag_ref) | near_tie
    assert bool(jnp.all(ok)), (tag_seq, tag_ref)

    print("KERNEL_OK")
</pallas_src>

<mosaic_0001>
module attributes {stable_mosaic.version = 11 : i64} {
  func.func @ner_cnn_kernel(%arg0: i32, %arg1: memref<128x128xbf16, #tpu.memory_space<vmem>>, %arg2: memref<128x128xbf16, #tpu.memory_space<vmem>>, %arg3: memref<1x128xf32, #tpu.memory_space<vmem>>, %arg4: memref<4x128x384xbf16, #tpu.memory_space<vmem>>, %arg5: memref<4x128xf32, #tpu.memory_space<vmem>>, %arg6: memref<4x128xf32, #tpu.memory_space<vmem>>, %arg7: memref<4x128xf32, #tpu.memory_space<vmem>>, %arg8: memref<128x128xbf16, #tpu.memory_space<vmem>>, %arg9: memref<1x128xf32, #tpu.memory_space<vmem>>, %arg10: memref<1x1x128xi32, #tpu.memory_space<vmem>>) attributes {dimension_semantics = [#tpu.dimension_semantics<parallel>], iteration_bounds = array<i64: 1>, scalar_prefetch = 0 : i64, scratch_operands = 0 : i64, tpu.core_type = #tpu.core_type<tc>, window_params = [{transform_indices = @transform_0, window_bounds = array<i64: 128, 128>}, {pipeline_mode = #tpu.pipeline_mode<synchronous>, transform_indices = @transform_1, window_bounds = array<i64: 128, 128>}, {pipeline_mode = #tpu.pipeline_mode<synchronous>, transform_indices = @transform_2, window_bounds = array<i64: 1, 128>}, {pipeline_mode = #tpu.pipeline_mode<synchronous>, transform_indices = @transform_3, window_bounds = array<i64: 4, 128, 384>}, {pipeline_mode = #tpu.pipeline_mode<synchronous>, transform_indices = @transform_4, window_bounds = array<i64: 4, 128>}, {pipeline_mode = #tpu.pipeline_mode<synchronous>, transform_indices = @transform_5, window_bounds = array<i64: 4, 128>}, {pipeline_mode = #tpu.pipeline_mode<synchronous>, transform_indices = @transform_6, window_bounds = array<i64: 4, 128>}, {pipeline_mode = #tpu.pipeline_mode<synchronous>, transform_indices = @transform_7, window_bounds = array<i64: 128, 128>}, {pipeline_mode = #tpu.pipeline_mode<synchronous>, transform_indices = @transform_8, window_bounds = array<i64: 1, 128>}, {transform_indices = @transform_9, window_bounds = array<i64: 1, 1, 128>}]} {
    %0 = tpu.iota {dimensions = array<i32: 0>} : vector<128x128xi32>
    %c8_i32 = arith.constant 8 : i32
    %c0_i32 = arith.constant 0 : i32
    %1 = arith.cmpi eq, %c8_i32, %c0_i32 : i32
    %c1_i32 = arith.constant 1 : i32
    %2 = arith.select %1, %c1_i32, %c8_i32 : i32
    %3 = vector.broadcast %2 : i32 to vector<128x128xi32>
    %4 = arith.remsi %0, %3 : vector<128x128xi32>
    %c0_i32_0 = arith.constant 0 : i32
    %5 = vector.broadcast %c0_i32_0 : i32 to vector<128x128xi32>
    %6 = arith.cmpi ne, %4, %5 : vector<128x128xi32>
    %c0_i32_1 = arith.constant 0 : i32
    %7 = vector.broadcast %c0_i32_1 : i32 to vector<128x128xi32>
    %8 = arith.cmpi slt, %4, %7 : vector<128x128xi32>
    %c0_i32_2 = arith.constant 0 : i32
    %9 = arith.cmpi slt, %2, %c0_i32_2 : i32
    %10 = vector.broadcast %9 : i1 to vector<128x128xi1>
    %11 = vector.broadcast %10 : vector<128x128xi1> to vector<128x128xi1>
    %12 = arith.xori %8, %11 : vector<128x128xi1>
    %13 = arith.andi %12, %6 : vector<128x128xi1>
    %14 = vector.broadcast %2 : i32 to vector<128x128xi32>
    %15 = arith.addi %4, %14 : vector<128x128xi32>
    %16 = arith.select %13, %15, %4 : vector<128x128xi1>, vector<128x128xi32>
    %c0_i32_3 = arith.constant 0 : i32
    %17 = vector.broadcast %c0_i32_3 : i32 to vector<128x128xi32>
    %18 = arith.cmpi ne, %16, %17 : vector<128x128xi32>
    %19 = arith.extui %18 : vector<128x128xi1> to vector<128x128xi32>
    %20 = arith.sitofp %19 : vector<128x128xi32> to vector<128x128xf32>
    %c7_i32 = arith.constant 7 : i32
    %21 = vector.broadcast %c7_i32 : i32 to vector<128x128xi32>
    %22 = arith.cmpi ne, %16, %21 : vector<128x128xi32>
    %23 = arith.extui %22 : vector<128x128xi1> to vector<128x128xi32>
    %24 = arith.sitofp %23 : vector<128x128xi32> to vector<128x128xf32>
    %c0 = arith.constant 0 : index
    %c0_4 = arith.constant 0 : index
    %25 = vector.load %arg1[%c0, %c0_4] : memref<128x128xbf16, #tpu.memory_space<vmem>>, vector<128x128xbf16>
    %c0_5 = arith.constant 0 : index
    %c0_6 = arith.constant 0 : index
    %26 = vector.load %arg2[%c0_5, %c0_6] : memref<128x128xbf16, #tpu.memory_space<vmem>>, vector<128x128xbf16>
    %cst = arith.constant dense<0.000000e+00> : vector<128x128xf32>
    %27 = tpu.matmul %25, %26, %cst {dimension_numbers = #tpu.dot_dimension_numbers<[1], [0], [0], [1], [0, 0, 1, 1], [], []>} : vector<128x128xbf16>, vector<128x128xbf16>, vector<128x128xf32> -> vector<128x128xf32>
    %c0_7 = arith.constant 0 : index
    %c0_8 = arith.constant 0 : index
    %28 = vector.load %arg3[%c0_7, %c0_8] : memref<1x128xf32, #tpu.memory_space<vmem>>, vector<1x128xf32>
    %29 = vector.broadcast %28 : vector<1x128xf32> to vector<128x128xf32>
    %30 = arith.addf %27, %29 : vector<128x128xf32>
    %31 = math.tanh %30 : vector<128x128xf32>
    %32 = arith.truncf %31 : vector<128x128xf32> to vector<128x128xbf16>
    %c0_9 = arith.constant 0 : index
    %c0_10 = arith.constant 0 : index
    %c0_11 = arith.constant 0 : index
    %33 = vector.load %arg4[%c0_9, %c0_10, %c0_11] : memref<4x128x384xbf16, #tpu.memory_space<vmem>>, vector<1x128x384xbf16>
    %34 = vector.shape_cast %33 : vector<1x128x384xbf16> to vector<128x384xbf16>
    %cst_12 = arith.constant dense<0.000000e+00> : vector<128x384xf32>
    %35 = tpu.matmul %32, %34, %cst_12 {dimension_numbers = #tpu.dot_dimension_numbers<[1], [0], [0], [1], [0, 0, 1, 1], [], []>} : vector<128x128xbf16>, vector<128x384xbf16>, vector<128x384xf32> -> vector<128x384xf32>
    %36 = vector.extract_strided_slice %35 {offsets = [0, 0], sizes = [128, 128], strides = [1, 1]} : vector<128x384xf32> to vector<128x128xf32>
    %c1_i32_13 = arith.constant 1 : i32
    %37 = tpu.dynamic_rotate %36 by %c1_i32_13 dim 0 : vector<128x128xf32>, i32 -> vector<128x128xf32>
    %38 = arith.mulf %37, %20 : vector<128x128xf32>
    %39 = vector.extract_strided_slice %35 {offsets = [0, 128], sizes = [128, 128], strides = [1, 1]} : vector<128x384xf32> to vector<128x128xf32>
    %40 = vector.extract_strided_slice %35 {offsets = [0, 256], sizes = [128, 128], strides = [1, 1]} : vector<128x384xf32> to vector<128x128xf32>
    %c127_i32 = arith.constant 127 : i32
    %41 = tpu.dynamic_rotate %40 by %c127_i32 dim 0 : vector<128x128xf32>, i32 -> vector<128x128xf32>
    %42 = arith.mulf %41, %24 : vector<128x128xf32>
    %43 = arith.addf %38, %39 : vector<128x128xf32>
    %44 = arith.addf %43, %42 : vector<128x128xf32>
    %c0_14 = arith.constant 0 : index
    %c0_15 = arith.constant 0 : index
    %45 = vector.load %arg5[%c0_14, %c0_15] : memref<4x128xf32, #tpu.memory_space<vmem>>, vector<1x128xf32>
    %46 = vector.broadcast %45 : vector<1x128xf32> to vector<128x128xf32>
    %47 = arith.addf %44, %46 : vector<128x128xf32>
    %cst_16 = arith.constant 0.000000e+00 : f32
    %48 = vector.broadcast %cst_16 : f32 to vector<128x128xf32>
    %49 = arith.maximumf %47, %48 : vector<128x128xf32>
    %c0_17 = arith.constant 0 : index
    %c0_18 = arith.constant 0 : index
    %50 = vector.load %arg6[%c0_17, %c0_18] : memref<4x128xf32, #tpu.memory_space<vmem>>, vector<1x128xf32>
    %51 = vector.broadcast %50 : vector<1x128xf32> to vector<128x128xf32>
    %52 = arith.mulf %49, %51 : vector<128x128xf32>
    %c0_19 = arith.constant 0 : index
    %c0_20 = arith.constant 0 : index
    %53 = vector.load %arg7[%c0_19, %c0_20] : memref<4x128xf32, #tpu.memory_space<vmem>>, vector<1x128xf32>
    %54 = vector.broadcast %53 : vector<1x128xf32> to vector<128x128xf32>
    %55 = arith.addf %52, %54 : vector<128x128xf32>
    %56 = arith.truncf %55 : vector<128x128xf32> to vector<128x128xbf16>
    %c1 = arith.constant 1 : index
    %c0_21 = arith.constant 0 : index
    %c0_22 = arith.constant 0 : index
    %57 = vector.load %arg4[%c1, %c0_21, %c0_22] : memref<4x128x384xbf16, #tpu.memory_space<vmem>>, vector<1x128x384xbf16>
    %58 = vector.shape_cast %57 : vector<1x128x384xbf16> to vector<128x384xbf16>
    %cst_23 = arith.constant dense<0.000000e+00> : vector<128x384xf32>
    %59 = tpu.matmul %56, %58, %cst_23 {dimension_numbers = #tpu.dot_dimension_numbers<[1], [0], [0], [1], [0, 0, 1, 1], [], []>} : vector<128x128xbf16>, vector<128x384xbf16>, vector<128x384xf32> -> vector<128x384xf32>
    %60 = vector.extract_strided_slice %59 {offsets = [0, 0], sizes = [128, 128], strides = [1, 1]} : vector<128x384xf32> to vector<128x128xf32>
    %c1_i32_24 = arith.constant 1 : i32
    %61 = tpu.dynamic_rotate %60 by %c1_i32_24 dim 0 : vector<128x128xf32>, i32 -> vector<128x128xf32>
    %62 = arith.mulf %61, %20 : vector<128x128xf32>
    %63 = vector.extract_strided_slice %59 {offsets = [0, 128], sizes = [128, 128], strides = [1, 1]} : vector<128x384xf32> to vector<128x128xf32>
    %64 = vector.extract_strided_slice %59 {offsets = [0, 256], sizes = [128, 128], strides = [1, 1]} : vector<128x384xf32> to vector<128x128xf32>
    %c127_i32_25 = arith.constant 127 : i32
    %65 = tpu.dynamic_rotate %64 by %c127_i32_25 dim 0 : vector<128x128xf32>, i32 -> vector<128x128xf32>
    %66 = arith.mulf %65, %24 : vector<128x128xf32>
    %67 = arith.addf %62, %63 : vector<128x128xf32>
    %68 = arith.addf %67, %66 : vector<128x128xf32>
    %c1_26 = arith.constant 1 : index
    %c0_27 = arith.constant 0 : index
    %69 = vector.load %arg5[%c1_26, %c0_27] : memref<4x128xf32, #tpu.memory_space<vmem>>, vector<1x128xf32>
    %70 = vector.broadcast %69 : vector<1x128xf32> to vector<128x128xf32>
    %71 = arith.addf %68, %70 : vector<128x128xf32>
    %cst_28 = arith.constant 0.000000e+00 : f32
    %72 = vector.broadcast %cst_28 : f32 to vector<128x128xf32>
    %73 = arith.maximumf %71, %72 : vector<128x128xf32>
    %c1_29 = arith.constant 1 : index
    %c0_30 = arith.constant 0 : index
    %74 = vector.load %arg6[%c1_29, %c0_30] : memref<4x128xf32, #tpu.memory_space<vmem>>, vector<1x128xf32>
    %75 = vector.broadcast %74 : vector<1x128xf32> to vector<128x128xf32>
    %76 = arith.mulf %73, %75 : vector<128x128xf32>
    %c1_31 = arith.constant 1 : index
    %c0_32 = arith.constant 0 : index
    %77 = vector.load %arg7[%c1_31, %c0_32] : memref<4x128xf32, #tpu.memory_space<vmem>>, vector<1x128xf32>
    %78 = vector.broadcast %77 : vector<1x128xf32> to vector<128x128xf32>
    %79 = arith.addf %76, %78 : vector<128x128xf32>
    %80 = arith.truncf %79 : vector<128x128xf32> to vector<128x128xbf16>
    %c2 = arith.constant 2 : index
    %c0_33 = arith.constant 0 : index
    %c0_34 = arith.constant 0 : index
    %81 = vector.load %arg4[%c2, %c0_33, %c0_34] : memref<4x128x384xbf16, #tpu.memory_space<vmem>>, vector<1x128x384xbf16>
    %82 = vector.shape_cast %81 : vector<1x128x384xbf16> to vector<128x384xbf16>
    %cst_35 = arith.constant dense<0.000000e+00> : vector<128x384xf32>
    %83 = tpu.matmul %80, %82, %cst_35 {dimension_numbers = #tpu.dot_dimension_numbers<[1], [0], [0], [1], [0, 0, 1, 1], [], []>} : vector<128x128xbf16>, vector<128x384xbf16>, vector<128x384xf32> -> vector<128x384xf32>
    %84 = vector.extract_strided_slice %83 {offsets = [0, 0], sizes = [128, 128], strides = [1, 1]} : vector<128x384xf32> to vector<128x128xf32>
    %c1_i32_36 = arith.constant 1 : i32
    %85 = tpu.dynamic_rotate %84 by %c1_i32_36 dim 0 : vector<128x128xf32>, i32 -> vector<128x128xf32>
    %86 = arith.mulf %85, %20 : vector<128x128xf32>
    %87 = vector.extract_strided_slice %83 {offsets = [0, 128], sizes = [128, 128], strides = [1, 1]} : vector<128x384xf32> to vector<128x128xf32>
    %88 = vector.extract_strided_slice %83 {offsets = [0, 256], sizes = [128, 128], strides = [1, 1]} : vector<128x384xf32> to vector<128x128xf32>
    %c127_i32_37 = arith.constant 127 : i32
    %89 = tpu.dynamic_rotate %88 by %c127_i32_37 dim 0 : vector<128x128xf32>, i32 -> vector<128x128xf32>
    %90 = arith.mulf %89, %24 : vector<128x128xf32>
    %91 = arith.addf %86, %87 : vector<128x128xf32>
    %92 = arith.addf %91, %90 : vector<128x128xf32>
    %c2_38 = arith.constant 2 : index
    %c0_39 = arith.constant 0 : index
    %93 = vector.load %arg5[%c2_38, %c0_39] : memref<4x128xf32, #tpu.memory_space<vmem>>, vector<1x128xf32>
    %94 = vector.broadcast %93 : vector<1x128xf32> to vector<128x128xf32>
    %95 = arith.addf %92, %94 : vector<128x128xf32>
    %cst_40 = arith.constant 0.000000e+00 : f32
    %96 = vector.broadcast %cst_40 : f32 to vector<128x128xf32>
    %97 = arith.maximumf %95, %96 : vector<128x128xf32>
    %c2_41 = arith.constant 2 : index
    %c0_42 = arith.constant 0 : index
    %98 = vector.load %arg6[%c2_41, %c0_42] : memref<4x128xf32, #tpu.memory_space<vmem>>, vector<1x128xf32>
    %99 = vector.broadcast %98 : vector<1x128xf32> to vector<128x128xf32>
    %100 = arith.mulf %97, %99 : vector<128x128xf32>
    %c2_43 = arith.constant 2 : index
    %c0_44 = arith.constant 0 : index
    %101 = vector.load %arg7[%c2_43, %c0_44] : memref<4x128xf32, #tpu.memory_space<vmem>>, vector<1x128xf32>
    %102 = vector.broadcast %101 : vector<1x128xf32> to vector<128x128xf32>
    %103 = arith.addf %100, %102 : vector<128x128xf32>
    %104 = arith.truncf %103 : vector<128x128xf32> to vector<128x128xbf16>
    %c3 = arith.constant 3 : index
    %c0_45 = arith.constant 0 : index
    %c0_46 = arith.constant 0 : index
    %105 = vector.load %arg4[%c3, %c0_45, %c0_46] : memref<4x128x384xbf16, #tpu.memory_space<vmem>>, vector<1x128x384xbf16>
    %106 = vector.shape_cast %105 : vector<1x128x384xbf16> to vector<128x384xbf16>
    %cst_47 = arith.constant dense<0.000000e+00> : vector<128x384xf32>
    %107 = tpu.matmul %104, %106, %cst_47 {dimension_numbers = #tpu.dot_dimension_numbers<[1], [0], [0], [1], [0, 0, 1, 1], [], []>} : vector<128x128xbf16>, vector<128x384xbf16>, vector<128x384xf32> -> vector<128x384xf32>
    %108 = vector.extract_strided_slice %107 {offsets = [0, 0], sizes = [128, 128], strides = [1, 1]} : vector<128x384xf32> to vector<128x128xf32>
    %c1_i32_48 = arith.constant 1 : i32
    %109 = tpu.dynamic_rotate %108 by %c1_i32_48 dim 0 : vector<128x128xf32>, i32 -> vector<128x128xf32>
    %110 = arith.mulf %109, %20 : vector<128x128xf32>
    %111 = vector.extract_strided_slice %107 {offsets = [0, 128], sizes = [128, 128], strides = [1, 1]} : vector<128x384xf32> to vector<128x128xf32>
    %112 = vector.extract_strided_slice %107 {offsets = [0, 256], sizes = [128, 128], strides = [1, 1]} : vector<128x384xf32> to vector<128x128xf32>
    %c127_i32_49 = arith.constant 127 : i32
    %113 = tpu.dynamic_rotate %112 by %c127_i32_49 dim 0 : vector<128x128xf32>, i32 -> vector<128x128xf32>
    %114 = arith.mulf %113, %24 : vector<128x128xf32>
    %115 = arith.addf %110, %111 : vector<128x128xf32>
    %116 = arith.addf %115, %114 : vector<128x128xf32>
    %c3_50 = arith.constant 3 : index
    %c0_51 = arith.constant 0 : index
    %117 = vector.load %arg5[%c3_50, %c0_51] : memref<4x128xf32, #tpu.memory_space<vmem>>, vector<1x128xf32>
    %118 = vector.broadcast %117 : vector<1x128xf32> to vector<128x128xf32>
    %119 = arith.addf %116, %118 : vector<128x128xf32>
    %cst_52 = arith.constant 0.000000e+00 : f32
    %120 = vector.broadcast %cst_52 : f32 to vector<128x128xf32>
    %121 = arith.maximumf %119, %120 : vector<128x128xf32>
    %c3_53 = arith.constant 3 : index
    %c0_54 = arith.constant 0 : index
    %122 = vector.load %arg6[%c3_53, %c0_54] : memref<4x128xf32, #tpu.memory_space<vmem>>, vector<1x128xf32>
    %123 = vector.broadcast %122 : vector<1x128xf32> to vector<128x128xf32>
    %124 = arith.mulf %121, %123 : vector<128x128xf32>
    %c3_55 = arith.constant 3 : index
    %c0_56 = arith.constant 0 : index
    %125 = vector.load %arg7[%c3_55, %c0_56] : memref<4x128xf32, #tpu.memory_space<vmem>>, vector<1x128xf32>
    %126 = vector.broadcast %125 : vector<1x128xf32> to vector<128x128xf32>
    %127 = arith.addf %124, %126 : vector<128x128xf32>
    %128 = arith.truncf %127 : vector<128x128xf32> to vector<128x128xbf16>
    %c0_57 = arith.constant 0 : index
    %c0_58 = arith.constant 0 : index
    %129 = vector.load %arg8[%c0_57, %c0_58] : memref<128x128xbf16, #tpu.memory_space<vmem>>, vector<128x128xbf16>
    %cst_59 = arith.constant dense<0.000000e+00> : vector<128x128xf32>
    %130 = tpu.matmul %128, %129, %cst_59 {dimension_numbers = #tpu.dot_dimension_numbers<[1], [0], [0], [1], [0, 0, 1, 1], [], []>} : vector<128x128xbf16>, vector<128x128xbf16>, vector<128x128xf32> -> vector<128x128xf32>
    %c0_60 = arith.constant 0 : index
    %c0_61 = arith.constant 0 : index
    %131 = vector.load %arg9[%c0_60, %c0_61] : memref<1x128xf32, #tpu.memory_space<vmem>>, vector<1x128xf32>
    %132 = vector.broadcast %131 : vector<1x128xf32> to vector<128x128xf32>
    %133 = arith.addf %130, %132 : vector<128x128xf32>
    %134 = tpu.transpose %133, [1, 0] : vector<128x128xf32> -> vector<128x128xf32>
    %cst_62 = arith.constant dense<0xFF800000> : vector<128xf32>
    %135 = vector.multi_reduction <maximumf>, %134, %cst_62 [0] : vector<128x128xf32> to vector<128xf32>
    %136 = vector.shape_cast %135 : vector<128xf32> to vector<1x128xf32>
    %137 = tpu.iota {dimensions = array<i32: 0>} : vector<128x128xi32>
    %138 = vector.broadcast %136 : vector<1x128xf32> to vector<128x128xf32>
    %139 = arith.cmpf oeq, %134, %138 : vector<128x128xf32>
    %c128_i32 = arith.constant 128 : i32
    %140 = vector.broadcast %c128_i32 : i32 to vector<128x128xi32>
    %141 = arith.select %139, %137, %140 : vector<128x128xi1>, vector<128x128xi32>
    %cst_63 = arith.constant dense<2147483647> : vector<128xi32>
    %142 = vector.multi_reduction <minsi>, %141, %cst_63 [0] : vector<128x128xi32> to vector<128xi32>
    %143 = vector.shape_cast %142 : vector<128xi32> to vector<1x128xi32>
    %c0_64 = arith.constant 0 : index
    %c0_65 = arith.constant 0 : index
    %c0_66 = arith.constant 0 : index
    %144 = vector.load %arg10[%c0_64, %c0_65, %c0_66] : memref<1x1x128xi32, #tpu.memory_space<vmem>>, vector<1x1x128xi32>
    %145 = vector.shape_cast %144 : vector<1x1x128xi32> to vector<1x128xi32>
    %146 = vector.shape_cast %143 : vector<1x128xi32> to vector<1x1x128xi32>
    tpu.vector_store %arg10[%c0_64, %c0_65, %c0_66], %146 {strides = array<i32>} : memref<1x1x128xi32, #tpu.memory_space<vmem>>, vector<1x1x128xi32>,
    return
  }
  func.func @transform_0(%arg0: i32) -> (i32, i32) {
    %c0_i32 = arith.constant 0 : i32
    %c0_i32_0 = arith.constant 0 : i32
    return %arg0, %c0_i32 : i32, i32
  }
  func.func @transform_1(%arg0: i32) -> (i32, i32) {
    %c0_i32 = arith.constant 0 : i32
    %c0_i32_0 = arith.constant 0 : i32
    %c0_i32_1 = arith.constant 0 : i32
    return %c0_i32, %c0_i32_0 : i32, i32
  }
  func.func @transform_2(%arg0: i32) -> (i32, i32) {
    %c0_i32 = arith.constant 0 : i32
    %c0_i32_0 = arith.constant 0 : i32
    %c0_i32_1 = arith.constant 0 : i32
    return %c0_i32, %c0_i32_0 : i32, i32
  }
  func.func @transform_3(%arg0: i32) -> (i32, i32, i32) {
    %c0_i32 = arith.constant 0 : i32
    %c0_i32_0 = arith.constant 0 : i32
    %c0_i32_1 = arith.constant 0 : i32
    %c0_i32_2 = arith.constant 0 : i32
    return %c0_i32, %c0_i32_0, %c0_i32_1 : i32, i32, i32
  }
  func.func @transform_4(%arg0: i32) -> (i32, i32) {
    %c0_i32 = arith.constant 0 : i32
    %c0_i32_0 = arith.constant 0 : i32
    %c0_i32_1 = arith.constant 0 : i32
    return %c0_i32, %c0_i32_0 : i32, i32
  }
  func.func @transform_5(%arg0: i32) -> (i32, i32) {
    %c0_i32 = arith.constant 0 : i32
    %c0_i32_0 = arith.constant 0 : i32
    %c0_i32_1 = arith.constant 0 : i32
    return %c0_i32, %c0_i32_0 : i32, i32
  }
  func.func @transform_6(%arg0: i32) -> (i32, i32) {
    %c0_i32 = arith.constant 0 : i32
    %c0_i32_0 = arith.constant 0 : i32
    %c0_i32_1 = arith.constant 0 : i32
    return %c0_i32, %c0_i32_0 : i32, i32
  }
  func.func @transform_7(%arg0: i32) -> (i32, i32) {
    %c0_i32 = arith.constant 0 : i32
    %c0_i32_0 = arith.constant 0 : i32
    %c0_i32_1 = arith.constant 0 : i32
    return %c0_i32, %c0_i32_0 : i32, i32
  }
  func.func @transform_8(%arg0: i32) -> (i32, i32) {
    %c0_i32 = arith.constant 0 : i32
    %c0_i32_0 = arith.constant 0 : i32
    %c0_i32_1 = arith.constant 0 : i32
    return %c0_i32, %c0_i32_0 : i32, i32
  }
  func.func @transform_9(%arg0: i32) -> (i32, i32, i32) {
    %c0_i32 = arith.constant 0 : i32
    %c0_i32_0 = arith.constant 0 : i32
    %c0_i32_1 = arith.constant 0 : i32
    return %arg0, %c0_i32, %c0_i32_0 : i32, i32, i32
  }
}

</mosaic_0001>

<bundles_post_ra>
// kernel: tpu_custom_call.1
= control target key start
LH: loop header
LB: loop body
LE: loop exit
PB: predicated region body
PF: predicated region fallthrough
CT: control target
= control target key end

     0   :  { %14 = vsyncpa [#allocation3], 0  ;;  %s5541_s0 = inlined_call_operand.hbm [shape: bf16[128,128], index: 0, kind: input, shape index: {}]   ;;  %s5542_s1 = inlined_call_operand.hbm [shape: bf16[128,128], index: 1, kind: input, shape index: {}]   ;;  %s5543_s2 = inlined_call_operand.vmem [shape: f32[1,128], index: 2, kind: input, shape index: {}]   ;;  %s5544_s3 = inlined_call_operand.hbm [shape: bf16[4,128,384], index: 3, kind: input, shape index: {}]   ;;  %s5545_s4 = inlined_call_operand.vmem [shape: f32[4,128], index: 4, kind: input, shape index: {}]   ;;  %s5546_s5 = inlined_call_operand.vmem [shape: f32[4,128], index: 5, kind: input, shape index: {}]   ;;  %s5547_s6 = inlined_call_operand.vmem [shape: f32[4,128], index: 6, kind: input, shape index: {}]   ;;  %s5548_s7 = inlined_call_operand.hbm [shape: bf16[128,128], index: 7, kind: input, shape index: {}]   ;;  %s5549_s8 = inlined_call_operand.vmem [shape: f32[1,128], index: 8, kind: input, shape index: {}]   ;;  %s5550_s9 = inlined_call_operand.hbm [shape: s32[1,1,128], index: 9, kind: output, shape index: {}]  }
   0x1   :  { %15 = vsyncpa [#allocation6], 0 }
   0x2   :  { %16 = vsyncpa [#allocation9], 0 }
   0x3   :  { %17 = vsyncpa [#allocation4], 0  ;;  %s4072_s30 = smov [#allocation5]   ;;  %s4073_s11 = smov [#allocation2]  }
   0x4   :  { %s35_s10 = sshll.u32 %s4072_s30, 4  ;;  %s23_s12 = sshll.u32 %s4073_s11, 4  ;;  %s36_s10 = int_to_ptr.vmem [resolvable:$true] %s35_s10  ;;  %s4133_s12 = int_to_ptr.vmem [resolvable:$true] %s23_s12 }
   0x5   :  { %s3954_s15 = scalar_lea.hbm %s5542_s1, 1024 }
   0x6   :  { %p3955_p0 = scmp.ne.s32.totalorder %s5542_s1, %s3954_s15  ;;  %p3958_p1 = scmp.lt.u32.totalorder %s3954_s15, %s5542_s1 }
   0x8   :  { %p3960_p2 = pnand %p3958_p1, %p3955_p0 }
   0xa   :  { %3963 = shalt.err (!%p3960_p2)
}
   0xb   :  { %s3964_s20 = scalar_lea.vmem %s36_s10, 1024  ;;  %p3969_p4 = scmp.lt.s32.totalorder %s36_s10, %s36_s10 }
   0xc   :  { %p3965_p3 = scmp.ne.s32.totalorder %s36_s10, %s3964_s20  ;;  %p3970_p5 = scmp.lt.s32.totalorder %s3964_s20, %s3964_s20 }
   0xe   :  { %p3971_p6 = por %p3970_p5, %p3969_p4 }
  0x10   :  { %p3972_p7 = pnand %p3971_p6, %p3965_p3 }
  0x12   :  { %3975 = shalt.err (!%p3972_p7)
}
  0x13   :  { %s4074_s21 = smov 64   ;;  %s4075_s22 = smov 4  }
  0x14   :  { %41 = dma.hbm_to_vmem [thread:$0]  %s5542_s1, 1024, %s36_s10, [#allocation6], %s4074_s21, %s4074_s21, %s4075_s22  }
  0x15   :  { %s3976_s27 = scalar_lea.hbm %s5541_s0, 1024 }
  0x16   :  { %p3977_p8 = scmp.ne.s32.totalorder %s5541_s0, %s3976_s27  ;;  %p3980_p9 = scmp.lt.u32.totalorder %s3976_s27, %s5541_s0 }
  0x18   :  { %p3982_p10 = pnand %p3980_p9, %p3977_p8 }
  0x1a   :  { %3985 = shalt.err (!%p3982_p10)
}
  0x1b   :  { %s3986_s13 = scalar_lea.vmem %s4133_s12, 1024  ;;  %p3991_p12 = scmp.lt.s32.totalorder %s4133_s12, %s4133_s12 }
  0x1c   :  { %p3987_p11 = scmp.ne.s32.totalorder %s4133_s12, %s3986_s13  ;;  %p3992_p13 = scmp.lt.s32.totalorder %s3986_s13, %s3986_s13 }
  0x1e   :  { %p3993_p0 = por %p3992_p13, %p3991_p12 }
  0x20   :  { %p3994_p1 = pnand %p3993_p0, %p3987_p11 }
  0x22   :  { %3997 = shalt.err (!%p3994_p1)
}
  0x23   :  { %29 = dma.hbm_to_vmem [thread:$0]  %s5541_s0, 1024, %s4133_s12, [#allocation3], %s4074_s21, %s4074_s21, %s4075_s22  }
  0x24   :  { %s4076_s14 = smov [#allocation7]   ;;  %s3998_s18 = scalar_lea.hbm %s5544_s3, 12288 }
  0x25   :  { %s49_s15 = sshll.u32 %s4076_s14, 4  ;;  %p3999_p2 = scmp.ne.s32.totalorder %s5544_s3, %s3998_s18  ;;  %s50_s15 = int_to_ptr.vmem [resolvable:$true] %s49_s15 }
  0x26   :  { %p4002_p3 = scmp.lt.u32.totalorder %s3998_s18, %s5544_s3 }
  0x28   :  { %p4004_p4 = pnand %p4002_p3, %p3999_p2 }
  0x2a   :  { %4007 = shalt.err (!%p4004_p4)
}
  0x2b   :  { %s4008_s25 = scalar_lea.vmem %s50_s15, 12288  ;;  %p4013_p6 = scmp.lt.s32.totalorder %s50_s15, %s50_s15 }
  0x2c   :  { %p4009_p5 = scmp.ne.s32.totalorder %s50_s15, %s4008_s25  ;;  %p4014_p7 = scmp.lt.s32.totalorder %s4008_s25, %s4008_s25 }
  0x2e   :  { %p4015_p8 = por %p4014_p7, %p4013_p6 }
  0x30   :  { %p4016_p9 = pnand %p4015_p8, %p4009_p5 }
  0x32   :  { %4019 = shalt.err (!%p4016_p9)
}
  0x33   :  { %s4077_s0 = smov 192   ;;  %s4078_s12 = smov 12  }
  0x34   :  { %55 = dma.hbm_to_vmem [thread:$0]  %s5544_s3, 12288, %s50_s15, [#allocation6], %s4077_s0, %s4077_s0, %s4078_s12  }
  0x35   :  { %s4079_s28 = smov [#allocation8]   ;;  %s4020_s13 = scalar_lea.hbm %s5548_s7, 1024 }
  0x36   :  { %s67_s29 = sshll.u32 %s4079_s28, 4  ;;  %p4021_p10 = scmp.ne.s32.totalorder %s5548_s7, %s4020_s13  ;;  %s68_s29 = int_to_ptr.vmem [resolvable:$true] %s67_s29 }
  0x37   :  { %p4024_p11 = scmp.lt.u32.totalorder %s4020_s13, %s5548_s7 }
  0x39   :  { %p4026_p12 = pnand %p4024_p11, %p4021_p10 }
  0x3b   :  { %4029 = shalt.err (!%p4026_p12)
}
  0x3c   :  { %s4030_s17 = scalar_lea.vmem %s68_s29, 1024  ;;  %p4035_p0 = scmp.lt.s32.totalorder %s68_s29, %s68_s29 }
  0x3d   :  { %p4031_p13 = scmp.ne.s32.totalorder %s68_s29, %s4030_s17  ;;  %p4036_p1 = scmp.lt.s32.totalorder %s4030_s17, %s4030_s17 }
  0x3f   :  { %p4037_p2 = por %p4036_p1, %p4035_p0 }
  0x41   :  { %p4038_p3 = pnand %p4037_p2, %p4031_p13 }
  0x43   :  { %4041 = shalt.err (!%p4038_p3)
}
  0x44   :  { %73 = dma.hbm_to_vmem [thread:$0]  %s5548_s7, 1024, %s68_s29, [#allocation9], %s4074_s21, %s4074_s21, %s4075_s22  }
  0x45   :  { %4064 = dma.done.wait [#allocation3], 1024  }
  0x46   :  { %4065 = vsyncadd [#allocation3], 4294966272 }
  0x47   :  { %4066 = dma.done.wait [#allocation6], 13312  }
  0x48   :  { %4067 = vsyncadd [#allocation6], 4294953984 }
  0x49   :  { %4068 = dma.done.wait [#allocation9], 1024  }
  0x4a   :  { %4069 = vsyncadd [#allocation9], 4294966272  ;;  %v3770_v0 = vld [vmem:[#allocation5] sm:$0xff]   ;;  %v3771_v1 = vld [vmem:[#allocation5 + $0x8] sm:$0xff]   ;;  %v5551_v40 = vmov 0  }
  0x4b   :  { %3567 = vmatprep.subr.bf16.mxu0 %v3770_v0  ;;  %v3772_v2 = vld [vmem:[#allocation5 + $0x10] sm:$0xff]   ;;  %v3773_v3 = vld [vmem:[#allocation5 + $0x18] sm:$0xff]   ;;  %v3778_v4 = vld [vmem:[#allocation2] sm:$0xff]   ;;  %842 = vmatprep.mubr.bf16.mxu1 %v5551_v40 }
  0x4c   :  { %3568 = vmatpush3.bf16.msra.mxu0 %v3770_v0  ;;  %3583 = vmatprep.mubr.bf16.mxu0 %v3778_v4  ;;  %v3774_v5 = vld [vmem:[#allocation5 + $0x20] sm:$0xff]   ;;  %v3775_v6 = vld [vmem:[#allocation5 + $0x28] sm:$0xff]   ;;  %v3776_v11 = vld [vmem:[#allocation5 + $0x30] sm:$0xff]  }
  0x4d   :  { %3569 = vmatprep.subr.bf16.mxu0 %v3771_v1  ;;  %v3786_v7 = vld [vmem:[#allocation7 + $0x4] ss:$12 sps:$4 sm:$0xff]   ;;  %v3788_v8 = vld [vmem:[#allocation7] ss:$12 sps:$4 sm:$0xff]   ;;  %v3790_v9 = vld [vmem:[#allocation7 + $0x1c] ss:$12 sps:$4 sm:$0xff]  }
  0x4e   :  { %810 = vmatprep.subr.bf16.mxu1 %v3786_v7  ;;  %v3792_v10 = vld [vmem:[#allocation7 + $0x18] ss:$12 sps:$4 sm:$0xff]   ;;  %v3794_v12 = vld [vmem:[#allocation7 + $0x34] ss:$12 sps:$4 sm:$0xff]   ;;  %v3796_v14 = vld [vmem:[#allocation7 + $0x30] ss:$12 sps:$4 sm:$0xff]  }
  0x4f   :  { %811 = vmatpush1.bf16.msra.mxu1 %v3788_v8  ;;  %v3777_v13 = vld [vmem:[#allocation5 + $0x38] sm:$0xff]   ;;  %v3789_v16 = vld [vmem:[#allocation7 + $0x8] ss:$12 sps:$4 sm:$0xff]   ;;  %v3793_v19 = vld [vmem:[#allocation7 + $0x20] ss:$12 sps:$4 sm:$0xff]  }
  0x50   :  { %3570 = vmatpush3.bf16.msra.mxu0 %v3771_v1  ;;  %812 = vmatprep.subr.bf16.mxu1 %v3790_v9  ;;  %v3798_v15 = vld [vmem:[#allocation7 + $0x4c] ss:$12 sps:$4 sm:$0xff]   ;;  %v3780_v18 = vld [vmem:[#allocation2 + $0x10] sm:$0xff]   ;;  %v3782_v22 = vld [vmem:[#allocation2 + $0x20] sm:$0xff]  }
  0x51   :  { %3571 = vmatprep.subr.bf16.mxu0 %v3772_v2  ;;  %v3779_v17 = vld [vmem:[#allocation2 + $0x8] sm:$0xff]   ;;  %v3797_v20 = vld [vmem:[#allocation7 + $0x38] ss:$12 sps:$4 sm:$0xff]   ;;  %v3784_v24 = vld [vmem:[#allocation2 + $0x30] sm:$0xff]  }
  0x52   :  { %v3781_v21 = vld [vmem:[#allocation2 + $0x18] sm:$0xff]   ;;  %v3783_v23 = vld [vmem:[#allocation2 + $0x28] sm:$0xff]   ;;  %v3802_v28 = vld [vmem:[#allocation7 + $0x64] ss:$12 sps:$4 sm:$0xff]  }
  0x53   :  { %813 = vmatpush1.bf16.msra.mxu1 %v3792_v10  ;;  %v3785_v25 = vld [vmem:[#allocation2 + $0x38] sm:$0xff]   ;;  %v3800_v26 = vld [vmem:[#allocation7 + $0x48] ss:$12 sps:$4 sm:$0xff]   ;;  %v3804_v29 = vld [vmem:[#allocation7 + $0x60] ss:$12 sps:$4 sm:$0xff]  }
  0x54   :  { %3572 = vmatpush3.bf16.msra.mxu0 %v3772_v2  ;;  %814 = vmatprep.subr.bf16.mxu1 %v3794_v12  ;;  %v3801_v27 = vld [vmem:[#allocation7 + $0x50] ss:$12 sps:$4 sm:$0xff]   ;;  %v3805_v30 = vld [vmem:[#allocation7 + $0x68] ss:$12 sps:$4 sm:$0xff]   ;;  %v3808_v32 = vld [vmem:[#allocation7 + $0x78] ss:$12 sps:$4 sm:$0xff]  }
  0x55   :  { %3573 = vmatprep.subr.bf16.mxu0 %v3773_v3  ;;  %v3806_v31 = vld [vmem:[#allocation7 + $0x7c] ss:$12 sps:$4 sm:$0xff]   ;;  %v3809_v33 = vld [vmem:[#allocation7 + $0x80] ss:$12 sps:$4 sm:$0xff]   ;;  %v3813_v36 = vld [vmem:[#allocation7 + $0x98] ss:$12 sps:$4 sm:$0xff]  }
  0x56   :  { %v3810_v34 = vld [vmem:[#allocation7 + $0x94] ss:$12 sps:$4 sm:$0xff]   ;;  %v3812_v35 = vld [vmem:[#allocation7 + $0x90] ss:$12 sps:$4 sm:$0xff]   ;;  %v3814_v37 = vld [vmem:[#allocation7 + $0xac] ss:$12 sps:$4 sm:$0xff]  }
  0x57   :  { %815 = vmatpush1.bf16.msra.mxu1 %v3796_v14  ;;  %v3816_v38 = vld [vmem:[#allocation7 + $0xa8] ss:$12 sps:$4 sm:$0xff]   ;;  %v3817_v39 = vld [vmem:[#allocation7 + $0xb0] ss:$12 sps:$4 sm:$0xff]   ;;  %v4201_v41 = vld [vmem:[%s5543_s2] ss:$0 sm:$0xff] }
  0x58   :  { %3574 = vmatpush3.bf16.msra.mxu0 %v3773_v3  ;;  %816 = vmatprep.subr.bf16.mxu1 %v3798_v15 }
  0x59   :  { %3575 = vmatprep.subr.bf16.mxu0 %v3774_v5 }
  0x5b   :  { %817 = vmatpush1.bf16.msra.mxu1 %v3800_v26 }
  0x5c   :  { %3576 = vmatpush3.bf16.msra.mxu0 %v3774_v5  ;;  %818 = vmatprep.subr.bf16.mxu1 %v3802_v28 }
  0x5d   :  { %3577 = vmatprep.subr.bf16.mxu0 %v3775_v6 }
  0x5f   :  { %819 = vmatpush1.bf16.msra.mxu1 %v3804_v29 }
  0x60   :  { %3578 = vmatpush3.bf16.msra.mxu0 %v3775_v6  ;;  %820 = vmatprep.subr.bf16.mxu1 %v3806_v31 }
  0x61   :  { %3579 = vmatprep.subr.bf16.mxu0 %v3776_v11 }
  0x63   :  { %821 = vmatpush1.bf16.msra.mxu1 %v3808_v32 }
  0x64   :  { %3580 = vmatpush3.bf16.msra.mxu0 %v3776_v11  ;;  %822 = vmatprep.subr.bf16.mxu1 %v3810_v34  ;;  %v3820_v34 = vld [vmem:[#allocation7 + $0xc4] ss:$12 sps:$4 sm:$0xff]  }
  0x65   :  { %3581 = vmatprep.subr.bf16.mxu0 %v3777_v13 }
  0x67   :  { %823 = vmatpush1.bf16.msra.mxu1 %v3812_v35  ;;  %v3818_v35 = vld [vmem:[#allocation7 + $0xc0] ss:$12 sps:$4 sm:$0xff]  }
  0x68   :  { %3582 = vmatpush3.bf16.msra.mxu0 %v3777_v13  ;;  %824 = vmatprep.subr.bf16.mxu1 %v3814_v37  ;;  %v3824_v37 = vld [vmem:[#allocation7 + $0xdc] ss:$12 sps:$4 sm:$0xff]  }
  0x69   :  { %3599 = vmatprep.subr.bf16.mxu0 %v3789_v16 }
  0x6b   :  { %3584 = vmatmul.mubr.bf16.vlgmr.msra.gmra.mrb[0].mxu0 %v3779_v17  ;;  %825 = vmatpush1.bf16.msra.mxu1 %v3816_v38  ;;  %v3822_v38 = vld [vmem:[#allocation7 + $0xd8] ss:$12 sps:$4 sm:$0xff]  }
  0x6c   :  { %3587 = vmatprep.mubr.bf16.mxu0 %v3780_v18  ;;  %3600 = vmatpush3.bf16.msra.mxu0 %v3789_v16 }
  0x6d   :  { %3601 = vmatprep.subr.bf16.mxu0 %v3793_v19 }
  0x70   :  { %3602 = vmatpush3.bf16.msra.mxu0 %v3793_v19 }
  0x71   :  { %3603 = vmatprep.subr.bf16.mxu0 %v3797_v20 }
  0x73   :  { %3588 = vmatmul.mubr.bf16.gmra.mrb[4].mxu0 %v3781_v21 }
  0x74   :  { %3591 = vmatprep.mubr.bf16.mxu0 %v3782_v22  ;;  %3604 = vmatpush3.bf16.msra.mxu0 %v3797_v20 }
  0x75   :  { %3605 = vmatprep.subr.bf16.mxu0 %v3801_v27 }
  0x78   :  { %3606 = vmatpush3.bf16.msra.mxu0 %v3801_v27 }
  0x79   :  { %3607 = vmatprep.subr.bf16.mxu0 %v3805_v30 }
  0x7b   :  { %3592 = vmatmul.mubr.bf16.gmra.mrb[8].mxu0 %v3783_v23 }
  0x7c   :  { %3595 = vmatprep.mubr.bf16.mxu0 %v3784_v24  ;;  %3608 = vmatpush3.bf16.msra.mxu0 %v3805_v30 }
  0x7d   :  { %3609 = vmatprep.subr.bf16.mxu0 %v3809_v33 }
  0x80   :  { %3610 = vmatpush3.bf16.msra.mxu0 %v3809_v33 }
  0x81   :  { %3611 = vmatprep.subr.bf16.mxu0 %v3813_v36 }
  0x83   :  { %3596 = vmatmul.mubr.bf16.gmra.mrb[12].mxu0 %v3785_v25 }
  0x84   :  { %3612 = vmatpush3.bf16.msra.mxu0 %v3813_v36  ;;  %v3821_v36 = vld [vmem:[#allocation7 + $0xc8] ss:$12 sps:$4 sm:$0xff]  }
  0x85   :  { %3613 = vmatprep.subr.bf16.mxu0 %v3817_v39  ;;  %3631 = vmatprep.subr.bf16.mxu1 %v3821_v36 }
  0x88   :  { %3614 = vmatpush3.bf16.msra.mxu0 %v3817_v39  ;;  %v3825_v39 = vld [vmem:[#allocation7 + $0xe0] ss:$12 sps:$4 sm:$0xff]  }
  0x89   :  { %1398 = vmatprep.subr.bf16.mxu0 %v3820_v34 }
 0x13e   :  { %v3585_v42 = vpop.f32.mrb[0].mxu0 }
 0x13f   :  { %v572_v43 = vadd.f32 %v3585_v42, %v4201_v41  ;;  %v563_v44 = vpop.f32.mrb[1].mxu0  ;;  %v3826_v42 = vld [vmem:[#allocation7 + $0xf0] ss:$12 sps:$4 sm:$0xff]  }
 0x140   :  { %v564_v45 = vadd.f32 %v4201_v41, %v563_v44  ;;  %v3586_v46 = vpop.f32.mrb[2].mxu0  ;;  %v3832_v44 = vld [vmem:[#allocation7 + $0x10c] ss:$12 sps:$4 sm:$0xff]  }
 0x141   :  { %3922 = vtanh.f32 %v572_v43  ;;  %v575_v47 = vadd.f32 %v3586_v46, %v4201_v41  ;;  %v566_v48 = vpop.f32.mrb[3].mxu0  ;;  %v3829_v43 = vld [vmem:[#allocation7 + $0xf8] ss:$12 sps:$4 sm:$0xff]   ;;  %v3833_v46 = vld [vmem:[#allocation7 + $0x110] ss:$12 sps:$4 sm:$0xff]  }
 0x142   :  { %3924 = vtanh.f32 %v564_v45  ;;  %v567_v49 = vadd.f32 %v4201_v41, %v566_v48  ;;  %v3830_v45 = vld [vmem:[#allocation7 + $0x108] ss:$12 sps:$4 sm:$0xff]   ;;  %v3834_v48 = vld [vmem:[#allocation7 + $0x120] ss:$12 sps:$4 sm:$0xff]  }
 0x143   :  { %3926 = vtanh.f32 %v575_v47  ;;  %v3836_v47 = vld [vmem:[#allocation7 + $0x124] ss:$12 sps:$4 sm:$0xff]  }
 0x144   :  { %3928 = vtanh.f32 %v567_v49  ;;  %v3837_v49 = vld [vmem:[#allocation7 + $0x128] ss:$12 sps:$4 sm:$0xff]  }
 0x146   :  { %v3589_v50 = vpop.f32.mrb[4].mxu0 }
 0x147   :  { %v588_v51 = vadd.f32 %v3589_v50, %v4201_v41  ;;  %v579_v52 = vpop.f32.mrb[5].mxu0  ;;  %v3840_v50 = vld [vmem:[#allocation7 + $0x13c] ss:$12 sps:$4 sm:$0xff]  }
 0x148   :  { %v580_v53 = vadd.f32 %v4201_v41, %v579_v52  ;;  %v3590_v54 = vpop.f32.mrb[6].mxu0  ;;  %v3841_v52 = vld [vmem:[#allocation7 + $0x140] ss:$12 sps:$4 sm:$0xff]  }
 0x149   :  { %3930 = vtanh.f32 %v588_v51  ;;  %v591_v55 = vadd.f32 %v3590_v54, %v4201_v41  ;;  %v582_v56 = vpop.f32.mrb[7].mxu0  ;;  %v3838_v51 = vld [vmem:[#allocation7 + $0x138] ss:$12 sps:$4 sm:$0xff]   ;;  %v3842_v54 = vld [vmem:[#allocation7 + $0x150] ss:$12 sps:$4 sm:$0xff]  }
 0x14a   :  { %3932 = vtanh.f32 %v580_v53  ;;  %v583_v57 = vadd.f32 %v4201_v41, %v582_v56  ;;  %v3844_v53 = vld [vmem:[#allocation7 + $0x154] ss:$12 sps:$4 sm:$0xff]   ;;  %v3848_v56 = vld [vmem:[#allocation7 + $0x16c] ss:$12 sps:$4 sm:$0xff]  }
 0x14b   :  { %v3923_v58 = vpop.eup %3922  ;;  %3934 = vtanh.f32 %v591_v55  ;;  %v3845_v55 = vld [vmem:[#allocation7 + $0x158] ss:$12 sps:$4 sm:$0xff]  }
 0x14c   :  { %v3925_v59 = vpop.eup %3924  ;;  %3936 = vtanh.f32 %v583_v57  ;;  %v3849_v57 = vld [vmem:[#allocation7 + $0x170] ss:$12 sps:$4 sm:$0xff]  }
 0x14d   :  { %v3927_v60 = vpop.eup %3926 }
 0x14e   :  { %v3929_v61 = vpop.eup %3928  ;;  %v3593_v62 = vpop.f32.mrb[8].mxu0  ;;  %v643_v63 = vpack.c.bf16 %v3927_v60, %v3923_v58  ;;  %v3846_v58 = vld [vmem:[#allocation7 + $0x168] ss:$12 sps:$4 sm:$0xff]  }
 0x14f   :  { %v604_v0 = vadd.f32 %v3593_v62, %v4201_v41  ;;  %v595_v1 = vpop.f32.mrb[9].mxu0  ;;  %v642_v2 = vpack.c.bf16 %v3929_v61, %v3925_v59  ;;  %v89_v59 = vlaneseq }
 0x150   :  { %v596_v3 = vadd.f32 %v4201_v41, %v595_v1  ;;  %v3594_v4 = vpop.f32.mrb[10].mxu0 }
 0x151   :  { %3938 = vtanh.f32 %v604_v0  ;;  %v607_v5 = vadd.f32 %v3594_v4, %v4201_v41  ;;  %v598_v6 = vpop.f32.mrb[11].mxu0  ;;  %843 = vmatmul.mubr.bf16.vlgmr.msra.gmra.mrb[0].mxu1 %v642_v2  ;;  %3615 = vmatprep.mubr.bf16.mxu0 %v642_v2  ;;  %v4227_v60 = vshrl.u32 %v89_v59, 7 }
 0x152   :  { %3940 = vtanh.f32 %v596_v3  ;;  %v599_v7 = vadd.f32 %v4201_v41, %v598_v6  ;;  %3616 = vmatmul.mubr.bf16.vlgmr.msra.gmra.mrb[16].mxu0 %v643_v63  ;;  %852 = vmatprep.mubr.bf16.mxu1 %v5551_v40 }
 0x153   :  { %v3931_v8 = vpop.eup %3930  ;;  %3942 = vtanh.f32 %v607_v5  ;;  %1399 = vmatpush1.bf16.msra.mxu0 %v3818_v35  ;;  %3632 = vmatpush3.bf16.msra.mxu1 %v3821_v36  ;;  %v4230_v61 = vadd.s32 8, %v4227_v60  ;;  %v4233_v62 = vadd.s32 16, %v4227_v60  ;;  %v4241_v2 = vadd.s32 32, %v4227_v60 }
 0x154   :  { %v3933_v9 = vpop.eup %3932  ;;  %3944 = vtanh.f32 %v599_v7  ;;  %1400 = vmatprep.subr.bf16.mxu0 %v3824_v37  ;;  %3633 = vmatprep.subr.bf16.mxu1 %v3825_v39  ;;  %v4245_v4 = vadd.s32 40, %v4227_v60  ;;  %v4248_v5 = vadd.s32 48, %v4227_v60  ;;  %v4255_v7 = vadd.s32 56, %v4227_v60 }
 0x155   :  { %v3935_v10 = vpop.eup %3934  ;;  %5595 = vst [vmem:[#allocation15_spill] sm:$0xff] %v4230_v61  ;;  %5596 = vst [vmem:[#allocation16_spill] sm:$0xff] %v4233_v62  ;;  %v117_v0 = vand.u32 7, %v4230_v61  ;;  %v124_v1 = vand.u32 7, %v4233_v62  ;;  %vm1036_vm4 = vcmp.lt.s32.totalorder %v4227_v60, 1  ;;  %vm1085_vm6 = vcmp.lt.s32.totalorder %v4227_v60, 7 }
 0x156   :  { %v3937_v11 = vpop.eup %3936  ;;  %v3597_v12 = vpop.f32.mrb[12].mxu0  ;;  %v645_v13 = vpack.c.bf16 %v3935_v10, %v3931_v8  ;;  %5598 = vst [vmem:[#allocation18_spill] sm:$0xff] %v4241_v2  ;;  %5599 = vst [vmem:[#allocation19_spill] sm:$0xff] %v4245_v4  ;;  %v138_v10 = vand.u32 7, %v4241_v2  ;;  %v4401_v36 = vadd.s32 80, %v4227_v60 }
 0x157   :  { %v620_v14 = vadd.f32 %v3597_v12, %v4201_v41  ;;  %v611_v15 = vpop.f32.mrb[13].mxu0  ;;  %v644_v16 = vpack.c.bf16 %v3937_v11, %v3933_v9  ;;  %1401 = vmatpush1.bf16.msra.mxu0 %v3822_v38  ;;  %3634 = vmatpush3.bf16.msra.mxu1 %v3825_v39  ;;  %5600 = vst [vmem:[#allocation20_spill] sm:$0xff] %v4248_v5  ;;  %vm299_vm0 = vcmp.ne.s32.totalorder %v117_v0, 0  ;;  %vm4250_vm1 = vcmp.ne.s32.totalorder %v124_v1, 7 }
 0x158   :  { %v612_v17 = vadd.f32 %v4201_v41, %v611_v15  ;;  %v3598_v18 = vpop.f32.mrb[14].mxu0  ;;  %3635 = vmatprep.subr.bf16.mxu1 %v3829_v43  ;;  %5603 = vst [vmem:[#allocation21_spill] sm:$0xff] %v4255_v7  ;;  %vm4257_vm2 = vcmp.ne.s32.totalorder %v117_v0, 7  ;;  %vm4261_vm3 = vcmp.ne.s32.totalorder %v124_v1, 0  ;;  %vm4310_vm8 = vcmp.ne.s32.totalorder %v138_v10, 7  ;;  %5634 = vst [vmem:[#allocation32_spill] sm:$0xff] %v4401_v36 }
 0x159   :  { %3946 = vtanh.f32 %v620_v14  ;;  %v623_v19 = vadd.f32 %v3598_v18, %v4201_v41  ;;  %v614_v20 = vpop.f32.mrb[15].mxu0  ;;  %853 = vmatmul.mubr.bf16.gmra.mrb[4].mxu1 %v643_v63  ;;  %3619 = vmatprep.mubr.bf16.mxu0 %v644_v16  ;;  %v4236_v63 = vadd.s32 24, %v4227_v60  ;;  %v152_v14 = vand.u32 7, %v4248_v5 }
 0x15a   :  { %3948 = vtanh.f32 %v612_v17  ;;  %v615_v21 = vadd.f32 %v4201_v41, %v614_v20  ;;  %3620 = vmatmul.mubr.bf16.gmra.mrb[20].mxu0 %v645_v13  ;;  %862 = vmatprep.mubr.bf16.mxu1 %v5551_v40  ;;  %v3828_v41 = vld [vmem:[#allocation7 + $0xf4] ss:$12 sps:$4 sm:$0xff]   ;;  %v5554_v17 = vmov 0.0   ;;  %vm4327_vm11 = vcmp.ne.s32.totalorder %v138_v10, 0 }
 0x15b   :  { %v3939_v22 = vpop.eup %3938  ;;  %3950 = vtanh.f32 %v623_v19  ;;  %1402 = vmatprep.subr.bf16.mxu0 %v3828_v41  ;;  %3636 = vmatpush3.bf16.msra.mxu1 %v3829_v43  ;;  %5597 = vst [vmem:[#allocation17_spill] sm:$0xff] %v4236_v63  ;;  %v131_v3 = vand.u32 7, %v4236_v63  ;;  %v4278_v18 = vsel %vm299_vm0, 1.0, %v5554_v17  ;;  %v4285_v20 = vsel %vm4250_vm1, 1.0, %v5554_v17 }
 0x15c   :  { %v3941_v23 = vpop.eup %3940  ;;  %3952 = vtanh.f32 %v615_v21  ;;  %1403 = vmatpush1.bf16.msra.mxu0 %v3826_v42  ;;  %3637 = vmatprep.subr.bf16.mxu1 %v3833_v46  ;;  %vm4318_vm10 = vcmp.ne.s32.totalorder %v152_v14, 7  ;;  %vm4376_vm14 = vcmp.ne.s32.totalorder %v152_v14, 0  ;;  %v4385_v9 = vadd.s32 120, %v4227_v60 }
 0x15d   :  { %v3943_v24 = vpop.eup %3942  ;;  %1404 = vmatprep.subr.bf16.mxu0 %v3832_v44  ;;  %vm4269_vm5 = vcmp.ne.s32.totalorder %v131_v3, 0  ;;  %vm4299_vm7 = vcmp.ne.s32.totalorder %v131_v3, 7  ;;  %v4406_v42 = vadd.s32 88, %v4227_v60 }
 0x15e   :  { %v3945_v25 = vpop.eup %3944  ;;  %v647_v26 = vpack.c.bf16 %v3943_v24, %v3939_v22  ;;  %v4297_v24 = vsel %vm4261_vm3, 1.0, %v5554_v17  ;;  %5631 = vst [vmem:[#allocation29_spill] sm:$0xff] %v4385_v9 }
 0x15f   :  { %v646_v27 = vpack.c.bf16 %v3945_v25, %v3941_v23  ;;  %3638 = vmatpush3.bf16.msra.mxu1 %v3833_v46  ;;  %v4292_v23 = vsel %vm4257_vm2, 1.0, %v5554_v17  ;;  %5635 = vst [vmem:[#allocation33_spill] sm:$0xff] %v4406_v42 }
 0x160   :  { %1405 = vmatpush1.bf16.msra.mxu0 %v3830_v45  ;;  %3639 = vmatprep.subr.bf16.mxu1 %v3837_v49 }
 0x161   :  { %863 = vmatmul.mubr.bf16.gmra.mrb[8].mxu1 %v644_v16  ;;  %3623 = vmatprep.mubr.bf16.mxu0 %v646_v27 }
 0x162   :  { %3624 = vmatmul.mubr.bf16.gmra.mrb[24].mxu0 %v647_v26  ;;  %872 = vmatprep.mubr.bf16.mxu1 %v5551_v40 }
 0x163   :  { %v3947_v28 = vpop.eup %3946  ;;  %1406 = vmatprep.subr.bf16.mxu0 %v3836_v47  ;;  %3640 = vmatpush3.bf16.msra.mxu1 %v3837_v49  ;;  %v4345_v47 = vsel %vm4299_vm7, 1.0, %v5554_v17 }
 0x164   :  { %v3949_v29 = vpop.eup %3948  ;;  %1407 = vmatpush1.bf16.msra.mxu0 %v3834_v48  ;;  %3641 = vmatprep.subr.bf16.mxu1 %v3841_v52  ;;  %5621 = vst [vmem:[#allocation23_spill] sm:$0xff] %v4345_v47  ;;  %v4350_v48 = vsel %vm4310_vm8, 1.0, %v5554_v17 }
 0x165   :  { %v3951_v30 = vpop.eup %3950  ;;  %1408 = vmatprep.subr.bf16.mxu0 %v3840_v50  ;;  %5622 = vst [vmem:[#allocation24_spill] sm:$0xff] %v4350_v48 }
 0x166   :  { %v3953_v31 = vpop.eup %3952  ;;  %v649_v32 = vpack.c.bf16 %v3951_v30, %v3947_v28 }
 0x167   :  { %v648_v33 = vpack.c.bf16 %v3953_v31, %v3949_v29  ;;  %3642 = vmatpush3.bf16.msra.mxu1 %v3841_v52  ;;  %v4308_v31 = vsel %vm4269_vm5, 1.0, %v5554_v17 }
 0x168   :  { %1409 = vmatpush1.bf16.msra.mxu0 %v3838_v51  ;;  %3643 = vmatprep.subr.bf16.mxu1 %v3845_v55  ;;  %5612 = vst [vmem:[#allocation22_spill] sm:$0xff] %v4308_v31 }
 0x169   :  { %873 = vmatmul.mubr.bf16.gmra.mrb[12].mxu1 %v645_v13  ;;  %3627 = vmatprep.mubr.bf16.mxu0 %v648_v33  ;;  %v145_v13 = vand.u32 7, %v4245_v4 }
 0x16a   :  { %3628 = vmatmul.mubr.bf16.gmra.mrb[28].mxu0 %v649_v32  ;;  %882 = vmatprep.mubr.bf16.mxu1 %v5551_v40 }
 0x16b   :  { %1430 = vmatprep.mubr.bf16.mxu0 %v5551_v40  ;;  %1410 = vmatprep.subr.bf16.mxu0 %v3844_v53  ;;  %vm4314_vm9 = vcmp.ne.s32.totalorder %v145_v13, 7  ;;  %vm303_vm12 = vcmp.ne.s32.totalorder %v145_v13, 0  ;;  %v4361_v53 = vsel %vm4318_vm10, 1.0, %v5554_v17 }
 0x16c   :  { %1411 = vmatpush1.bf16.msra.mxu0 %v3842_v54  ;;  %3644 = vmatpush3.bf16.msra.mxu1 %v3845_v55  ;;  %v4356_v52 = vsel %vm4314_vm9, 1.0, %v5554_v17  ;;  %5624 = vst [vmem:[#allocation26_spill] sm:$0xff] %v4361_v53 }
 0x16d   :  { %1412 = vmatprep.subr.bf16.mxu0 %v3848_v56  ;;  %3645 = vmatprep.subr.bf16.mxu1 %v3849_v57  ;;  %5623 = vst [vmem:[#allocation25_spill] sm:$0xff] %v4356_v52 }
 0x170   :  { %1413 = vmatpush1.bf16.msra.mxu0 %v3846_v58  ;;  %3646 = vmatpush3.bf16.msra.mxu1 %v3849_v57  ;;  %v4366_v57 = vsel %vm4327_vm11, 1.0, %v5554_v17  ;;  %v4369_v58 = vsel %vm303_vm12, 1.0, %v5554_v17 }
 0x171   :  { %883 = vmatmul.mubr.bf16.gmra.mrb[16].mxu1 %v646_v27  ;;  %5625 = vst [vmem:[#allocation27_spill] sm:$0xff] %v4366_v57  ;;  %5626 = vst [vmem:[#allocation28_spill] sm:$0xff] %v4369_v58 }
 0x172   :  { %892 = vmatprep.mubr.bf16.mxu1 %v5551_v40 }
 0x179   :  { %893 = vmatmul.mubr.bf16.gmra.mrb[20].mxu1 %v647_v26  ;;  %v159_v26 = vand.u32 7, %v4255_v7 }
 0x17a   :  { %902 = vmatprep.mubr.bf16.mxu1 %v5551_v40 }
 0x17b   :  { %vm353_vm13 = vcmp.ne.s32.totalorder %v159_v26, 7  ;;  %vm4380_vm15 = vcmp.ne.s32.totalorder %v159_v26, 0  ;;  %v4391_v26 = vadd.s32 64, %v4227_v60 }
 0x17c   :  { %v4372_v59 = vsel %vm353_vm13, 1.0, %v5554_v17 }
 0x17d   :  { %5632 = vst [vmem:[#allocation30_spill] sm:$0xff] %v4391_v26 }
 0x181   :  { %903 = vmatmul.mubr.bf16.gmra.mrb[24].mxu1 %v648_v33 }
 0x182   :  { %912 = vmatprep.mubr.bf16.mxu1 %v5551_v40 }
 0x189   :  { %913 = vmatmul.mubr.bf16.gmra.mrb[28].mxu1 %v649_v32  ;;  %v4394_v32 = vadd.s32 72, %v4227_v60 }
 0x18b   :  { %5633 = vst [vmem:[#allocation31_spill] sm:$0xff] %v4394_v32 }
 0x224   :  { %v4266_v11 = vpop.f32.mrb[0].mxu1 }
 0x225   :  { %v4275_v15 = vpop.f32.mrb[1].mxu1  ;;  %v3617_v16 = vpop.f32.mrb[16].mxu0  ;;  %v5553_v27 = vrot.slane %v4266_v11, 7 }
 0x226   :  { %v848_v21 = vpop.f32.mrb[2].mxu1  ;;  %v4287_v22 = vpop.f32.mrb[17].mxu0  ;;  %v1071_v33 = vrot.slane %v3617_v16, 1 }
 0x227   :  { %v1021_v28 = vrot.slane %v848_v21, 7  ;;  %v850_v29 = vpop.f32.mrb[3].mxu1  ;;  %v3618_v30 = vpop.f32.mrb[18].mxu0  ;;  %v5556_v38 = vrot.slane %v4287_v22, 1 }
 0x228   :  { %v1072_v34 = vrot.slane %v3618_v30, 1  ;;  %v960_v35 = vpop.f32.mrb[19].mxu0 }
 0x229   :  { %v1051_v39 = vsel %vm1036_vm4, %v5553_v27, %v1021_v28  ;;  %v1070_v41 = vrot.slane %v960_v35, 1 }
 0x22a   :  { %v1054_v43 = vmul.f32 %v4278_v18, %v1051_v39  ;;  %v1098_v44 = vsel %vm1085_vm6, %v1071_v33, %v1072_v34 }
 0x22b   :  { %v1099_v45 = vsel %vm1085_vm6, %v1070_v41, %v1071_v33  ;;  %v4340_v46 = vsel %vm1085_vm6, %v5556_v38, %v1070_v41  ;;  %v1104_v37 = vmul.f32 %v4285_v20, %v1098_v44  ;;  %v4422_v44 = vld [vmem:[%s5545_s4] ss:$0 sm:$0xff] }
 0x22c   :  { %v1119_v49 = vadd.f32 %v1054_v43, %v850_v29  ;;  %v1103_v50 = vmul.f32 %v4292_v23, %v1099_v45  ;;  %v854_v51 = vpop.f32.mrb[4].mxu1 }
 0x22d   :  { %v1022_v54 = vrot.slane %v854_v51, 7  ;;  %v856_v55 = vpop.f32.mrb[5].mxu1  ;;  %v3621_v56 = vpop.f32.mrb[20].mxu0 }
 0x22e   :  { %v4374_v0 = vadd.f32 %v1119_v49, %v1103_v50  ;;  %v858_v1 = vpop.f32.mrb[6].mxu1  ;;  %v973_v3 = vpop.f32.mrb[21].mxu0  ;;  %v1075_v12 = vrot.slane %v3621_v56, 1  ;;  %v4417_v49 = vsel %vm4376_vm14, 1.0, %v5554_v17  ;;  %v4428_v56 = vsel %vm4380_vm15, 1.0, %v5554_v17 }
 0x22f   :  { %v1050_v10 = vsel %vm1036_vm4, %v1021_v28, %v1022_v54  ;;  %v1023_v13 = vrot.slane %v858_v1, 7  ;;  %v1073_v16 = vrot.slane %v973_v3, 1  ;;  %v860_v21 = vpop.f32.mrb[7].mxu1  ;;  %v3622_v25 = vpop.f32.mrb[22].mxu0  ;;  %5636 = vst [vmem:[#allocation34_spill] sm:$0xff] %v4417_v49  ;;  %5637 = vst [vmem:[#allocation35_spill] sm:$0xff] %v4428_v56 }
 0x230   :  { %v1055_v14 = vmul.f32 %v4297_v24, %v1050_v10  ;;  %v1076_v29 = vrot.slane %v3622_v25, 1  ;;  %v976_v30 = vpop.f32.mrb[23].mxu0  ;;  %v166_v10 = vand.u32 7, %v4391_v26 }
 0x231   :  { %v1097_v33 = vsel %vm1085_vm6, %v1072_v34, %v1073_v16  ;;  %v1049_v28 = vsel %vm1036_vm4, %v1022_v54, %v1023_v13  ;;  %v1074_v35 = vrot.slane %v976_v30, 1 }
 0x232   :  { %v1120_v39 = vadd.f32 %v1055_v14, %v856_v55  ;;  %v1056_v41 = vmul.f32 %v4308_v31, %v1049_v28  ;;  %v1094_v43 = vsel %vm1085_vm6, %v1075_v12, %v1076_v29  ;;  %v1105_v51 = vmul.f32 %v4345_v47, %v1097_v33 }
 0x233   :  { %v1095_v34 = vsel %vm1085_vm6, %v1074_v35, %v1075_v12  ;;  %v1096_v45 = vsel %vm1085_vm6, %v1073_v16, %v1074_v35  ;;  %v173_v12 = vand.u32 7, %v4394_v32  ;;  %v4443_v16 = vld [vmem:[%s5546_s5] ss:$0 sm:$0xff]  ;;  %vm4452_vm0 = vcmp.ne.s32.totalorder %v166_v10, 7 }
 0x234   :  { %v1136_v50 = vadd.f32 %v1120_v39, %v1104_v37  ;;  %v1121_v54 = vadd.f32 %v1056_v41, %v860_v21  ;;  %v864_v55 = vpop.f32.mrb[8].mxu1  ;;  %v1106_v19 = vmul.f32 %v4350_v48, %v1096_v45  ;;  %vm4480_vm2 = vcmp.ne.s32.totalorder %v166_v10, 0 }
 0x235   :  { %v1024_v1 = vrot.slane %v864_v55, 7  ;;  %v866_v3 = vpop.f32.mrb[9].mxu1  ;;  %v3625_v6 = vpop.f32.mrb[24].mxu0  ;;  %vm4468_vm1 = vcmp.ne.s32.totalorder %v173_v12, 7  ;;  %vm4484_vm3 = vcmp.ne.s32.totalorder %v173_v12, 0 }
 0x236   :  { %v1157_v25 = vadd.f32 %v4422_v44, %v1136_v50  ;;  %v1137_v14 = vadd.f32 %v1121_v54, %v1105_v51  ;;  %v868_v30 = vpop.f32.mrb[10].mxu1  ;;  %v989_v21 = vpop.f32.mrb[25].mxu0  ;;  %v1079_v35 = vrot.slane %v3625_v6, 1 }
 0x237   :  { %v1048_v28 = vsel %vm1036_vm4, %v1023_v13, %v1024_v1  ;;  %v1025_v37 = vrot.slane %v868_v30, 7  ;;  %v1077_v39 = vrot.slane %v989_v21, 1  ;;  %v870_v41 = vpop.f32.mrb[11].mxu1  ;;  %v3626_v55 = vpop.f32.mrb[26].mxu0 }
 0x238   :  { %v1173_v40 = vmax.f32 %v1157_v25, 0.0  ;;  %v1158_v27 = vadd.f32 %v4422_v44, %v1137_v14  ;;  %v1057_v50 = vmul.f32 %v4366_v57, %v1048_v28  ;;  %v1080_v51 = vrot.slane %v3626_v55, 1  ;;  %v992_v54 = vpop.f32.mrb[27].mxu0 }
 0x239   :  { %v1093_v13 = vsel %vm1085_vm6, %v1076_v29, %v1077_v39  ;;  %v1047_v6 = vsel %vm1036_vm4, %v1024_v1, %v1025_v37  ;;  %v1078_v25 = vrot.slane %v992_v54, 1  ;;  %v1107_v54 = vmul.f32 %v4356_v52, %v1095_v34 }
 0x23a   :  { %v1194_v14 = vmul.f32 %v4443_v16, %v1173_v40  ;;  %v1174_v30 = vmax.f32 %v1158_v27, 0.0  ;;  %v1122_v21 = vadd.f32 %v1057_v50, %v866_v3  ;;  %v1058_v28 = vmul.f32 %v4369_v58, %v1047_v6  ;;  %v4475_v27 = vld [vmem:[%s5547_s6] ss:$0 sm:$0xff] }
 0x23b   :  { %v4458_v45 = vsel %vm1085_vm6, %v1079_v35, %v1080_v51  ;;  %v4462_v29 = vsel %vm1085_vm6, %v1078_v25, %v1079_v35  ;;  %v4466_v1 = vsel %vm1085_vm6, %v1077_v39, %v1078_v25  ;;  %v1108_v39 = vmul.f32 %v4361_v53, %v1094_v43 }
 0x23c   :  { %v1195_v3 = vmul.f32 %v4443_v16, %v1174_v30  ;;  %v1138_v50 = vadd.f32 %v1122_v21, %v1106_v19  ;;  %v1123_v35 = vadd.f32 %v1058_v28, %v870_v41  ;;  %v874_v6 = vpop.f32.mrb[12].mxu1  ;;  %v1215_v30 = vadd.f32 %v4475_v27, %v1194_v14 }
 0x23d   :  { %v1026_v8 = vrot.slane %v874_v6, 7  ;;  %v876_v17 = vpop.f32.mrb[13].mxu1  ;;  %v3629_v25 = vpop.f32.mrb[28].mxu0 }
 0x23e   :  { %v1216_v19 = vadd.f32 %v4475_v27, %v1195_v3  ;;  %v1159_v34 = vadd.f32 %v4422_v44, %v1138_v50  ;;  %v1139_v41 = vadd.f32 %v1123_v35, %v1107_v54  ;;  %v878_v21 = vpop.f32.mrb[14].mxu1  ;;  %v1005_v28 = vpop.f32.mrb[29].mxu0  ;;  %v1083_v10 = vrot.slane %v3629_v25, 1 }
 0x23f   :  { %v1046_v43 = vsel %vm1036_vm4, %v1025_v37, %v1026_v8  ;;  %v1027_v6 = vrot.slane %v878_v21, 7  ;;  %v1081_v32 = vrot.slane %v1005_v28, 1  ;;  %v880_v26 = vpop.f32.mrb[15].mxu1  ;;  %v3630_v12 = vpop.f32.mrb[30].mxu0  ;;  %v5646_v50 = vand.u32 7, %v4401_v36 }
 0x240   :  { %v4493_v7 = vpack.c.bf16 %v1216_v19, %v1215_v30  ;;  %v1175_v5 = vmax.f32 %v1159_v34, 0.0  ;;  %v1160_v14 = vadd.f32 %v4422_v44, %v1139_v41  ;;  %v1059_v3 = vmul.f32 %v4417_v49, %v1046_v43  ;;  %v1008_v35 = vpop.f32.mrb[31].mxu0 }
 0x241   :  { %vm4499_vm5 = vcmp.ne.s32.totalorder %v5646_v50, 7  ;;  %v4505_v37 = vsel %vm1085_vm6, %v1080_v51, %v1081_v32  ;;  %v1045_v25 = vsel %vm1036_vm4, %v1026_v8, %v1027_v6  ;;  %v1084_v30 = vrot.slane %v3630_v12, 1 }
 0x242   :  { %v1082_v19 = vrot.slane %v1008_v35, 1  ;;  %v1176_v34 = vmax.f32 %v1160_v14, 0.0  ;;  %v1124_v41 = vadd.f32 %v1059_v3, %v876_v17  ;;  %v1060_v21 = vmul.f32 %v4428_v56, %v1045_v25 }
 0x243   :  { %v1109_v28 = vmul.f32 %v4372_v59, %v1093_v13  ;;  %v1196_v43 = vmul.f32 %v4443_v16, %v1175_v5  ;;  %v4514_v50 = vsel %vm1085_vm6, %v1083_v10, %v1084_v30  ;;  %v5649_v51 = vrot.slane %v4287_v22, 1 }
 0x244   :  { %v4524_v8 = vsel %vm1085_vm6, %v1082_v19, %v1083_v10  ;;  %v1197_v17 = vmul.f32 %v4443_v16, %v1176_v34  ;;  %v1140_v12 = vadd.f32 %v1124_v41, %v1108_v39  ;;  %v1125_v13 = vadd.f32 %v1060_v21, %v880_v26  ;;  %v884_v14 = vpop.f32.mrb[16].mxu1 }
 0x245   :  { %v4520_v4 = vsel %vm1085_vm6, %v1084_v30, %v5649_v51  ;;  %v4529_v5 = vsel %vm1085_vm6, %v1081_v32, %v1082_v19  ;;  %v1028_v3 = vrot.slane %v884_v14, 7  ;;  %v5650_v35 = vmov 0.0   ;;  %v886_v25 = vpop.f32.mrb[17].mxu1 }
 0x246   :  { %v4534_v22 = vsel %vm4480_vm2, 1.0, %v5650_v35  ;;  %v4539_v10 = vsel %vm4452_vm0, 1.0, %v5650_v35  ;;  %v4544_v26 = vsel %vm4468_vm1, 1.0, %v5650_v35  ;;  %v1161_v32 = vadd.f32 %v4422_v44, %v1140_v12  ;;  %v888_v30 = vpop.f32.mrb[18].mxu1 }
 0x247   :  { %v1141_v39 = vadd.f32 %v1125_v13, %v1109_v28  ;;  %v4550_v38 = vsel %vm4484_vm3, 1.0, %v5650_v35  ;;  %v5651_v19 = vand.u32 7, %v4406_v42  ;;  %v1044_v40 = vsel %vm1036_vm4, %v1027_v6, %v1028_v3  ;;  %v890_v41 = vpop.f32.mrb[19].mxu1 }
 0x248   :  { %v1029_v34 = vrot.slane %v888_v30, 7  ;;  %v1217_v21 = vadd.f32 %v4475_v27, %v1196_v43  ;;  %v1218_v28 = vadd.f32 %v4475_v27, %v1197_v17  ;;  %v1177_v51 = vmax.f32 %v1161_v32, 0.0 }
 0x249   :  { %vm4554_vm7 = vcmp.ne.s32.totalorder %v5651_v19, 7  ;;  %v1162_v33 = vadd.f32 %v4422_v44, %v1141_v39  ;;  %v1061_v12 = vmul.f32 %v4534_v22, %v1044_v40  ;;  %v5654_v13 = vand.u32 7, %v4401_v36 }
 0x24a   :  { %v1110_v6 = vmul.f32 %v4539_v10, %v4466_v1  ;;  %v1043_v30 = vsel %vm1036_vm4, %v1028_v3, %v1029_v34  ;;  %v4575_v43 = vadd.s32 96, %v4227_v60  ;;  %v4577_v17 = vpack.c.bf16 %v1218_v28, %v1217_v21 }
 0x24b   :  { %vm4566_vm8 = vcmp.ne.s32.totalorder %v5654_v13, 0  ;;  %v1198_v32 = vmul.f32 %v4443_v16, %v1177_v51  ;;  %v1178_v39 = vmax.f32 %v1162_v33, 0.0  ;;  %v1126_v19 = vadd.f32 %v1061_v12, %v886_v25 }
 0x24c   :  { %5657 = vst [vmem:[#allocation36_spill] sm:$0xff] %v4575_v43  ;;  %v1062_v40 = vmul.f32 %v4550_v38, %v1043_v30  ;;  %v4584_v13 = vsel %vm4499_vm5, 1.0, %v5650_v35  ;;  %v5658_v1 = vand.u32 7, %v4406_v42  ;;  %v4595_v21 = vsel %vm4554_vm7, 1.0, %v5650_v35  ;;  %v894_v12 = vpop.f32.mrb[20].mxu1 }
 0x24d   :  { %v4598_v25 = vadd.s32 104, %v4227_v60  ;;  %v1199_v28 = vmul.f32 %v4443_v16, %v1178_v39  ;;  %v1142_v51 = vadd.f32 %v1126_v19, %v1110_v6  ;;  %v1111_v54 = vmul.f32 %v4544_v26, %v4462_v29  ;;  %v896_v55 = vpop.f32.mrb[21].mxu1 }
 0x24e   :  { %vm4588_vm9 = vcmp.ne.s32.totalorder %v5658_v1, 0  ;;  %v1127_v33 = vadd.f32 %v1062_v40, %v890_v41  ;;  %v1030_v30 = vrot.slane %v894_v12, 7  ;;  %v4606_v1 = vsel %vm4566_vm8, 1.0, %v5650_v35  ;;  %v898_v19 = vpop.f32.mrb[22].mxu1 }
 0x24f   :  { %5661 = vst [vmem:[#allocation37_spill] sm:$0xff] %v4598_v25  ;;  %v194_v42 = vand.u32 7, %v4575_v43  ;;  %v4610_v36 = vadd.s32 112, %v4227_v60  ;;  %v1163_v39 = vadd.f32 %v4422_v44, %v1142_v51  ;;  %v1219_v29 = vadd.f32 %v4475_v27, %v1198_v32  ;;  %v900_v43 = vpop.f32.mrb[23].mxu1 }
 0x250   :  { %v1143_v6 = vadd.f32 %v1127_v33, %v1111_v54  ;;  %v1220_v41 = vadd.f32 %v4475_v27, %v1199_v28  ;;  %v1042_v40 = vsel %vm1036_vm4, %v1029_v34, %v1030_v30  ;;  %v1031_v14 = vrot.slane %v898_v19, 7 }
 0x251   :  { %5662 = vst [vmem:[#allocation38_spill] sm:$0xff] %v4610_v36  ;;  %v4620_v12 = vsel %vm4588_vm9, 1.0, %v5650_v35  ;;  %v201_v2 = vand.u32 7, %v4598_v25  ;;  %v1179_v63 = vmax.f32 %v1163_v39, 0.0  ;;  %v1063_v54 = vmul.f32 %v4606_v1, %v1042_v40 }
 0x252   :  { %v1164_v51 = vadd.f32 %v4422_v44, %v1143_v6  ;;  %v4625_v32 = vpack.c.bf16 %v1220_v41, %v1219_v29  ;;  %v1112_v28 = vmul.f32 %v4584_v13, %v4458_v45  ;;  %v1041_v34 = vsel %vm1036_vm4, %v1030_v30, %v1031_v14 }
 0x253   :  { %vm4631_vm10 = vcmp.ne.s32.totalorder %v194_v42, 0  ;;  %vm4635_vm11 = vcmp.ne.s32.totalorder %v194_v42, 7  ;;  %v1200_v39 = vmul.f32 %v4443_v16, %v1179_v63  ;;  %v1128_v19 = vadd.f32 %v1063_v54, %v896_v55 }
 0x254   :  { %v1180_v6 = vmax.f32 %v1164_v51, 0.0  ;;  %v1064_v29 = vmul.f32 %v4620_v12, %v1041_v34  ;;  %v5667_v41 = vand.u32 7, %v4227_v60  ;;  %vm4647_vm13 = vcmp.ne.s32.totalorder %v201_v2, 0 }
 0x255   :  { %v208_v42 = vand.u32 7, %v4610_v36  ;;  %v5672_v40 = vand.u32 7, %v4385_v9  ;;  %v1144_v51 = vadd.f32 %v1128_v19, %v1112_v28  ;;  %v1113_v54 = vmul.f32 %v4595_v21, %v4505_v37 }
 0x256   :  { %vm4643_vm12 = vcmp.ne.s32.totalorder %v5667_v41, 7  ;;  %v1201_v55 = vmul.f32 %v4443_v16, %v1180_v6  ;;  %v1129_v34 = vadd.f32 %v1064_v29, %v900_v43  ;;  %v904_v41 = vpop.f32.mrb[24].mxu1  ;;  %v4664_v62 = vsel %vm4631_vm10, 1.0, %v5650_v35 }
 0x257   :  { %vm4654_vm14 = vcmp.ne.s32.totalorder %v5672_v40, 7  ;;  %v1032_v25 = vrot.slane %v904_v41, 7  ;;  %v4669_v40 = vsel %vm4635_vm11, 1.0, %v5650_v35  ;;  %v906_v36 = vpop.f32.mrb[25].mxu1  ;;  %vm4671_vm15 = vcmp.ne.s32.totalorder %v201_v2, 7 }
 0x258   :  { %v1165_v37 = vadd.f32 %v4422_v44, %v1144_v51  ;;  %v1145_v43 = vadd.f32 %v1129_v34, %v1113_v54  ;;  %v908_v28 = vpop.f32.mrb[26].mxu1  ;;  %v1221_v19 = vadd.f32 %v4475_v27, %v1200_v39  ;;  %v1222_v3 = vadd.f32 %v4475_v27, %v1201_v55 }
 0x259   :  { %v1040_v29 = vsel %vm1036_vm4, %v1031_v14, %v1032_v25  ;;  %v1033_v41 = vrot.slane %v908_v28, 7  ;;  %v4683_v33 = vsel %vm4647_vm13, 1.0, %v5650_v35  ;;  %v910_v2 = vpop.f32.mrb[27].mxu1  ;;  %vm4685_vm0 = vcmp.ne.s32.totalorder %v208_v42, 7 }
 0x25a   :  { %v1181_v51 = vmax.f32 %v1165_v37, 0.0  ;;  %v1166_v54 = vadd.f32 %v4422_v44, %v1145_v43  ;;  %v1065_v39 = vmul.f32 %v4664_v62, %v1040_v29  ;;  %v4691_v55 = vpack.c.bf16 %v1222_v3, %v1221_v19 }
 0x25b   :  { %v1114_v14 = vmul.f32 %v4669_v40, %v4529_v5  ;;  %v4698_v30 = vsel %vm4671_vm15, 1.0, %v5650_v35  ;;  %v1039_v34 = vsel %vm1036_vm4, %v1032_v25, %v1033_v41  ;;  %vm312_vm1 = vcmp.ne.s32.totalorder %v208_v42, 0 }
 0x25c   :  { %5679 = vst [vmem:[#allocation39_spill] sm:$0xff] %v4698_v30  ;;  %v1202_v37 = vmul.f32 %v4443_v16, %v1181_v51  ;;  %v1182_v28 = vmax.f32 %v1166_v54, 0.0  ;;  %v1130_v43 = vadd.f32 %v1065_v39, %v906_v36  ;;  %v1066_v29 = vmul.f32 %v4683_v33, %v1039_v34  ;;  %v914_v54 = vpop.f32.mrb[28].mxu1 }
 0x25d   :  { %v4707_v19 = vsel %vm4643_vm12, 1.0, %v5650_v35  ;;  %v5680_v5 = vand.u32 7, %v4227_v60  ;;  %v5683_v25 = vand.u32 7, %v4385_v9  ;;  %v1115_v45 = vmul.f32 %v4698_v30, %v4524_v8 }
 0x25e   :  { %v1203_v36 = vmul.f32 %v4443_v16, %v1182_v28  ;;  %v1146_v3 = vadd.f32 %v1130_v43, %v1114_v14  ;;  %v1131_v51 = vadd.f32 %v1066_v29, %v910_v2  ;;  %v1034_v39 = vrot.slane %v914_v54, 7 }
 0x25f   :  { %vm4711_vm2 = vcmp.ne.s32.totalorder %v5680_v5, 0  ;;  %vm4717_vm3 = vcmp.ne.s32.totalorder %v5683_v25, 0  ;;  %v4725_v34 = vsel %vm312_vm1, 1.0, %v5650_v35  ;;  %v4730_v5 = vsel %vm4685_vm0, 1.0, %v5650_v35  ;;  %v916_v25 = vpop.f32.mrb[29].mxu1 }
 0x260   :  { %v4735_v28 = vsel %vm4654_vm14, 1.0, %v5650_v35  ;;  %v1167_v14 = vadd.f32 %v4422_v44, %v1146_v3  ;;  %v1147_v8 = vadd.f32 %v1131_v51, %v1115_v45  ;;  %v918_v2 = vpop.f32.mrb[30].mxu1  ;;  %v1223_v43 = vadd.f32 %v4475_v27, %v1202_v37 }
 0x261   :  { %v1224_v29 = vadd.f32 %v4475_v27, %v1203_v36  ;;  %v1038_v54 = vsel %vm1036_vm4, %v1033_v41, %v1034_v39  ;;  %v4745_v61 = vsel %vm4711_vm2, 1.0, %v5650_v35  ;;  %v1035_v9 = vrot.slane %v918_v2, 7  ;;  %v920_v3 = vpop.f32.mrb[31].mxu1 }
 0x262   :  { %v4750_v63 = vsel %vm4717_vm3, 1.0, %v5650_v35  ;;  %v1183_v45 = vmax.f32 %v1167_v14, 0.0  ;;  %v1168_v37 = vadd.f32 %v4422_v44, %v1147_v8  ;;  %v1067_v36 = vmul.f32 %v4725_v34, %v1038_v54 }
 0x263   :  { %v1234_v51 = vpack.c.bf16 %v1224_v29, %v1223_v43  ;;  %v1156_v41 = vadd.f32 %v4422_v44, %v4374_v0  ;;  %v1116_v6 = vmul.f32 %v4730_v5, %v4514_v50  ;;  %v5686_v2 = vrot.slane %v4266_v11, 7 }
 0x264   :  { %v1037_v35 = vsel %vm1036_vm4, %v1034_v39, %v1035_v9  ;;  %v1204_v14 = vmul.f32 %v4443_v16, %v1183_v45  ;;  %v1184_v8 = vmax.f32 %v1168_v37, 0.0  ;;  %v1132_v30 = vadd.f32 %v1067_v36, %v916_v25 }
 0x265   :  { %v1052_v42 = vsel %vm1036_vm4, %v1035_v9, %v5686_v2  ;;  %v1068_v29 = vmul.f32 %v4750_v63, %v1037_v35  ;;  %v1102_v0 = vmul.f32 %v4707_v19, %v4340_v46  ;;  %v1172_v2 = vmax.f32 %v1156_v41, 0.0 }
 0x266   :  { %v1053_v43 = vmul.f32 %v4745_v61, %v1052_v42  ;;  %v1205_v50 = vmul.f32 %v4443_v16, %v1184_v8  ;;  %v1148_v11 = vadd.f32 %v1132_v30, %v1116_v6  ;;  %v1117_v9 = vmul.f32 %v4735_v28, %v4520_v4 }
 0x267   :  { %v1133_v39 = vadd.f32 %v1068_v29, %v920_v3  ;;  %v1225_v37 = vadd.f32 %v4475_v27, %v1204_v14 }
 0x268   :  { %v1118_v54 = vadd.f32 %v1053_v43, %v4275_v15  ;;  %v1169_v45 = vadd.f32 %v4422_v44, %v1148_v11  ;;  %v1226_v36 = vadd.f32 %v4475_v27, %v1205_v50  ;;  %v1193_v15 = vmul.f32 %v4443_v16, %v1172_v2  ;;  %v3857_v2 = vld [vmem:[#allocation7 + $0x1a0] ss:$12 sps:$4 sm:$0xff]  }
 0x269   :  { %v1149_v42 = vadd.f32 %v1133_v39, %v1117_v9  ;;  %v3861_v9 = vld [vmem:[#allocation7 + $0x1b8] ss:$12 sps:$4 sm:$0xff]  }
 0x26a   :  { %v1134_v25 = vadd.f32 %v1118_v54, %v1102_v0  ;;  %v1185_v35 = vmax.f32 %v1169_v45, 0.0  ;;  %v1235_v8 = vpack.c.bf16 %v1226_v36, %v1225_v37  ;;  %v1214_v29 = vadd.f32 %v4475_v27, %v1193_v15  ;;  %v3864_v39 = vld [vmem:[#allocation7 + $0x1cc] ss:$12 sps:$4 sm:$0xff]   ;;  %v3862_v45 = vld [vmem:[#allocation7 + $0x1c8] ss:$12 sps:$4 sm:$0xff]  }
 0x26b   :  { %v1170_v30 = vadd.f32 %v4422_v44, %v1149_v42  ;;  %v5687_v54 = vmov 0   ;;  %v3868_v37 = vld [vmem:[#allocation7 + $0x1e4] ss:$12 sps:$4 sm:$0xff]   ;;  %v3866_v36 = vld [vmem:[#allocation7 + $0x1e0] ss:$12 sps:$4 sm:$0xff]  }
 0x26c   :  { %v1155_v46 = vadd.f32 %v4422_v44, %v1134_v25  ;;  %v1206_v4 = vmul.f32 %v4443_v16, %v1185_v35  ;;  %v3865_v25 = vld [vmem:[#allocation7 + $0x1d0] ss:$12 sps:$4 sm:$0xff]   ;;  %v3869_v42 = vld [vmem:[#allocation7 + $0x1e8] ss:$12 sps:$4 sm:$0xff]  }
 0x26d   :  { %v1186_v3 = vmax.f32 %v1170_v30, 0.0  ;;  %v3872_v35 = vld [vmem:[#allocation7 + $0x1fc] ss:$12 sps:$4 sm:$0xff]   ;;  %v3876_v30 = vld [vmem:[#allocation7 + $0x214] ss:$12 sps:$4 sm:$0xff]  }
 0x26e   :  { %v1171_v41 = vmax.f32 %v1155_v46, 0.0  ;;  %v1227_v0 = vadd.f32 %v4475_v27, %v1206_v4  ;;  %v3870_v46 = vld [vmem:[#allocation7 + $0x1f8] ss:$12 sps:$4 sm:$0xff]   ;;  %v3874_v15 = vld [vmem:[#allocation7 + $0x210] ss:$12 sps:$4 sm:$0xff]  }
 0x26f   :  { %v1207_v43 = vmul.f32 %v4443_v16, %v1186_v3  ;;  %v3880_v4 = vld [vmem:[#allocation7 + $0x22c] ss:$12 sps:$4 sm:$0xff]   ;;  %v3881_v3 = vld [vmem:[#allocation7 + $0x230] ss:$12 sps:$4 sm:$0xff]  }
 0x270   :  { %v1192_v6 = vmul.f32 %v4443_v16, %v1171_v41  ;;  %v3850_v16 = vld [vmem:[#allocation7 + $0x180] ss:$12 sps:$4 sm:$0xff]   ;;  %v3877_v41 = vld [vmem:[#allocation7 + $0x218] ss:$12 sps:$4 sm:$0xff]  }
 0x271   :  { %v1228_v50 = vadd.f32 %v4475_v27, %v1207_v43 }
 0x272   :  { %v1213_v14 = vadd.f32 %v4475_v27, %v1192_v6  ;;  %v3853_v27 = vld [vmem:[#allocation7 + $0x188] ss:$12 sps:$4 sm:$0xff]  }
 0x273   :  { %v1236_v44 = vpack.c.bf16 %v1228_v50, %v1227_v0  ;;  %3663 = vmatprep.subr.bf16.mxu0 %v3853_v27  ;;  %v3878_v6 = vld [vmem:[#allocation7 + $0x228] ss:$12 sps:$4 sm:$0xff]  }
 0x274   :  { %v1229_v11 = vpack.c.bf16 %v1214_v29, %v1213_v14 }
 0x276   :  { %1431 = vmatmul.mubr.bf16.vlgmr.msra.gmra.mrb[32].mxu0 %v1229_v11  ;;  %3647 = vmatprep.mubr.bf16.mxu1 %v1229_v11 }
 0x277   :  { %3648 = vmatmul.mubr.bf16.vlgmr.msra.gmra.mrb[32].mxu1 %v4493_v7  ;;  %1440 = vmatprep.mubr.bf16.mxu0 %v5687_v54 }
 0x278   :  { %3651 = vmatprep.mubr.bf16.mxu1 %v4577_v17  ;;  %3664 = vmatpush3.bf16.msra.mxu0 %v3853_v27 }
 0x279   :  { %3665 = vmatprep.subr.bf16.mxu0 %v3857_v2 }
 0x27c   :  { %3666 = vmatpush3.bf16.msra.mxu0 %v3857_v2 }
 0x27d   :  { %3667 = vmatprep.subr.bf16.mxu0 %v3861_v9 }
 0x27e   :  { %1441 = vmatmul.mubr.bf16.gmra.mrb[36].mxu0 %v4493_v7  ;;  %v3852_v7 = vld [vmem:[#allocation7 + $0x184] ss:$12 sps:$4 sm:$0xff]  }
 0x27f   :  { %3652 = vmatmul.mubr.bf16.gmra.mrb[36].mxu1 %v4625_v32  ;;  %1450 = vmatprep.mubr.bf16.mxu0 %v5687_v54 }
 0x280   :  { %3655 = vmatprep.mubr.bf16.mxu1 %v4691_v55  ;;  %1984 = vmatprep.subr.bf16.mxu1 %v3852_v7 }
 0x281   :  { %1985 = vmatpush1.bf16.msra.mxu1 %v3850_v16  ;;  %3668 = vmatpush3.bf16.msra.mxu0 %v3861_v9 }
 0x282   :  { %3669 = vmatprep.subr.bf16.mxu0 %v3865_v25 }
 0x285   :  { %3670 = vmatpush3.bf16.msra.mxu0 %v3865_v25 }
 0x286   :  { %1451 = vmatmul.mubr.bf16.gmra.mrb[40].mxu0 %v4577_v17  ;;  %v3856_v17 = vld [vmem:[#allocation7 + $0x19c] ss:$12 sps:$4 sm:$0xff]   ;;  %3671 = vmatprep.subr.bf16.mxu0 %v3869_v42 }
 0x287   :  { %3656 = vmatmul.mubr.bf16.gmra.mrb[40].mxu1 %v1234_v51  ;;  %1460 = vmatprep.mubr.bf16.mxu0 %v5687_v54 }
 0x288   :  { %3659 = vmatprep.mubr.bf16.mxu1 %v1235_v8  ;;  %1986 = vmatprep.subr.bf16.mxu1 %v3856_v17 }
 0x289   :  { %3672 = vmatpush3.bf16.msra.mxu0 %v3869_v42 }
 0x28e   :  { %1461 = vmatmul.mubr.bf16.gmra.mrb[44].mxu0 %v4625_v32  ;;  %v3854_v32 = vld [vmem:[#allocation7 + $0x198] ss:$12 sps:$4 sm:$0xff]  }
 0x28f   :  { %3660 = vmatmul.mubr.bf16.gmra.mrb[44].mxu1 %v1236_v44  ;;  %1470 = vmatprep.mubr.bf16.mxu0 %v5687_v54 }
 0x290   :  { %2016 = vmatprep.mubr.bf16.mxu1 %v5687_v54  ;;  %1987 = vmatpush1.bf16.msra.mxu1 %v3854_v32 }
 0x296   :  { %1471 = vmatmul.mubr.bf16.gmra.mrb[48].mxu0 %v4691_v55  ;;  %v3860_v55 = vld [vmem:[#allocation7 + $0x1b4] ss:$12 sps:$4 sm:$0xff]  }
 0x297   :  { %1480 = vmatprep.mubr.bf16.mxu0 %v5687_v54  ;;  %1988 = vmatprep.subr.bf16.mxu1 %v3860_v55 }
 0x29e   :  { %1481 = vmatmul.mubr.bf16.gmra.mrb[52].mxu0 %v1234_v51  ;;  %v3858_v51 = vld [vmem:[#allocation7 + $0x1b0] ss:$12 sps:$4 sm:$0xff]  }
 0x29f   :  { %1490 = vmatprep.mubr.bf16.mxu0 %v5687_v54  ;;  %1989 = vmatpush1.bf16.msra.mxu1 %v3858_v51 }
 0x2a0   :  { %1990 = vmatprep.subr.bf16.mxu1 %v3864_v39 }
 0x2a3   :  { %1991 = vmatpush1.bf16.msra.mxu1 %v3862_v45 }
 0x2a4   :  { %1992 = vmatprep.subr.bf16.mxu1 %v3868_v37 }
 0x2a6   :  { %1491 = vmatmul.mubr.bf16.gmra.mrb[56].mxu0 %v1235_v8  ;;  %v3873_v8 = vld [vmem:[#allocation7 + $0x200] ss:$12 sps:$4 sm:$0xff]  }
 0x2a7   :  { %1500 = vmatprep.mubr.bf16.mxu0 %v5687_v54  ;;  %1993 = vmatpush1.bf16.msra.mxu1 %v3866_v36 }
 0x2a8   :  { %1994 = vmatprep.subr.bf16.mxu1 %v3872_v35  ;;  %3673 = vmatprep.subr.bf16.mxu0 %v3873_v8 }
 0x2a9   :  { %3674 = vmatpush3.bf16.msra.mxu0 %v3873_v8 }
 0x2aa   :  { %3675 = vmatprep.subr.bf16.mxu0 %v3877_v41 }
 0x2ab   :  { %1995 = vmatpush1.bf16.msra.mxu1 %v3870_v46 }
 0x2ac   :  { %1996 = vmatprep.subr.bf16.mxu1 %v3876_v30 }
 0x2ad   :  { %3676 = vmatpush3.bf16.msra.mxu0 %v3877_v41 }
 0x2ae   :  { %1501 = vmatmul.mubr.bf16.gmra.mrb[60].mxu0 %v1236_v44  ;;  %3677 = vmatprep.subr.bf16.mxu0 %v3881_v3 }
 0x2af   :  { %1997 = vmatpush1.bf16.msra.mxu1 %v3874_v15 }
 0x2b0   :  { %1998 = vmatprep.subr.bf16.mxu1 %v3880_v4 }
 0x2b1   :  { %3678 = vmatpush3.bf16.msra.mxu0 %v3881_v3 }
 0x2b3   :  { %1999 = vmatpush1.bf16.msra.mxu1 %v3878_v6 }
 0x349   :  { %v4802_v43 = vpop.f32.mrb[32].mxu0 }
 0x34a   :  { %v4804_v14 = vpop.f32.mrb[33].mxu0  ;;  %v3649_v29 = vpop.f32.mrb[32].mxu1  ;;  %v5574_v11 = vrot.slane %v4802_v43, 7 }
 0x34b   :  { %v1436_v0 = vpop.f32.mrb[34].mxu0  ;;  %v4806_v50 = vpop.f32.mrb[33].mxu1  ;;  %v1658_v27 = vrot.slane %v3649_v29, 1 }
 0x34c   :  { %v1609_v44 = vrot.slane %v1436_v0, 7  ;;  %v1438_v7 = vpop.f32.mrb[35].mxu0  ;;  %v3650_v16 = vpop.f32.mrb[34].mxu1  ;;  %v5575_v2 = vrot.slane %v4806_v50, 1 }
 0x34d   :  { %v1659_v17 = vrot.slane %v3650_v16, 1  ;;  %v1548_v32 = vpop.f32.mrb[35].mxu1 }
 0x34e   :  { %v1638_v55 = vsel %vm1036_vm4, %v5574_v11, %v1609_v44  ;;  %v1657_v51 = vrot.slane %v1548_v32, 1 }
 0x34f   :  { %v1641_v9 = vmul.f32 %v4278_v18, %v1638_v55  ;;  %v1684_v39 = vsel %vm1085_vm6, %v1658_v27, %v1659_v17 }
 0x350   :  { %v1685_v45 = vsel %vm1085_vm6, %v1657_v51, %v1658_v27  ;;  %v4823_v25 = vsel %vm1085_vm6, %v5575_v2, %v1657_v51 }
 0x351   :  { %v1705_v37 = vadd.f32 %v1641_v9, %v1438_v7  ;;  %v1689_v36 = vmul.f32 %v4292_v23, %v1685_v45  ;;  %v1442_v42 = vpop.f32.mrb[36].mxu0  ;;  %v1690_v45 = vmul.f32 %v4285_v20, %v1684_v39  ;;  %v4847_v39 = vld [vmem:[%s5545_s4 + $0x1] ss:$0 sm:$0xff] }
 0x352   :  { %v1610_v35 = vrot.slane %v1442_v42, 7  ;;  %v1444_v46 = vpop.f32.mrb[37].mxu0  ;;  %v3653_v8 = vpop.f32.mrb[36].mxu1 }
 0x353   :  { %v4826_v30 = vadd.f32 %v1705_v37, %v1689_v36  ;;  %v1446_v15 = vpop.f32.mrb[38].mxu0  ;;  %v1561_v41 = vpop.f32.mrb[37].mxu1  ;;  %v1662_v32 = vrot.slane %v3653_v8, 1 }
 0x354   :  { %v1637_v4 = vsel %vm1036_vm4, %v1609_v44, %v1610_v35  ;;  %v1611_v3 = vrot.slane %v1446_v15, 7  ;;  %v1660_v6 = vrot.slane %v1561_v41, 1  ;;  %v1448_v29 = vpop.f32.mrb[39].mxu0  ;;  %v3654_v0 = vpop.f32.mrb[38].mxu1 }
 0x355   :  { %v1642_v16 = vmul.f32 %v4297_v24, %v1637_v4  ;;  %v1663_v7 = vrot.slane %v3654_v0, 1  ;;  %v1564_v27 = vpop.f32.mrb[39].mxu1 }
 0x356   :  { %v1683_v55 = vsel %vm1085_vm6, %v1659_v17, %v1660_v6  ;;  %v1636_v51 = vsel %vm1036_vm4, %v1610_v35, %v1611_v3  ;;  %v1661_v9 = vrot.slane %v1564_v27, 1 }
 0x357   :  { %v1706_v37 = vadd.f32 %v1642_v16, %v1444_v46  ;;  %v1643_v44 = vmul.f32 %v4308_v31, %v1636_v51  ;;  %v1680_v36 = vsel %vm1085_vm6, %v1662_v32, %v1663_v7  ;;  %v1691_v17 = vmul.f32 %v4345_v47, %v1683_v55 }
 0x358   :  { %v1681_v42 = vsel %vm1085_vm6, %v1661_v9, %v1662_v32  ;;  %v1682_v8 = vsel %vm1085_vm6, %v1660_v6, %v1661_v9 }
 0x359   :  { %v1722_v15 = vadd.f32 %v1706_v37, %v1690_v45  ;;  %v1707_v41 = vadd.f32 %v1643_v44, %v1448_v29  ;;  %v1452_v35 = vpop.f32.mrb[40].mxu0  ;;  %v1692_v55 = vmul.f32 %v4350_v48, %v1682_v8 }
 0x35a   :  { %v1612_v46 = vrot.slane %v1452_v35, 7  ;;  %v1454_v4 = vpop.f32.mrb[41].mxu0  ;;  %v3657_v0 = vpop.f32.mrb[40].mxu1 }
 0x35b   :  { %v1743_v16 = vadd.f32 %v4847_v39, %v1722_v15  ;;  %v1723_v27 = vadd.f32 %v1707_v41, %v1691_v17  ;;  %v1456_v32 = vpop.f32.mrb[42].mxu0  ;;  %v1577_v51 = vpop.f32.mrb[41].mxu1  ;;  %v4858_v15 = vld [vmem:[%s5546_s5 + $0x1] ss:$0 sm:$0xff]  ;;  %v1666_v17 = vrot.slane %v3657_v0, 1 }
 0x35c   :  { %v1635_v6 = vsel %vm1036_vm4, %v1611_v3, %v1612_v46  ;;  %v1613_v29 = vrot.slane %v1456_v32, 7  ;;  %v1664_v9 = vrot.slane %v1577_v51, 1  ;;  %v1458_v45 = vpop.f32.mrb[43].mxu0  ;;  %v3658_v37 = vpop.f32.mrb[42].mxu1 }
 0x35d   :  { %v1759_v44 = vmax.f32 %v1743_v16, 0.0  ;;  %v1744_v11 = vadd.f32 %v4847_v39, %v1723_v27  ;;  %v1644_v35 = vmul.f32 %v4366_v57, %v1635_v6  ;;  %v1667_v2 = vrot.slane %v3658_v37, 1  ;;  %v1580_v47 = vpop.f32.mrb[43].mxu1 }
 0x35e   :  { %v1679_v3 = vsel %vm1085_vm6, %v1663_v7, %v1664_v9  ;;  %v1634_v8 = vsel %vm1036_vm4, %v1612_v46, %v1613_v29  ;;  %v1665_v41 = vrot.slane %v1580_v47, 1  ;;  %v1693_v37 = vmul.f32 %v4356_v52, %v1681_v42 }
 0x35f   :  { %v1780_v16 = vmul.f32 %v4858_v15, %v1759_v44  ;;  %v1760_v27 = vmax.f32 %v1744_v11, 0.0  ;;  %v1708_v32 = vadd.f32 %v1644_v35, %v1454_v4  ;;  %v1645_v51 = vmul.f32 %v4369_v58, %v1634_v8  ;;  %v4881_v44 = vld [vmem:[%s5547_s6 + $0x1] ss:$0 sm:$0xff] }
 0x360   :  { %v4868_v6 = vsel %vm1085_vm6, %v1666_v17, %v1667_v2  ;;  %v4872_v0 = vsel %vm1085_vm6, %v1665_v41, %v1666_v17  ;;  %v1678_v7 = vsel %vm1085_vm6, %v1664_v9, %v1665_v41  ;;  %v1694_v17 = vmul.f32 %v4361_v53, %v1680_v36 }
 0x361   :  { %v1781_v46 = vmul.f32 %v4858_v15, %v1760_v27  ;;  %v1724_v47 = vadd.f32 %v1708_v32, %v1692_v55  ;;  %v1709_v11 = vadd.f32 %v1645_v51, %v1458_v45  ;;  %v1462_v4 = vpop.f32.mrb[44].mxu0  ;;  %v1801_v57 = vadd.f32 %v4881_v44, %v1780_v16 }
 0x362   :  { %v1614_v35 = vrot.slane %v1462_v4, 7  ;;  %v1464_v8 = vpop.f32.mrb[45].mxu0  ;;  %v3661_v58 = vpop.f32.mrb[44].mxu1 }
 0x363   :  { %v1802_v9 = vadd.f32 %v4881_v44, %v1781_v46  ;;  %v1745_v55 = vadd.f32 %v4847_v39, %v1724_v47  ;;  %v1725_v41 = vadd.f32 %v1709_v11, %v1693_v37  ;;  %v1466_v42 = vpop.f32.mrb[46].mxu0  ;;  %v1593_v45 = vpop.f32.mrb[45].mxu1  ;;  %v1670_v32 = vrot.slane %v3661_v58, 1 }
 0x364   :  { %v1633_v27 = vsel %vm1036_vm4, %v1613_v29, %v1614_v35  ;;  %v1615_v51 = vrot.slane %v1466_v42, 7  ;;  %v1668_v52 = vrot.slane %v1593_v45, 1  ;;  %v1468_v4 = vpop.f32.mrb[47].mxu0  ;;  %v3662_v48 = vpop.f32.mrb[46].mxu1  ;;  %v1695_v45 = vmul.f32 %v4372_v59, %v1679_v3 }
 0x365   :  { %v4889_v31 = vpack.c.bf16 %v1802_v9, %v1801_v57  ;;  %v1761_v36 = vmax.f32 %v1745_v55, 0.0  ;;  %v1746_v16 = vadd.f32 %v4847_v39, %v1725_v41  ;;  %v1646_v46 = vmul.f32 %v4417_v49, %v1633_v27  ;;  %v1596_v53 = vpop.f32.mrb[47].mxu1 }
 0x366   :  { %v4895_v47 = vsel %vm1085_vm6, %v1667_v2, %v1668_v52  ;;  %v1632_v29 = vsel %vm1036_vm4, %v1614_v35, %v1615_v51  ;;  %v1671_v58 = vrot.slane %v3662_v48, 1  ;;  %v1669_v37 = vrot.slane %v1596_v53, 1 }
 0x367   :  { %v1782_v11 = vmul.f32 %v4858_v15, %v1761_v36  ;;  %v1762_v42 = vmax.f32 %v1746_v16, 0.0  ;;  %v1710_v57 = vadd.f32 %v1646_v46, %v1464_v8  ;;  %v1647_v9 = vmul.f32 %v4428_v56, %v1632_v29 }
 0x368   :  { %v4903_v55 = vsel %vm1085_vm6, %v1670_v32, %v1671_v58  ;;  %v5688_v41 = vrot.slane %v4806_v50, 1  ;;  %v4913_v48 = vsel %vm1085_vm6, %v1669_v37, %v1670_v32  ;;  %v4917_v53 = vsel %vm1085_vm6, %v1668_v52, %v1669_v37 }
 0x369   :  { %v1783_v35 = vmul.f32 %v4858_v15, %v1762_v42  ;;  %v1726_v8 = vadd.f32 %v1710_v57, %v1694_v17  ;;  %v1711_v27 = vadd.f32 %v1647_v9, %v1468_v4  ;;  %v1472_v36 = vpop.f32.mrb[48].mxu0  ;;  %v1803_v52 = vadd.f32 %v4881_v44, %v1782_v11 }
 0x36a   :  { %v4909_v2 = vsel %vm1085_vm6, %v1671_v58, %v5688_v41  ;;  %v1616_v50 = vrot.slane %v1472_v36, 7  ;;  %v1474_v16 = vpop.f32.mrb[49].mxu0  ;;  %v1696_v42 = vmul.f32 %v4539_v10, %v1678_v7  ;;  %v1697_v36 = vmul.f32 %v4544_v26, %v4872_v0 }
 0x36b   :  { %v1747_v46 = vadd.f32 %v4847_v39, %v1726_v8  ;;  %v1727_v29 = vadd.f32 %v1711_v27, %v1695_v45  ;;  %v1476_v58 = vpop.f32.mrb[50].mxu0  ;;  %v1804_v37 = vadd.f32 %v4881_v44, %v1783_v35 }
 0x36c   :  { %v1631_v32 = vsel %vm1036_vm4, %v1615_v51, %v1616_v50  ;;  %v1617_v41 = vrot.slane %v1476_v58, 7  ;;  %v1478_v56 = vpop.f32.mrb[51].mxu0 }
 0x36d   :  { %v1763_v17 = vmax.f32 %v1747_v46, 0.0  ;;  %v1748_v3 = vadd.f32 %v4847_v39, %v1727_v29  ;;  %v1648_v4 = vmul.f32 %v4534_v22, %v1631_v32  ;;  %v4931_v9 = vpack.c.bf16 %v1804_v37, %v1803_v52 }
 0x36e   :  { %v1630_v57 = vsel %vm1036_vm4, %v1616_v50, %v1617_v41 }
 0x36f   :  { %v1784_v51 = vmul.f32 %v4858_v15, %v1763_v17  ;;  %v1764_v8 = vmax.f32 %v1748_v3, 0.0  ;;  %v1712_v45 = vadd.f32 %v1648_v4, %v1474_v16  ;;  %v1649_v11 = vmul.f32 %v4550_v38, %v1630_v57 }
 0x371   :  { %v1785_v35 = vmul.f32 %v4858_v15, %v1764_v8  ;;  %v1728_v27 = vadd.f32 %v1712_v45, %v1696_v42  ;;  %v1713_v46 = vadd.f32 %v1649_v11, %v1478_v56  ;;  %v1482_v29 = vpop.f32.mrb[52].mxu0  ;;  %v1805_v37 = vadd.f32 %v4881_v44, %v1784_v51 }
 0x372   :  { %v1618_v7 = vrot.slane %v1482_v29, 7  ;;  %v1484_v58 = vpop.f32.mrb[53].mxu0  ;;  %v1698_v8 = vmul.f32 %v4584_v13, %v4868_v6 }
 0x373   :  { %v1749_v50 = vadd.f32 %v4847_v39, %v1728_v27  ;;  %v1729_v32 = vadd.f32 %v1713_v46, %v1697_v36  ;;  %v1486_v52 = vpop.f32.mrb[54].mxu0  ;;  %v1806_v16 = vadd.f32 %v4881_v44, %v1785_v35  ;;  %v1699_v46 = vmul.f32 %v4595_v21, %v4895_v47 }
 0x374   :  { %v1629_v17 = vsel %vm1036_vm4, %v1617_v41, %v1618_v7  ;;  %v1619_v3 = vrot.slane %v1486_v52, 7  ;;  %v1488_v4 = vpop.f32.mrb[55].mxu0 }
 0x375   :  { %v1765_v42 = vmax.f32 %v1749_v50, 0.0  ;;  %v1750_v0 = vadd.f32 %v4847_v39, %v1729_v32  ;;  %v1650_v56 = vmul.f32 %v4606_v1, %v1629_v17  ;;  %v4945_v57 = vpack.c.bf16 %v1806_v16, %v1805_v37 }
 0x376   :  { %v1628_v51 = vsel %vm1036_vm4, %v1618_v7, %v1619_v3 }
 0x377   :  { %v1786_v45 = vmul.f32 %v4858_v15, %v1765_v42  ;;  %v1766_v11 = vmax.f32 %v1750_v0, 0.0  ;;  %v1714_v35 = vadd.f32 %v1650_v56, %v1484_v58  ;;  %v1651_v41 = vmul.f32 %v4620_v12, %v1628_v51 }
 0x378   :  { %v1700_v51 = vmul.f32 %v4669_v40, %v4917_v53 }
 0x379   :  { %v1787_v27 = vmul.f32 %v4858_v15, %v1766_v11  ;;  %v1730_v36 = vadd.f32 %v1714_v35, %v1698_v8  ;;  %v1715_v29 = vadd.f32 %v1651_v41, %v1488_v4  ;;  %v1492_v50 = vpop.f32.mrb[56].mxu0  ;;  %v1807_v16 = vadd.f32 %v4881_v44, %v1786_v45 }
 0x37a   :  { %v1620_v32 = vrot.slane %v1492_v50, 7  ;;  %v1494_v52 = vpop.f32.mrb[57].mxu0 }
 0x37b   :  { %v1751_v6 = vadd.f32 %v4847_v39, %v1730_v36  ;;  %v1731_v37 = vadd.f32 %v1715_v29, %v1699_v46  ;;  %v1496_v7 = vpop.f32.mrb[58].mxu0  ;;  %v1808_v58 = vadd.f32 %v4881_v44, %v1787_v27  ;;  %v5689_v46 = vld [vmem:[#allocation39_spill] sm:$0xff] }
 0x37c   :  { %v1627_v17 = vsel %vm1036_vm4, %v1619_v3, %v1620_v32  ;;  %v1621_v42 = vrot.slane %v1496_v7, 7  ;;  %v1498_v0 = vpop.f32.mrb[59].mxu0  ;;  %v1701_v29 = vmul.f32 %v5689_v46, %v4913_v48 }
 0x37d   :  { %v1767_v56 = vmax.f32 %v1751_v6, 0.0  ;;  %v1752_v47 = vadd.f32 %v4847_v39, %v1731_v37  ;;  %v1652_v4 = vmul.f32 %v4664_v62, %v1627_v17  ;;  %v4963_v8 = vpack.c.bf16 %v1808_v58, %v1807_v16 }
 0x37e   :  { %v1626_v45 = vsel %vm1036_vm4, %v1620_v32, %v1621_v42 }
 0x37f   :  { %v1788_v11 = vmul.f32 %v4858_v15, %v1767_v56  ;;  %v1768_v35 = vmax.f32 %v1752_v47, 0.0  ;;  %v1716_v41 = vadd.f32 %v1652_v4, %v1494_v52  ;;  %v1653_v3 = vmul.f32 %v4683_v33, %v1626_v45 }
 0x380   :  { %v1742_v45 = vadd.f32 %v4847_v39, %v4826_v30  ;;  %v1688_v30 = vmul.f32 %v4707_v19, %v4823_v25 }
 0x381   :  { %v1789_v27 = vmul.f32 %v4858_v15, %v1768_v35  ;;  %v1732_v36 = vadd.f32 %v1716_v41, %v1700_v51  ;;  %v1717_v50 = vadd.f32 %v1653_v3, %v1498_v0  ;;  %v1502_v6 = vpop.f32.mrb[60].mxu0  ;;  %v1809_v58 = vadd.f32 %v4881_v44, %v1788_v11 }
 0x382   :  { %v1622_v37 = vrot.slane %v1502_v6, 7  ;;  %v1504_v7 = vpop.f32.mrb[61].mxu0  ;;  %v1702_v35 = vmul.f32 %v4730_v5, %v4903_v55  ;;  %v5690_v11 = vrot.slane %v4802_v43, 7 }
 0x383   :  { %v1753_v53 = vadd.f32 %v4847_v39, %v1732_v36  ;;  %v1733_v16 = vadd.f32 %v1717_v50, %v1701_v29  ;;  %v1506_v32 = vpop.f32.mrb[62].mxu0  ;;  %v1810_v52 = vadd.f32 %v4881_v44, %v1789_v27 }
 0x384   :  { %v1625_v17 = vsel %vm1036_vm4, %v1621_v42, %v1622_v37  ;;  %v1623_v56 = vrot.slane %v1506_v32, 7  ;;  %v1508_v47 = vpop.f32.mrb[63].mxu0 }
 0x385   :  { %v1769_v4 = vmax.f32 %v1753_v53, 0.0  ;;  %v1754_v48 = vadd.f32 %v4847_v39, %v1733_v16  ;;  %v1654_v0 = vmul.f32 %v4725_v34, %v1625_v17  ;;  %v1820_v51 = vpack.c.bf16 %v1810_v52, %v1809_v58 }
 0x386   :  { %v1639_v41 = vsel %vm1036_vm4, %v1623_v56, %v5690_v11  ;;  %v1624_v42 = vsel %vm1036_vm4, %v1622_v37, %v1623_v56  ;;  %v1758_v53 = vmax.f32 %v1742_v45, 0.0  ;;  %v1703_v37 = vmul.f32 %v4735_v28, %v4909_v2 }
 0x387   :  { %v1790_v3 = vmul.f32 %v4858_v15, %v1769_v4  ;;  %v1770_v27 = vmax.f32 %v1754_v48, 0.0  ;;  %v1718_v36 = vadd.f32 %v1654_v0, %v1504_v7  ;;  %v1640_v29 = vmul.f32 %v4745_v61, %v1639_v41 }
 0x388   :  { %v1655_v50 = vmul.f32 %v4750_v63, %v1624_v42 }
 0x389   :  { %v1791_v55 = vmul.f32 %v4858_v15, %v1770_v27  ;;  %v1734_v43 = vadd.f32 %v1718_v36, %v1702_v35  ;;  %v1704_v6 = vadd.f32 %v1640_v29, %v4804_v14  ;;  %v1811_v58 = vadd.f32 %v4881_v44, %v1790_v3  ;;  %v3889_v36 = vld [vmem:[#allocation7 + $0x260] ss:$12 sps:$4 sm:$0xff]   ;;  %v3893_v29 = vld [vmem:[#allocation7 + $0x278] ss:$12 sps:$4 sm:$0xff]  }
 0x38a   :  { %v1719_v16 = vadd.f32 %v1655_v50, %v1508_v47  ;;  %v1779_v14 = vmul.f32 %v4858_v15, %v1758_v53  ;;  %v3896_v50 = vld [vmem:[#allocation7 + $0x28c] ss:$12 sps:$4 sm:$0xff]   ;;  %v3901_v53 = vld [vmem:[#allocation7 + $0x2a8] ss:$12 sps:$4 sm:$0xff]  }
 0x38b   :  { %v1755_v32 = vadd.f32 %v4847_v39, %v1734_v43  ;;  %v1720_v7 = vadd.f32 %v1704_v6, %v1688_v30  ;;  %v1812_v52 = vadd.f32 %v4881_v44, %v1791_v55  ;;  %v3894_v30 = vld [vmem:[#allocation7 + $0x288] ss:$12 sps:$4 sm:$0xff]   ;;  %v3897_v55 = vld [vmem:[#allocation7 + $0x290] ss:$12 sps:$4 sm:$0xff]   ;;  %v3898_v6 = vld [vmem:[#allocation7 + $0x2a0] ss:$12 sps:$4 sm:$0xff]  }
 0x38c   :  { %v1735_v17 = vadd.f32 %v1719_v16, %v1703_v37  ;;  %v1800_v41 = vadd.f32 %v4881_v44, %v1779_v14  ;;  %v3900_v43 = vld [vmem:[#allocation7 + $0x2a4] ss:$12 sps:$4 sm:$0xff]   ;;  %v3904_v37 = vld [vmem:[#allocation7 + $0x2bc] ss:$12 sps:$4 sm:$0xff]  }
 0x38d   :  { %v1771_v56 = vmax.f32 %v1755_v32, 0.0  ;;  %v1741_v25 = vadd.f32 %v4847_v39, %v1720_v7  ;;  %v1821_v4 = vpack.c.bf16 %v1812_v52, %v1811_v58  ;;  %v3902_v16 = vld [vmem:[#allocation7 + $0x2b8] ss:$12 sps:$4 sm:$0xff]   ;;  %v3905_v32 = vld [vmem:[#allocation7 + $0x2c0] ss:$12 sps:$4 sm:$0xff]  }
 0x38e   :  { %v1756_v48 = vadd.f32 %v4847_v39, %v1735_v17  ;;  %v3908_v7 = vld [vmem:[#allocation7 + $0x2d4] ss:$12 sps:$4 sm:$0xff]   ;;  %v3906_v58 = vld [vmem:[#allocation7 + $0x2d0] ss:$12 sps:$4 sm:$0xff]   ;;  %v3909_v52 = vld [vmem:[#allocation7 + $0x2d8] ss:$12 sps:$4 sm:$0xff]  }
 0x38f   :  { %v1757_v0 = vmax.f32 %v1741_v25, 0.0  ;;  %v1792_v2 = vmul.f32 %v4858_v15, %v1771_v56  ;;  %v3912_v17 = vld [vmem:[#allocation7 + $0x2ec] ss:$12 sps:$4 sm:$0xff]   ;;  %v3913_v56 = vld [vmem:[#allocation7 + $0x2f0] ss:$12 sps:$4 sm:$0xff]  }
 0x390   :  { %v1772_v47 = vmax.f32 %v1756_v48, 0.0  ;;  %v3910_v25 = vld [vmem:[#allocation7 + $0x2e8] ss:$12 sps:$4 sm:$0xff]  }
 0x391   :  { %v1778_v45 = vmul.f32 %v4858_v15, %v1757_v0  ;;  %v1813_v42 = vadd.f32 %v4881_v44, %v1792_v2 }
 0x392   :  { %v1793_v35 = vmul.f32 %v4858_v15, %v1772_v47  ;;  %v3882_v15 = vld [vmem:[#allocation7 + $0x240] ss:$12 sps:$4 sm:$0xff]  }
 0x393   :  { %v1799_v11 = vadd.f32 %v4881_v44, %v1778_v45 }
 0x394   :  { %v1814_v3 = vadd.f32 %v4881_v44, %v1793_v35  ;;  %v3885_v44 = vld [vmem:[#allocation7 + $0x248] ss:$12 sps:$4 sm:$0xff]  }
 0x395   :  { %v1815_v27 = vpack.c.bf16 %v1800_v41, %v1799_v11  ;;  %3695 = vmatprep.subr.bf16.mxu1 %v3885_v44 }
 0x396   :  { %v1822_v39 = vpack.c.bf16 %v1814_v3, %v1813_v42 }
 0x397   :  { %2017 = vmatmul.mubr.bf16.vlgmr.msra.gmra.mrb[48].mxu1 %v1815_v27  ;;  %3679 = vmatprep.mubr.bf16.mxu0 %v1815_v27 }
 0x398   :  { %3680 = vmatmul.mubr.bf16.vlgmr.msra.gmra.mrb[64].mxu0 %v4889_v31  ;;  %2026 = vmatprep.mubr.bf16.mxu1 %v5687_v54 }
 0x399   :  { %3683 = vmatprep.mubr.bf16.mxu0 %v4931_v9  ;;  %3696 = vmatpush3.bf16.msra.mxu1 %v3885_v44 }
 0x39a   :  { %3697 = vmatprep.subr.bf16.mxu1 %v3889_v36 }
 0x39d   :  { %3698 = vmatpush3.bf16.msra.mxu1 %v3889_v36 }
 0x39e   :  { %3699 = vmatprep.subr.bf16.mxu1 %v3893_v29 }
 0x39f   :  { %2027 = vmatmul.mubr.bf16.gmra.mrb[52].mxu1 %v4889_v31  ;;  %v3884_v31 = vld [vmem:[#allocation7 + $0x244] ss:$12 sps:$4 sm:$0xff]  }
 0x3a0   :  { %3684 = vmatmul.mubr.bf16.gmra.mrb[68].mxu0 %v4945_v57  ;;  %2036 = vmatprep.mubr.bf16.mxu1 %v5687_v54 }
 0x3a1   :  { %3687 = vmatprep.mubr.bf16.mxu0 %v4963_v8  ;;  %2570 = vmatprep.subr.bf16.mxu0 %v3884_v31 }
 0x3a2   :  { %2571 = vmatpush1.bf16.msra.mxu0 %v3882_v15  ;;  %3700 = vmatpush3.bf16.msra.mxu1 %v3893_v29 }
 0x3a3   :  { %3701 = vmatprep.subr.bf16.mxu1 %v3897_v55 }
 0x3a6   :  { %3702 = vmatpush3.bf16.msra.mxu1 %v3897_v55 }
 0x3a7   :  { %2037 = vmatmul.mubr.bf16.gmra.mrb[56].mxu1 %v4931_v9  ;;  %v3888_v9 = vld [vmem:[#allocation7 + $0x25c] ss:$12 sps:$4 sm:$0xff]   ;;  %3703 = vmatprep.subr.bf16.mxu1 %v3901_v53 }
 0x3a8   :  { %3688 = vmatmul.mubr.bf16.gmra.mrb[72].mxu0 %v1820_v51  ;;  %2046 = vmatprep.mubr.bf16.mxu1 %v5687_v54 }
 0x3a9   :  { %3691 = vmatprep.mubr.bf16.mxu0 %v1821_v4  ;;  %2572 = vmatprep.subr.bf16.mxu0 %v3888_v9 }
 0x3aa   :  { %3704 = vmatpush3.bf16.msra.mxu1 %v3901_v53 }
 0x3ab   :  { %3705 = vmatprep.subr.bf16.mxu1 %v3905_v32 }
 0x3ae   :  { %3706 = vmatpush3.bf16.msra.mxu1 %v3905_v32 }
 0x3af   :  { %2047 = vmatmul.mubr.bf16.gmra.mrb[60].mxu1 %v4945_v57  ;;  %v3886_v57 = vld [vmem:[#allocation7 + $0x258] ss:$12 sps:$4 sm:$0xff]   ;;  %3707 = vmatprep.subr.bf16.mxu1 %v3909_v52 }
 0x3b0   :  { %3692 = vmatmul.mubr.bf16.gmra.mrb[76].mxu0 %v1822_v39  ;;  %2056 = vmatprep.mubr.bf16.mxu1 %v5687_v54 }
 0x3b1   :  { %2602 = vmatprep.mubr.bf16.mxu0 %v5687_v54  ;;  %2573 = vmatpush1.bf16.msra.mxu0 %v3886_v57 }
 0x3b2   :  { %3708 = vmatpush3.bf16.msra.mxu1 %v3909_v52 }
 0x3b3   :  { %3709 = vmatprep.subr.bf16.mxu1 %v3913_v56 }
 0x3b6   :  { %3710 = vmatpush3.bf16.msra.mxu1 %v3913_v56 }
 0x3b7   :  { %2057 = vmatmul.mubr.bf16.gmra.mrb[64].mxu1 %v4963_v8  ;;  %v3892_v8 = vld [vmem:[#allocation7 + $0x274] ss:$12 sps:$4 sm:$0xff]  }
 0x3b8   :  { %2066 = vmatprep.mubr.bf16.mxu1 %v5687_v54  ;;  %2574 = vmatprep.subr.bf16.mxu0 %v3892_v8 }
 0x3bf   :  { %2067 = vmatmul.mubr.bf16.gmra.mrb[68].mxu1 %v1820_v51  ;;  %v3890_v51 = vld [vmem:[#allocation7 + $0x270] ss:$12 sps:$4 sm:$0xff]  }
 0x3c0   :  { %2076 = vmatprep.mubr.bf16.mxu1 %v5687_v54  ;;  %2575 = vmatpush1.bf16.msra.mxu0 %v3890_v51 }
 0x3c1   :  { %2576 = vmatprep.subr.bf16.mxu0 %v3896_v50 }
 0x3c4   :  { %2577 = vmatpush1.bf16.msra.mxu0 %v3894_v30 }
 0x3c5   :  { %2578 = vmatprep.subr.bf16.mxu0 %v3900_v43 }
 0x3c7   :  { %2077 = vmatmul.mubr.bf16.gmra.mrb[72].mxu1 %v1821_v4 }
 0x3c8   :  { %2086 = vmatprep.mubr.bf16.mxu1 %v5687_v54  ;;  %2579 = vmatpush1.bf16.msra.mxu0 %v3898_v6 }
 0x3c9   :  { %2580 = vmatprep.subr.bf16.mxu0 %v3904_v37 }
 0x3cc   :  { %2581 = vmatpush1.bf16.msra.mxu0 %v3902_v16 }
 0x3cd   :  { %2582 = vmatprep.subr.bf16.mxu0 %v3908_v7 }
 0x3cf   :  { %2087 = vmatmul.mubr.bf16.gmra.mrb[76].mxu1 %v1822_v39 }
 0x3d0   :  { %2583 = vmatpush1.bf16.msra.mxu0 %v3906_v58 }
 0x3d1   :  { %2584 = vmatprep.subr.bf16.mxu0 %v3912_v17 }
 0x3d4   :  { %2585 = vmatpush1.bf16.msra.mxu0 %v3910_v25 }
 0x46a   :  { %v5029_v4 = vpop.f32.mrb[48].mxu1 }
 0x46b   :  { %v5031_v48 = vpop.f32.mrb[49].mxu1  ;;  %v3681_v14 = vpop.f32.mrb[64].mxu0  ;;  %v5592_v47 = vrot.slane %v5029_v4, 7 }
 0x46c   :  { %v2022_v0 = vpop.f32.mrb[50].mxu1  ;;  %v5033_v2 = vpop.f32.mrb[65].mxu0  ;;  %v2244_v41 = vrot.slane %v3681_v14, 1 }
 0x46d   :  { %v2195_v45 = vrot.slane %v2022_v0, 7  ;;  %v2024_v35 = vpop.f32.mrb[51].mxu1  ;;  %v3682_v11 = vpop.f32.mrb[66].mxu0  ;;  %v5593_v27 = vrot.slane %v5033_v2, 1 }
 0x46e   :  { %v2245_v42 = vrot.slane %v3682_v11, 1  ;;  %v2134_v3 = vpop.f32.mrb[67].mxu0 }
 0x46f   :  { %v2224_v39 = vsel %vm1036_vm4, %v5592_v47, %v2195_v45  ;;  %v2243_v31 = vrot.slane %v2134_v3, 1  ;;  %v5696_v47 = vld [vmem:[#allocation25_spill] sm:$0xff] }
 0x470   :  { %v2227_v15 = vmul.f32 %v4278_v18, %v2224_v39  ;;  %v2270_v44 = vsel %vm1085_vm6, %v2244_v41, %v2245_v42 }
 0x471   :  { %v2271_v9 = vsel %vm1085_vm6, %v2243_v31, %v2244_v41  ;;  %v5050_v57 = vsel %vm1085_vm6, %v5593_v27, %v2243_v31 }
 0x472   :  { %v2291_v36 = vadd.f32 %v2227_v15, %v2024_v35  ;;  %v2275_v8 = vmul.f32 %v4292_v23, %v2271_v9  ;;  %v2028_v51 = vpop.f32.mrb[52].mxu1  ;;  %v2276_v35 = vmul.f32 %v4285_v20, %v2270_v44  ;;  %v5074_v44 = vld [vmem:[%s5545_s4 + $0x2] ss:$0 sm:$0xff] }
 0x473   :  { %v2196_v29 = vrot.slane %v2028_v51, 7  ;;  %v2030_v50 = vpop.f32.mrb[53].mxu1  ;;  %v3685_v30 = vpop.f32.mrb[68].mxu0 }
 0x474   :  { %v5053_v55 = vadd.f32 %v2291_v36, %v2275_v8  ;;  %v2032_v43 = vpop.f32.mrb[54].mxu1  ;;  %v2147_v6 = vpop.f32.mrb[69].mxu0  ;;  %v2248_v56 = vrot.slane %v3685_v30, 1 }
 0x475   :  { %v2223_v53 = vsel %vm1036_vm4, %v2195_v45, %v2196_v29  ;;  %v2197_v37 = vrot.slane %v2032_v43, 7  ;;  %v2246_v16 = vrot.slane %v2147_v6, 1  ;;  %v2034_v32 = vpop.f32.mrb[55].mxu1  ;;  %v3686_v7 = vpop.f32.mrb[70].mxu0  ;;  %v5691_v45 = vld [vmem:[#allocation22_spill] sm:$0xff] }
 0x476   :  { %v2228_v58 = vmul.f32 %v4297_v24, %v2223_v53  ;;  %v2249_v52 = vrot.slane %v3686_v7, 1  ;;  %v2150_v17 = vpop.f32.mrb[71].mxu0  ;;  %v5693_v7 = vld [vmem:[#allocation24_spill] sm:$0xff] }
 0x477   :  { %v2269_v25 = vsel %vm1085_vm6, %v2245_v42, %v2246_v16  ;;  %v2222_v14 = vsel %vm1036_vm4, %v2196_v29, %v2197_v37  ;;  %v2247_v0 = vrot.slane %v2150_v17, 1  ;;  %v5692_v42 = vld [vmem:[#allocation23_spill] sm:$0xff] }
 0x478   :  { %v2292_v11 = vadd.f32 %v2228_v58, %v2030_v50  ;;  %v2229_v41 = vmul.f32 %v5691_v45, %v2222_v14  ;;  %v2266_v3 = vsel %vm1085_vm6, %v2248_v56, %v2249_v52  ;;  %v2277_v9 = vmul.f32 %v5692_v42, %v2269_v25 }
 0x479   :  { %v2267_v39 = vsel %vm1085_vm6, %v2247_v0, %v2248_v56  ;;  %v2268_v31 = vsel %vm1085_vm6, %v2246_v16, %v2247_v0 }
 0x47a   :  { %v2308_v15 = vadd.f32 %v2292_v11, %v2276_v35  ;;  %v2293_v36 = vadd.f32 %v2229_v41, %v2034_v32  ;;  %v2038_v8 = vpop.f32.mrb[56].mxu1  ;;  %v2278_v58 = vmul.f32 %v5693_v7, %v2268_v31  ;;  %v5694_v35 = vld [vmem:[#allocation27_spill] sm:$0xff] }
 0x47b   :  { %v2198_v51 = vrot.slane %v2038_v8, 7  ;;  %v2040_v29 = vpop.f32.mrb[57].mxu1  ;;  %v3689_v50 = vpop.f32.mrb[72].mxu0 }
 0x47c   :  { %v2329_v30 = vadd.f32 %v5074_v44, %v2308_v15  ;;  %v2309_v43 = vadd.f32 %v2293_v36, %v2277_v9  ;;  %v2042_v6 = vpop.f32.mrb[58].mxu1  ;;  %v2163_v53 = vpop.f32.mrb[73].mxu0  ;;  %v5085_v15 = vld [vmem:[%s5546_s5 + $0x2] ss:$0 sm:$0xff]  ;;  %v2252_v9 = vrot.slane %v3689_v50, 1 }
 0x47d   :  { %v2221_v16 = vsel %vm1036_vm4, %v2197_v37, %v2198_v51  ;;  %v2199_v32 = vrot.slane %v2042_v6, 7  ;;  %v2250_v17 = vrot.slane %v2163_v53, 1  ;;  %v2044_v56 = vpop.f32.mrb[59].mxu1  ;;  %v3690_v25 = vpop.f32.mrb[74].mxu0  ;;  %v5695_v53 = vld [vmem:[#allocation28_spill] sm:$0xff] }
 0x47e   :  { %v2345_v14 = vmax.f32 %v2329_v30, 0.0  ;;  %v2330_v0 = vadd.f32 %v5074_v44, %v2309_v43  ;;  %v2230_v11 = vmul.f32 %v5694_v35, %v2221_v16  ;;  %v2253_v41 = vrot.slane %v3690_v25, 1  ;;  %v2166_v8 = vpop.f32.mrb[75].mxu0 }
 0x47f   :  { %v2265_v37 = vsel %vm1085_vm6, %v2249_v52, %v2250_v17  ;;  %v2220_v31 = vsel %vm1036_vm4, %v2198_v51, %v2199_v32  ;;  %v2251_v36 = vrot.slane %v2166_v8, 1 }
 0x480   :  { %v2366_v30 = vmul.f32 %v5085_v15, %v2345_v14  ;;  %v2346_v43 = vmax.f32 %v2330_v0, 0.0  ;;  %v2294_v6 = vadd.f32 %v2230_v11, %v2040_v29  ;;  %v2231_v16 = vmul.f32 %v5695_v53, %v2220_v31  ;;  %v5108_v11 = vld [vmem:[%s5547_s6 + $0x2] ss:$0 sm:$0xff]  ;;  %v5697_v53 = vld [vmem:[#allocation26_spill] sm:$0xff] }
 0x481   :  { %v5095_v25 = vsel %vm1085_vm6, %v2252_v9, %v2253_v41  ;;  %v5099_v50 = vsel %vm1085_vm6, %v2251_v36, %v2252_v9  ;;  %v2264_v52 = vsel %vm1085_vm6, %v2250_v17, %v2251_v36  ;;  %v2279_v14 = vmul.f32 %v5696_v47, %v2267_v39 }
 0x482   :  { %v2367_v51 = vmul.f32 %v5085_v15, %v2346_v43  ;;  %v2310_v8 = vadd.f32 %v2294_v6, %v2278_v58  ;;  %v2295_v0 = vadd.f32 %v2231_v16, %v2044_v56  ;;  %v2048_v29 = vpop.f32.mrb[60].mxu1  ;;  %v2280_v9 = vmul.f32 %v5697_v53, %v2266_v3 }
 0x483   :  { %v2200_v31 = vrot.slane %v2048_v29, 7  ;;  %v2050_v27 = vpop.f32.mrb[61].mxu1  ;;  %v3693_v35 = vpop.f32.mrb[76].mxu0  ;;  %v2387_v7 = vadd.f32 %v5108_v11, %v2366_v30 }
 0x484   :  { %v2388_v17 = vadd.f32 %v5108_v11, %v2367_v51  ;;  %v2331_v58 = vadd.f32 %v5074_v44, %v2310_v8  ;;  %v2311_v36 = vadd.f32 %v2295_v0, %v2279_v14  ;;  %v2052_v39 = vpop.f32.mrb[62].mxu1  ;;  %v2179_v56 = vpop.f32.mrb[77].mxu0  ;;  %v2256_v6 = vrot.slane %v3693_v35, 1 }
 0x485   :  { %v2219_v43 = vsel %vm1036_vm4, %v2199_v32, %v2200_v31  ;;  %v2201_v16 = vrot.slane %v2052_v39, 7  ;;  %v2254_v47 = vrot.slane %v2179_v56, 1  ;;  %v2054_v29 = vpop.f32.mrb[63].mxu1  ;;  %v3694_v42 = vpop.f32.mrb[78].mxu0  ;;  %v5699_v56 = vrot.slane %v5033_v2, 1 }
 0x486   :  { %v5116_v45 = vpack.c.bf16 %v2388_v17, %v2387_v7  ;;  %v2347_v3 = vmax.f32 %v2331_v58, 0.0  ;;  %v2332_v30 = vadd.f32 %v5074_v44, %v2311_v36  ;;  %v2232_v51 = vmul.f32 %v4417_v49, %v2219_v43  ;;  %v2182_v53 = vpop.f32.mrb[79].mxu0  ;;  %v5698_v17 = vld [vmem:[#allocation35_spill] sm:$0xff] }
 0x487   :  { %v5122_v8 = vsel %vm1085_vm6, %v2253_v41, %v2254_v47  ;;  %v2218_v32 = vsel %vm1036_vm4, %v2200_v31, %v2201_v16  ;;  %v2257_v35 = vrot.slane %v3694_v42, 1  ;;  %v2255_v14 = vrot.slane %v2182_v53, 1 }
 0x488   :  { %v2368_v0 = vmul.f32 %v5085_v15, %v2347_v3  ;;  %v2348_v39 = vmax.f32 %v2332_v30, 0.0  ;;  %v2296_v7 = vadd.f32 %v2232_v51, %v2050_v27  ;;  %v2233_v58 = vmul.f32 %v5698_v17, %v2218_v32 }
 0x489   :  { %v5130_v36 = vsel %vm1085_vm6, %v2256_v6, %v2257_v35  ;;  %v5136_v41 = vsel %vm1085_vm6, %v2257_v35, %v5699_v56  ;;  %v5140_v42 = vsel %vm1085_vm6, %v2255_v14, %v2256_v6  ;;  %v5144_v53 = vsel %vm1085_vm6, %v2254_v47, %v2255_v14 }
 0x48a   :  { %v2369_v27 = vmul.f32 %v5085_v15, %v2348_v39  ;;  %v2312_v31 = vadd.f32 %v2296_v7, %v2280_v9  ;;  %v2281_v43 = vmul.f32 %v4372_v59, %v2265_v37  ;;  %v2297_v3 = vadd.f32 %v2233_v58, %v2054_v29  ;;  %v2058_v30 = vpop.f32.mrb[64].mxu1 }
 0x48b   :  { %v2202_v2 = vrot.slane %v2058_v30, 7  ;;  %v2060_v51 = vpop.f32.mrb[65].mxu1  ;;  %v2389_v47 = vadd.f32 %v5108_v11, %v2368_v0  ;;  %v2282_v39 = vmul.f32 %v4539_v10, %v2264_v52  ;;  %v2283_v30 = vmul.f32 %v4544_v26, %v5099_v50 }
 0x48c   :  { %v2333_v32 = vadd.f32 %v5074_v44, %v2312_v31  ;;  %v2313_v35 = vadd.f32 %v2297_v3, %v2281_v43  ;;  %v2062_v56 = vpop.f32.mrb[66].mxu1  ;;  %v2390_v14 = vadd.f32 %v5108_v11, %v2369_v27 }
 0x48d   :  { %v2217_v6 = vsel %vm1036_vm4, %v2201_v16, %v2202_v2  ;;  %v2203_v17 = vrot.slane %v2062_v56, 7  ;;  %v2064_v49 = vpop.f32.mrb[67].mxu1 }
 0x48e   :  { %v2349_v9 = vmax.f32 %v2333_v32, 0.0  ;;  %v2334_v37 = vadd.f32 %v5074_v44, %v2313_v35  ;;  %v2234_v29 = vmul.f32 %v4534_v22, %v2217_v6  ;;  %v5158_v58 = vpack.c.bf16 %v2390_v14, %v2389_v47 }
 0x48f   :  { %v2216_v7 = vsel %vm1036_vm4, %v2202_v2, %v2203_v17 }
 0x490   :  { %v2370_v16 = vmul.f32 %v5085_v15, %v2349_v9  ;;  %v2350_v31 = vmax.f32 %v2334_v37, 0.0  ;;  %v2298_v43 = vadd.f32 %v2234_v29, %v2060_v51  ;;  %v2235_v0 = vmul.f32 %v4550_v38, %v2216_v7 }
 0x492   :  { %v2371_v27 = vmul.f32 %v5085_v15, %v2350_v31  ;;  %v2314_v3 = vadd.f32 %v2298_v43, %v2282_v39  ;;  %v2299_v32 = vadd.f32 %v2235_v0, %v2064_v49  ;;  %v2068_v35 = vpop.f32.mrb[68].mxu1  ;;  %v2391_v14 = vadd.f32 %v5108_v11, %v2370_v16 }
 0x493   :  { %v2204_v52 = vrot.slane %v2068_v35, 7  ;;  %v2070_v56 = vpop.f32.mrb[69].mxu1  ;;  %v2284_v31 = vmul.f32 %v4584_v13, %v5095_v25 }
 0x494   :  { %v2335_v2 = vadd.f32 %v5074_v44, %v2314_v3  ;;  %v2315_v6 = vadd.f32 %v2299_v32, %v2283_v30  ;;  %v2072_v47 = vpop.f32.mrb[70].mxu1  ;;  %v2392_v51 = vadd.f32 %v5108_v11, %v2371_v27  ;;  %v2285_v32 = vmul.f32 %v4595_v21, %v5122_v8 }
 0x495   :  { %v2215_v9 = vsel %vm1036_vm4, %v2203_v17, %v2204_v52  ;;  %v2205_v37 = vrot.slane %v2072_v47, 7  ;;  %v2074_v29 = vpop.f32.mrb[71].mxu1 }
 0x496   :  { %v2351_v39 = vmax.f32 %v2335_v2, 0.0  ;;  %v2336_v50 = vadd.f32 %v5074_v44, %v2315_v6  ;;  %v2236_v49 = vmul.f32 %v4606_v1, %v2215_v9  ;;  %v5172_v7 = vpack.c.bf16 %v2392_v51, %v2391_v14 }
 0x497   :  { %v2214_v16 = vsel %vm1036_vm4, %v2204_v52, %v2205_v37 }
 0x498   :  { %v2372_v43 = vmul.f32 %v5085_v15, %v2351_v39  ;;  %v2352_v0 = vmax.f32 %v2336_v50, 0.0  ;;  %v2300_v27 = vadd.f32 %v2236_v49, %v2070_v56  ;;  %v2237_v17 = vmul.f32 %v4620_v12, %v2214_v16 }
 0x499   :  { %v2286_v16 = vmul.f32 %v4669_v40, %v5144_v53 }
 0x49a   :  { %v2373_v3 = vmul.f32 %v5085_v15, %v2352_v0  ;;  %v2316_v30 = vadd.f32 %v2300_v27, %v2284_v31  ;;  %v2301_v35 = vadd.f32 %v2237_v17, %v2074_v29  ;;  %v2078_v2 = vpop.f32.mrb[72].mxu1  ;;  %v2393_v51 = vadd.f32 %v5108_v11, %v2372_v43 }
 0x49b   :  { %v2206_v6 = vrot.slane %v2078_v2, 7  ;;  %v2080_v47 = vpop.f32.mrb[73].mxu1 }
 0x49c   :  { %v2337_v25 = vadd.f32 %v5074_v44, %v2316_v30  ;;  %v2317_v14 = vadd.f32 %v2301_v35, %v2285_v32  ;;  %v2082_v52 = vpop.f32.mrb[74].mxu1  ;;  %v2394_v56 = vadd.f32 %v5108_v11, %v2373_v3  ;;  %v2287_v32 = vmul.f32 %v5689_v46, %v5140_v42 }
 0x49d   :  { %v2213_v9 = vsel %vm1036_vm4, %v2205_v37, %v2206_v6  ;;  %v2207_v39 = vrot.slane %v2082_v52, 7  ;;  %v2084_v50 = vpop.f32.mrb[75].mxu1 }
 0x49e   :  { %v2353_v49 = vmax.f32 %v2337_v25, 0.0  ;;  %v2338_v8 = vadd.f32 %v5074_v44, %v2317_v14  ;;  %v2238_v29 = vmul.f32 %v4664_v62, %v2213_v9  ;;  %v5190_v31 = vpack.c.bf16 %v2394_v56, %v2393_v51 }
 0x49f   :  { %v2212_v43 = vsel %vm1036_vm4, %v2206_v6, %v2207_v39 }
 0x4a0   :  { %v2374_v0 = vmul.f32 %v5085_v15, %v2353_v49  ;;  %v2354_v27 = vmax.f32 %v2338_v8, 0.0  ;;  %v2302_v17 = vadd.f32 %v2238_v29, %v2080_v47  ;;  %v2239_v37 = vmul.f32 %v4683_v33, %v2212_v43 }
 0x4a1   :  { %v2288_v43 = vmul.f32 %v4730_v5, %v5130_v36 }
 0x4a2   :  { %v2375_v3 = vmul.f32 %v5085_v15, %v2354_v27  ;;  %v2318_v30 = vadd.f32 %v2302_v17, %v2286_v16  ;;  %v2303_v35 = vadd.f32 %v2239_v37, %v2084_v50  ;;  %v2088_v2 = vpop.f32.mrb[76].mxu1  ;;  %v2395_v51 = vadd.f32 %v5108_v11, %v2374_v0 }
 0x4a3   :  { %v2208_v25 = vrot.slane %v2088_v2, 7  ;;  %v2090_v14 = vpop.f32.mrb[77].mxu1  ;;  %v2328_v16 = vadd.f32 %v5074_v44, %v5053_v55  ;;  %v5700_v0 = vrot.slane %v5029_v4, 7  ;;  %v2274_v55 = vmul.f32 %v4707_v19, %v5050_v57 }
 0x4a4   :  { %v2339_v53 = vadd.f32 %v5074_v44, %v2318_v30  ;;  %v2319_v52 = vadd.f32 %v2303_v35, %v2287_v32  ;;  %v2092_v6 = vpop.f32.mrb[78].mxu1  ;;  %v2396_v47 = vadd.f32 %v5108_v11, %v2375_v3 }
 0x4a5   :  { %v2211_v56 = vsel %vm1036_vm4, %v2207_v39, %v2208_v25  ;;  %v2209_v9 = vrot.slane %v2092_v6, 7  ;;  %v2094_v49 = vpop.f32.mrb[79].mxu1  ;;  %v2344_v2 = vmax.f32 %v2328_v16, 0.0 }
 0x4a6   :  { %v2355_v8 = vmax.f32 %v2339_v53, 0.0  ;;  %v2340_v42 = vadd.f32 %v5074_v44, %v2319_v52  ;;  %v2240_v50 = vmul.f32 %v4725_v34, %v2211_v56  ;;  %v2406_v29 = vpack.c.bf16 %v2396_v47, %v2395_v51 }
 0x4a7   :  { %v2225_v27 = vsel %vm1036_vm4, %v2209_v9, %v5700_v0  ;;  %v2210_v39 = vsel %vm1036_vm4, %v2208_v25, %v2209_v9  ;;  %v2289_v25 = vmul.f32 %v4735_v28, %v5136_v41 }
 0x4a8   :  { %v2376_v17 = vmul.f32 %v5085_v15, %v2355_v8  ;;  %v2356_v37 = vmax.f32 %v2340_v42, 0.0  ;;  %v2304_v3 = vadd.f32 %v2240_v50, %v2090_v14  ;;  %v2226_v30 = vmul.f32 %v4745_v61, %v2225_v27 }
 0x4a9   :  { %v2241_v32 = vmul.f32 %v4750_v63, %v2210_v39 }
 0x4aa   :  { %v2377_v36 = vmul.f32 %v5085_v15, %v2356_v37  ;;  %v2320_v4 = vadd.f32 %v2304_v3, %v2288_v43  ;;  %v2290_v35 = vadd.f32 %v2226_v30, %v5031_v48  ;;  %v2397_v6 = vadd.f32 %v5108_v11, %v2376_v17 }
 0x4ab   :  { %v2305_v53 = vadd.f32 %v2241_v32, %v2094_v49  ;;  %v2365_v48 = vmul.f32 %v5085_v15, %v2344_v2 }
 0x4ac   :  { %v2341_v52 = vadd.f32 %v5074_v44, %v2320_v4  ;;  %v2306_v14 = vadd.f32 %v2290_v35, %v2274_v55  ;;  %v2398_v51 = vadd.f32 %v5108_v11, %v2377_v36 }
 0x4ad   :  { %v2321_v47 = vadd.f32 %v2305_v53, %v2289_v25  ;;  %v2386_v0 = vadd.f32 %v5108_v11, %v2365_v48 }
 0x4ae   :  { %v2357_v56 = vmax.f32 %v2341_v52, 0.0  ;;  %v2327_v57 = vadd.f32 %v5074_v44, %v2306_v14  ;;  %v2407_v9 = vpack.c.bf16 %v2398_v51, %v2397_v6 }
 0x4af   :  { %v2342_v8 = vadd.f32 %v5074_v44, %v2321_v47 }
 0x4b0   :  { %v2343_v42 = vmax.f32 %v2327_v57, 0.0  ;;  %v2378_v41 = vmul.f32 %v5085_v15, %v2357_v56 }
 0x4b1   :  { %v2358_v49 = vmax.f32 %v2342_v8, 0.0 }
 0x4b2   :  { %v2364_v50 = vmul.f32 %v5085_v15, %v2343_v42  ;;  %v2399_v27 = vadd.f32 %v5108_v11, %v2378_v41 }
 0x4b3   :  { %v2379_v16 = vmul.f32 %v5085_v15, %v2358_v49  ;;  %v3915_v15 = vld [vmem:[#allocation8 + $0x8] sm:$0xff]  }
 0x4b4   :  { %v2385_v43 = vadd.f32 %v5108_v11, %v2364_v50 }
 0x4b5   :  { %v2400_v39 = vadd.f32 %v5108_v11, %v2379_v16  ;;  %v3916_v11 = vld [vmem:[#allocation8 + $0x10] sm:$0xff]  }
 0x4b6   :  { %v2401_v17 = vpack.c.bf16 %v2386_v0, %v2385_v43 }
 0x4b7   :  { %v2408_v44 = vpack.c.bf16 %v2400_v39, %v2399_v27 }
 0x4b8   :  { %2603 = vmatmul.mubr.bf16.vlgmr.msra.gmra.mrb[80].mxu0 %v2401_v17  ;;  %3711 = vmatprep.mubr.bf16.mxu1 %v2401_v17 }
 0x4b9   :  { %3712 = vmatmul.mubr.bf16.vlgmr.msra.gmra.mrb[80].mxu1 %v5116_v45  ;;  %2612 = vmatprep.mubr.bf16.mxu0 %v5687_v54 }
 0x4ba   :  { %3715 = vmatprep.mubr.bf16.mxu1 %v5158_v58 }
 0x4c0   :  { %2613 = vmatmul.mubr.bf16.gmra.mrb[84].mxu0 %v5116_v45  ;;  %v3914_v45 = vld [vmem:[#allocation8] sm:$0xff]  }
 0x4c1   :  { %3716 = vmatmul.mubr.bf16.gmra.mrb[84].mxu1 %v5172_v7  ;;  %2622 = vmatprep.mubr.bf16.mxu0 %v5687_v54 }
 0x4c2   :  { %3719 = vmatprep.mubr.bf16.mxu1 %v5190_v31  ;;  %3727 = vmatprep.subr.bf16.mxu1 %v3914_v45 }
 0x4c3   :  { %3728 = vmatpush3.bf16.msra.mxu1 %v3914_v45 }
 0x4c4   :  { %3729 = vmatprep.subr.bf16.mxu1 %v3915_v15 }
 0x4c7   :  { %3730 = vmatpush3.bf16.msra.mxu1 %v3915_v15 }
 0x4c8   :  { %2623 = vmatmul.mubr.bf16.gmra.mrb[88].mxu0 %v5158_v58  ;;  %3731 = vmatprep.subr.bf16.mxu1 %v3916_v11  ;;  %v3917_v58 = vld [vmem:[#allocation8 + $0x18] sm:$0xff]  }
 0x4c9   :  { %3720 = vmatmul.mubr.bf16.gmra.mrb[88].mxu1 %v2406_v29  ;;  %2632 = vmatprep.mubr.bf16.mxu0 %v5687_v54 }
 0x4ca   :  { %3723 = vmatprep.mubr.bf16.mxu1 %v2407_v9 }
 0x4cb   :  { %3732 = vmatpush3.bf16.msra.mxu1 %v3916_v11 }
 0x4cc   :  { %3733 = vmatprep.subr.bf16.mxu1 %v3917_v58 }
 0x4cf   :  { %3734 = vmatpush3.bf16.msra.mxu1 %v3917_v58 }
 0x4d0   :  { %2633 = vmatmul.mubr.bf16.gmra.mrb[92].mxu0 %v5172_v7  ;;  %v3918_v7 = vld [vmem:[#allocation8 + $0x20] sm:$0xff]  }
 0x4d1   :  { %3724 = vmatmul.mubr.bf16.gmra.mrb[92].mxu1 %v2408_v44  ;;  %2642 = vmatprep.mubr.bf16.mxu0 %v5687_v54 }
 0x4d2   :  { %3735 = vmatprep.subr.bf16.mxu1 %v3918_v7 }
 0x4d3   :  { %3736 = vmatpush3.bf16.msra.mxu1 %v3918_v7 }
 0x4d8   :  { %2643 = vmatmul.mubr.bf16.gmra.mrb[96].mxu0 %v5190_v31  ;;  %v3919_v31 = vld [vmem:[#allocation8 + $0x28] sm:$0xff]  }
 0x4d9   :  { %2652 = vmatprep.mubr.bf16.mxu0 %v5687_v54  ;;  %3737 = vmatprep.subr.bf16.mxu1 %v3919_v31 }
 0x4da   :  { %3738 = vmatpush3.bf16.msra.mxu1 %v3919_v31 }
 0x4e0   :  { %2653 = vmatmul.mubr.bf16.gmra.mrb[100].mxu0 %v2406_v29  ;;  %v3921_v29 = vld [vmem:[#allocation8 + $0x38] sm:$0xff]  }
 0x4e1   :  { %2662 = vmatprep.mubr.bf16.mxu0 %v5687_v54 }
 0x4e8   :  { %2663 = vmatmul.mubr.bf16.gmra.mrb[104].mxu0 %v2407_v9 }
 0x4e9   :  { %2672 = vmatprep.mubr.bf16.mxu0 %v5687_v54  ;;  %v3920_v54 = vld [vmem:[#allocation8 + $0x30] sm:$0xff]  }
 0x4ea   :  { %3739 = vmatprep.subr.bf16.mxu1 %v3920_v54 }
 0x4eb   :  { %3740 = vmatpush3.bf16.msra.mxu1 %v3920_v54 }
 0x4ec   :  { %3741 = vmatprep.subr.bf16.mxu1 %v3921_v29 }
 0x4ef   :  { %3742 = vmatpush3.bf16.msra.mxu1 %v3921_v29 }
 0x4f0   :  { %2673 = vmatmul.mubr.bf16.gmra.mrb[108].mxu0 %v2408_v44 }
 0x58b   :  { %v5255_v37 = vpop.f32.mrb[80].mxu0 }
 0x58c   :  { %v5257_v3 = vpop.f32.mrb[81].mxu0  ;;  %v3713_v30 = vpop.f32.mrb[80].mxu1  ;;  %v2780_v36 = vrot.slane %v5255_v37, 7 }
 0x58d   :  { %v2608_v32 = vpop.f32.mrb[82].mxu0  ;;  %v5259_v55 = vpop.f32.mrb[81].mxu1  ;;  %v2830_v25 = vrot.slane %v3713_v30, 1  ;;  %v5701_v30 = vld [vmem:[#allocation22_spill] sm:$0xff] }
 0x58e   :  { %v2781_v4 = vrot.slane %v2608_v32, 7  ;;  %v2610_v35 = vpop.f32.mrb[83].mxu0  ;;  %v3714_v2 = vpop.f32.mrb[82].mxu1  ;;  %v2828_v14 = vrot.slane %v5259_v55, 1 }
 0x58f   :  { %v2831_v53 = vrot.slane %v3714_v2, 1  ;;  %v2720_v52 = vpop.f32.mrb[83].mxu1 }
 0x590   :  { %v2810_v6 = vsel %vm1036_vm4, %v2780_v36, %v2781_v4  ;;  %v2829_v51 = vrot.slane %v2720_v52, 1 }
 0x591   :  { %v2813_v47 = vmul.f32 %v4278_v18, %v2810_v6  ;;  %v2856_v56 = vsel %vm1085_vm6, %v2830_v25, %v2831_v53 }
 0x592   :  { %v2857_v57 = vsel %vm1085_vm6, %v2829_v51, %v2830_v25  ;;  %v5276_v9 = vsel %vm1085_vm6, %v2828_v14, %v2829_v51  ;;  %v2862_v54 = vmul.f32 %v4285_v20, %v2856_v56  ;;  %v5702_v25 = vld [vmem:[#allocation23_spill] sm:$0xff] }
 0x593   :  { %v2877_v8 = vadd.f32 %v2813_v47, %v2610_v35  ;;  %v2861_v48 = vmul.f32 %v4292_v23, %v2857_v57  ;;  %v2614_v42 = vpop.f32.mrb[84].mxu0  ;;  %v5300_v20 = vld [vmem:[%s5545_s4 + $0x3] ss:$0 sm:$0xff] }
 0x594   :  { %v2782_v41 = vrot.slane %v2614_v42, 7  ;;  %v2616_v49 = vpop.f32.mrb[85].mxu0  ;;  %v3717_v50 = vpop.f32.mrb[84].mxu1 }
 0x595   :  { %v5279_v18 = vadd.f32 %v2877_v8, %v2861_v48  ;;  %v2618_v16 = vpop.f32.mrb[86].mxu0  ;;  %v2733_v43 = vpop.f32.mrb[85].mxu1  ;;  %v2834_v15 = vrot.slane %v3717_v50, 1 }
 0x596   :  { %v2809_v0 = vsel %vm1036_vm4, %v2781_v4, %v2782_v41  ;;  %v2783_v27 = vrot.slane %v2618_v16, 7  ;;  %v2832_v39 = vrot.slane %v2733_v43, 1  ;;  %v2620_v17 = vpop.f32.mrb[87].mxu0  ;;  %v3718_v44 = vpop.f32.mrb[86].mxu1 }
 0x597   :  { %v2814_v45 = vmul.f32 %v4297_v24, %v2809_v0  ;;  %v2835_v11 = vrot.slane %v3718_v44, 1  ;;  %v2736_v23 = vpop.f32.mrb[87].mxu1 }
 0x598   :  { %v2855_v58 = vsel %vm1085_vm6, %v2831_v53, %v2832_v39  ;;  %v2808_v7 = vsel %vm1036_vm4, %v2782_v41, %v2783_v27  ;;  %v2833_v31 = vrot.slane %v2736_v23, 1 }
 0x599   :  { %v2878_v29 = vadd.f32 %v2814_v45, %v2616_v49  ;;  %v2815_v32 = vmul.f32 %v5701_v30, %v2808_v7  ;;  %v2852_v4 = vsel %vm1085_vm6, %v2834_v15, %v2835_v11  ;;  %v2863_v53 = vmul.f32 %v5702_v25, %v2855_v58  ;;  %v5703_v49 = vld [vmem:[#allocation24_spill] sm:$0xff]  ;;  %v5704_v45 = vld [vmem:[#allocation27_spill] sm:$0xff] }
 0x59a   :  { %v2853_v24 = vsel %vm1085_vm6, %v2833_v31, %v2834_v15  ;;  %v2854_v35 = vsel %vm1085_vm6, %v2832_v39, %v2833_v31  ;;  %v5311_v7 = vld [vmem:[%s5546_s5 + $0x3] ss:$0 sm:$0xff] }
 0x59b   :  { %v2894_v2 = vadd.f32 %v2878_v29, %v2862_v54  ;;  %v2879_v52 = vadd.f32 %v2815_v32, %v2620_v17  ;;  %v2624_v6 = vpop.f32.mrb[88].mxu0  ;;  %v2864_v50 = vmul.f32 %v5703_v49, %v2854_v35  ;;  %v5707_v49 = vld [vmem:[#allocation26_spill] sm:$0xff] }
 0x59c   :  { %v2784_v51 = vrot.slane %v2624_v6, 7  ;;  %v2626_v47 = vpop.f32.mrb[89].mxu0  ;;  %v3721_v56 = vpop.f32.mrb[88].mxu1 }
 0x59d   :  { %v2915_v57 = vadd.f32 %v5300_v20, %v2894_v2  ;;  %v2895_v8 = vadd.f32 %v2879_v52, %v2863_v53  ;;  %v2628_v48 = vpop.f32.mrb[90].mxu0  ;;  %v2749_v42 = vpop.f32.mrb[89].mxu1  ;;  %v2838_v31 = vrot.slane %v3721_v56, 1  ;;  %v5705_v2 = vld [vmem:[#allocation28_spill] sm:$0xff]  ;;  %v5706_v56 = vld [vmem:[#allocation25_spill] sm:$0xff] }
 0x59e   :  { %v2807_v41 = vsel %vm1036_vm4, %v2783_v27, %v2784_v51  ;;  %v2785_v16 = vrot.slane %v2628_v48, 7  ;;  %v2836_v43 = vrot.slane %v2749_v42, 1  ;;  %v2630_v0 = vpop.f32.mrb[91].mxu0  ;;  %v3722_v39 = vpop.f32.mrb[90].mxu1  ;;  %v5334_v48 = vld [vmem:[%s5547_s6 + $0x3] ss:$0 sm:$0xff] }
 0x59f   :  { %v2931_v17 = vmax.f32 %v2915_v57, 0.0  ;;  %v2916_v44 = vadd.f32 %v5300_v20, %v2895_v8  ;;  %v2816_v15 = vmul.f32 %v5704_v45, %v2807_v41  ;;  %v2839_v23 = vrot.slane %v3722_v39, 1  ;;  %v2752_v58 = vpop.f32.mrb[91].mxu1 }
 0x5a0   :  { %v2851_v27 = vsel %vm1085_vm6, %v2835_v11, %v2836_v43  ;;  %v2806_v54 = vsel %vm1036_vm4, %v2784_v51, %v2785_v16  ;;  %v2837_v29 = vrot.slane %v2752_v58, 1  ;;  %v2865_v57 = vmul.f32 %v5706_v56, %v2853_v24 }
 0x5a1   :  { %v2952_v30 = vmul.f32 %v5311_v7, %v2931_v17  ;;  %v2932_v32 = vmax.f32 %v2916_v44, 0.0  ;;  %v2880_v35 = vadd.f32 %v2816_v15, %v2626_v47  ;;  %v2817_v25 = vmul.f32 %v5705_v2, %v2806_v54  ;;  %v5708_v2 = vld [vmem:[#allocation34_spill] sm:$0xff] }
 0x5a2   :  { %v5321_v53 = vsel %vm1085_vm6, %v2838_v31, %v2839_v23  ;;  %v5325_v52 = vsel %vm1085_vm6, %v2837_v29, %v2838_v31  ;;  %v2850_v11 = vsel %vm1085_vm6, %v2836_v43, %v2837_v29  ;;  %v2866_v39 = vmul.f32 %v5707_v49, %v2852_v4 }
 0x5a3   :  { %v2953_v6 = vmul.f32 %v5311_v7, %v2932_v32  ;;  %v2896_v51 = vadd.f32 %v2880_v35, %v2864_v50  ;;  %v2881_v8 = vadd.f32 %v2817_v25, %v2630_v0  ;;  %v2634_v47 = vpop.f32.mrb[92].mxu0  ;;  %v5338_v44 = vadd.f32 %v5334_v48, %v2952_v30 }
 0x5a4   :  { %v2786_v42 = vrot.slane %v2634_v47, 7  ;;  %v2636_v41 = vpop.f32.mrb[93].mxu0  ;;  %v3725_v17 = vpop.f32.mrb[92].mxu1 }
 0x5a5   :  { %v5341_v43 = vadd.f32 %v5334_v48, %v2953_v6  ;;  %v2917_v24 = vadd.f32 %v5300_v20, %v2896_v51  ;;  %v2897_v50 = vadd.f32 %v2881_v8, %v2865_v57  ;;  %v2638_v0 = vpop.f32.mrb[94].mxu0  ;;  %v2765_v45 = vpop.f32.mrb[93].mxu1  ;;  %v2842_v58 = vrot.slane %v3725_v17, 1  ;;  %v5709_v17 = vld [vmem:[#allocation35_spill] sm:$0xff] }
 0x5a6   :  { %v2805_v15 = vsel %vm1036_vm4, %v2785_v16, %v2786_v42  ;;  %v2787_v31 = vrot.slane %v2638_v0, 7  ;;  %v2840_v54 = vrot.slane %v2765_v45, 1  ;;  %v2640_v29 = vpop.f32.mrb[95].mxu0  ;;  %v3726_v4 = vpop.f32.mrb[94].mxu1 }
 0x5a7   :  { %v2988_v30 = vpack.c.bf16 %v5341_v43, %v5338_v44  ;;  %v2933_v32 = vmax.f32 %v2917_v24, 0.0  ;;  %v2918_v35 = vadd.f32 %v5300_v20, %v2897_v50  ;;  %v2818_v25 = vmul.f32 %v5708_v2, %v2805_v15  ;;  %v2768_v6 = vpop.f32.mrb[95].mxu1 }
 0x5a8   :  { %v5352_v51 = vsel %vm1085_vm6, %v2839_v23, %v2840_v54  ;;  %v2804_v16 = vsel %vm1036_vm4, %v2786_v42, %v2787_v31  ;;  %v2843_v56 = vrot.slane %v3726_v4, 1  ;;  %v2841_v57 = vrot.slane %v2768_v6, 1 }
 0x5a9   :  { %v2954_v8 = vmul.f32 %v5311_v7, %v2933_v32  ;;  %v2934_v47 = vmax.f32 %v2918_v35, 0.0  ;;  %v2882_v49 = vadd.f32 %v2818_v25, %v2636_v41  ;;  %v2819_v24 = vmul.f32 %v5709_v17, %v2804_v16 }
 0x5aa   :  { %v5360_v50 = vsel %vm1085_vm6, %v2842_v58, %v2843_v56  ;;  %v5366_v23 = vsel %vm1085_vm6, %v2843_v56, %v2828_v14  ;;  %v5370_v42 = vsel %vm1085_vm6, %v2841_v57, %v2842_v58  ;;  %v5374_v0 = vsel %vm1085_vm6, %v2840_v54, %v2841_v57 }
 0x5ab   :  { %v2955_v41 = vmul.f32 %v5311_v7, %v2934_v47  ;;  %v2898_v45 = vadd.f32 %v2882_v49, %v2866_v39  ;;  %v2867_v15 = vmul.f32 %v4372_v59, %v2851_v27  ;;  %v2883_v4 = vadd.f32 %v2819_v24, %v2640_v29  ;;  %v2644_v32 = vpop.f32.mrb[96].mxu0 }
 0x5ac   :  { %v2788_v55 = vrot.slane %v2644_v32, 7  ;;  %v2646_v35 = vpop.f32.mrb[97].mxu0  ;;  %v5382_v54 = vadd.f32 %v5334_v48, %v2954_v8  ;;  %v2868_v56 = vmul.f32 %v4539_v10, %v2850_v11 }
 0x5ad   :  { %v2919_v14 = vadd.f32 %v5300_v20, %v2898_v45  ;;  %v2899_v2 = vadd.f32 %v2883_v4, %v2867_v15  ;;  %v2648_v25 = vpop.f32.mrb[98].mxu0  ;;  %v5385_v39 = vadd.f32 %v5334_v48, %v2955_v41 }
 0x5ae   :  { %v2803_v58 = vsel %vm1036_vm4, %v2787_v31, %v2788_v55  ;;  %v2789_v6 = vrot.slane %v2648_v25, 7  ;;  %v2650_v16 = vpop.f32.mrb[99].mxu0 }
 0x5af   :  { %v2935_v59 = vmax.f32 %v2919_v14, 0.0  ;;  %v2920_v27 = vadd.f32 %v5300_v20, %v2899_v2  ;;  %v2820_v29 = vmul.f32 %v4534_v22, %v2803_v58  ;;  %v2989_v31 = vpack.c.bf16 %v5385_v39, %v5382_v54 }
 0x5b0   :  { %v2802_v57 = vsel %vm1036_vm4, %v2788_v55, %v2789_v6  ;;  %v2869_v22 = vmul.f32 %v4544_v26, %v5325_v52 }
 0x5b1   :  { %v2956_v47 = vmul.f32 %v5311_v7, %v2935_v59  ;;  %v2936_v8 = vmax.f32 %v2920_v27, 0.0  ;;  %v2884_v49 = vadd.f32 %v2820_v29, %v2646_v35  ;;  %v2821_v17 = vmul.f32 %v4550_v38, %v2802_v57 }
 0x5b2   :  { %v2870_v59 = vmul.f32 %v4584_v13, %v5321_v53 }
 0x5b3   :  { %v2957_v24 = vmul.f32 %v5311_v7, %v2936_v8  ;;  %v2900_v41 = vadd.f32 %v2884_v49, %v2868_v56  ;;  %v2885_v45 = vadd.f32 %v2821_v17, %v2650_v16  ;;  %v2654_v10 = vpop.f32.mrb[100].mxu0  ;;  %v5401_v14 = vadd.f32 %v5334_v48, %v2956_v47 }
 0x5b4   :  { %v2790_v11 = vrot.slane %v2654_v10, 7  ;;  %v2656_v15 = vpop.f32.mrb[101].mxu0 }
 0x5b5   :  { %v2921_v4 = vadd.f32 %v5300_v20, %v2900_v41  ;;  %v2901_v32 = vadd.f32 %v2885_v45, %v2869_v22  ;;  %v2658_v55 = vpop.f32.mrb[102].mxu0  ;;  %v5404_v35 = vadd.f32 %v5334_v48, %v2957_v24 }
 0x5b6   :  { %v2801_v38 = vsel %vm1036_vm4, %v2789_v6, %v2790_v11  ;;  %v2791_v2 = vrot.slane %v2658_v55, 7  ;;  %v2660_v25 = vpop.f32.mrb[103].mxu0  ;;  %v2872_v55 = vmul.f32 %v4669_v40, %v5374_v0 }
 0x5b7   :  { %v2937_v26 = vmax.f32 %v2921_v4, 0.0  ;;  %v2922_v52 = vadd.f32 %v5300_v20, %v2901_v32  ;;  %v2822_v58 = vmul.f32 %v4606_v1, %v2801_v38  ;;  %v2990_v16 = vpack.c.bf16 %v5404_v35, %v5401_v14 }
 0x5b8   :  { %v2800_v27 = vsel %vm1036_vm4, %v2790_v11, %v2791_v2  ;;  %v2871_v1 = vmul.f32 %v4595_v21, %v5352_v51 }
 0x5b9   :  { %v2958_v29 = vmul.f32 %v5311_v7, %v2937_v26  ;;  %v2938_v56 = vmax.f32 %v2922_v52, 0.0  ;;  %v2886_v6 = vadd.f32 %v2822_v58, %v2656_v15  ;;  %v2823_v57 = vmul.f32 %v4620_v12, %v2800_v27 }
 0x5bb   :  { %v2959_v47 = vmul.f32 %v5311_v7, %v2938_v56  ;;  %v2902_v8 = vadd.f32 %v2886_v6, %v2870_v59  ;;  %v2887_v49 = vadd.f32 %v2823_v57, %v2660_v25  ;;  %v2664_v17 = vpop.f32.mrb[104].mxu0  ;;  %v5423_v45 = vadd.f32 %v5334_v48, %v2958_v29 }
 0x5bc   :  { %v2792_v24 = vrot.slane %v2664_v17, 7  ;;  %v2666_v41 = vpop.f32.mrb[105].mxu0 }
 0x5bd   :  { %v2923_v13 = vadd.f32 %v5300_v20, %v2902_v8  ;;  %v2903_v53 = vadd.f32 %v2887_v49, %v2871_v1  ;;  %v2668_v22 = vpop.f32.mrb[106].mxu0  ;;  %v5426_v10 = vadd.f32 %v5334_v48, %v2959_v47 }
 0x5be   :  { %v2799_v12 = vsel %vm1036_vm4, %v2791_v2, %v2792_v24  ;;  %v2793_v11 = vrot.slane %v2668_v22, 7  ;;  %v2670_v15 = vpop.f32.mrb[107].mxu0 }
 0x5bf   :  { %v2939_v21 = vmax.f32 %v2923_v13, 0.0  ;;  %v2924_v51 = vadd.f32 %v5300_v20, %v2903_v53  ;;  %v2824_v4 = vmul.f32 %v4664_v62, %v2799_v12  ;;  %v2991_v32 = vpack.c.bf16 %v5426_v10, %v5423_v45 }
 0x5c0   :  { %v2798_v38 = vsel %vm1036_vm4, %v2792_v24, %v2793_v11  ;;  %v2873_v62 = vmul.f32 %v5689_v46, %v5370_v42  ;;  %v2874_v13 = vmul.f32 %v4730_v5, %v5360_v50 }
 0x5c1   :  { %v2960_v25 = vmul.f32 %v5311_v7, %v2939_v21  ;;  %v2940_v26 = vmax.f32 %v2924_v51, 0.0  ;;  %v2888_v2 = vadd.f32 %v2824_v4, %v2666_v41  ;;  %v2825_v52 = vmul.f32 %v4683_v33, %v2798_v38 }
 0x5c2   :  { %v2914_v41 = vadd.f32 %v5300_v20, %v5279_v18  ;;  %v2860_v18 = vmul.f32 %v4707_v19, %v5276_v9 }
 0x5c3   :  { %v2961_v58 = vmul.f32 %v5311_v7, %v2940_v26  ;;  %v2904_v59 = vadd.f32 %v2888_v2, %v2872_v55  ;;  %v2889_v27 = vadd.f32 %v2825_v52, %v2670_v15  ;;  %v2674_v29 = vpop.f32.mrb[108].mxu0  ;;  %v2981_v47 = vadd.f32 %v5334_v48, %v2960_v25 }
 0x5c4   :  { %v2794_v56 = vrot.slane %v2674_v29, 7  ;;  %v2676_v6 = vpop.f32.mrb[109].mxu0  ;;  %v2930_v4 = vmax.f32 %v2914_v41, 0.0 }
 0x5c5   :  { %v2925_v40 = vadd.f32 %v5300_v20, %v2904_v59  ;;  %v2905_v0 = vadd.f32 %v2889_v27, %v2873_v62  ;;  %v2678_v57 = vpop.f32.mrb[110].mxu0  ;;  %v2982_v8 = vadd.f32 %v5334_v48, %v2961_v58 }
 0x5c6   :  { %v2797_v33 = vsel %vm1036_vm4, %v2793_v11, %v2794_v56  ;;  %v2795_v1 = vrot.slane %v2678_v57, 7  ;;  %v2680_v49 = vpop.f32.mrb[111].mxu0  ;;  %v2951_v52 = vmul.f32 %v5311_v7, %v2930_v4 }
 0x5c7   :  { %v2941_v17 = vmax.f32 %v2925_v40, 0.0  ;;  %v2926_v46 = vadd.f32 %v5300_v20, %v2905_v0  ;;  %v2826_v42 = vmul.f32 %v4725_v34, %v2797_v33  ;;  %v2992_v24 = vpack.c.bf16 %v2982_v8, %v2981_v47 }
 0x5c8   :  { %v2811_v53 = vsel %vm1036_vm4, %v2795_v1, %v2780_v36  ;;  %v2796_v22 = vsel %vm1036_vm4, %v2794_v56, %v2795_v1  ;;  %v2875_v36 = vmul.f32 %v4735_v28, %v5366_v23  ;;  %v2972_v27 = vadd.f32 %v5334_v48, %v2951_v52 }
 0x5c9   :  { %v2962_v12 = vmul.f32 %v5311_v7, %v2941_v17  ;;  %v2942_v11 = vmax.f32 %v2926_v46, 0.0  ;;  %v2890_v15 = vadd.f32 %v2826_v42, %v2676_v6  ;;  %v2812_v34 = vmul.f32 %v4745_v61, %v2811_v53 }
 0x5ca   :  { %v2827_v21 = vmul.f32 %v4750_v63, %v2796_v22 }
 0x5cb   :  { %v2963_v5 = vmul.f32 %v5311_v7, %v2942_v11  ;;  %v2906_v37 = vadd.f32 %v2890_v15, %v2874_v13  ;;  %v2876_v50 = vadd.f32 %v2812_v34, %v5257_v3  ;;  %v2983_v61 = vadd.f32 %v5334_v48, %v2962_v12 }
 0x5cc   :  { %v2891_v51 = vadd.f32 %v2827_v21, %v2680_v49 }
 0x5cd   :  { %v2927_v55 = vadd.f32 %v5300_v20, %v2906_v37  ;;  %v2892_v38 = vadd.f32 %v2876_v50, %v2860_v18  ;;  %v2984_v63 = vadd.f32 %v5334_v48, %v2963_v5 }
 0x5ce   :  { %v2907_v25 = vadd.f32 %v2891_v51, %v2875_v36 }
 0x5cf   :  { %v2943_v26 = vmax.f32 %v2927_v55, 0.0  ;;  %v2913_v19 = vadd.f32 %v5300_v20, %v2892_v38  ;;  %v2993_v9 = vpack.c.bf16 %v2984_v63, %v2983_v61 }
 0x5d0   :  { %v2928_v2 = vadd.f32 %v5300_v20, %v2907_v25 }
 0x5d1   :  { %v2929_v3 = vmax.f32 %v2913_v19, 0.0  ;;  %v2964_v28 = vmul.f32 %v5311_v7, %v2943_v26 }
 0x5d2   :  { %v2944_v23 = vmax.f32 %v2928_v2, 0.0 }
 0x5d3   :  { %v2950_v58 = vmul.f32 %v5311_v7, %v2929_v3  ;;  %v2985_v29 = vadd.f32 %v5334_v48, %v2964_v28 }
 0x5d4   :  { %v2965_v59 = vmul.f32 %v5311_v7, %v2944_v23  ;;  %v3462_v7 = vld [vmem:[%s5549_s8] ss:$0 sm:$0xff]  ;;  %s4082_s8 = smov [#allocation10]  }
 0x5d5   :  { %v2971_v62 = vadd.f32 %v5334_v48, %v2950_v58  ;;  %s3294_s15 = sshll.u32 %s4082_s8, 4  ;;  %s3295_s15 = int_to_ptr.vmem [resolvable:$true] %s3294_s15 }
 0x5d6   :  { %v2986_v56 = vadd.f32 %v5334_v48, %v2965_v59  ;;  %s4042_s7 = scalar_lea.vmem %s3295_s15, 16  ;;  %s4046_s21 = scalar_lea.vmem %s3295_s15, 32 }
 0x5d7   :  { %v2987_v6 = vpack.c.bf16 %v2972_v27, %v2971_v62  ;;  %p4043_p4 = scmp.ne.s32.totalorder %s3295_s15, %s4042_s7  ;;  %p4047_p5 = scmp.lt.s32.totalorder %s3295_s15, %s3295_s15 }
 0x5d8   :  { %v2994_v20 = vpack.c.bf16 %v2986_v56, %v2985_v29  ;;  %p4048_p6 = scmp.lt.s32.totalorder %s4046_s21, %s4042_s7 }
 0x5d9   :  { %3743 = vmatprep.mubr.bf16.mxu1 %v2987_v6 }
 0x5da   :  { %3744 = vmatmul.mubr.bf16.vlgmr.msra.gmra.mrb[96].mxu1 %v2988_v30  ;;  %p4049_p7 = por %p4048_p6, %p4047_p5 }
 0x5db   :  { %3747 = vmatprep.mubr.bf16.mxu1 %v2989_v31 }
 0x5dc   :  { %p4050_p8 = pnand %p4049_p7, %p4043_p4 }
 0x5e2   :  { %3748 = vmatmul.mubr.bf16.gmra.mrb[100].mxu1 %v2990_v16 }
 0x5e3   :  { %3751 = vmatprep.mubr.bf16.mxu1 %v2991_v32 }
 0x5ea   :  { %3752 = vmatmul.mubr.bf16.gmra.mrb[104].mxu1 %v2992_v24 }
 0x5eb   :  { %3755 = vmatprep.mubr.bf16.mxu1 %v2993_v9 }
 0x5f2   :  { %3756 = vmatmul.mubr.bf16.gmra.mrb[108].mxu1 %v2994_v20 }
 0x6ad   :  { %v3745_v48 = vpop.f32.mrb[96].mxu1 }
 0x6ae   :  { %v3100_v44 = vpop.f32.mrb[97].mxu1  ;;  %v3109_v35 = vadd.f32 %v3745_v48, %v3462_v7 }
 0x6af   :  { %v3746_v43 = vpop.f32.mrb[98].mxu1  ;;  %v3101_v30 = vadd.f32 %v3462_v7, %v3100_v44 }
 0x6b0   :  { %v3103_v54 = vpop.f32.mrb[99].mxu1  ;;  %v3112_v10 = vadd.f32 %v3746_v43, %v3462_v7 }
 0x6b1   :  { %3163 = vxpose.xlu0.b32.start [1/16] %v3101_v30, 128  ;;  %v3104_v39 = vadd.f32 %v3462_v7, %v3103_v54 }
 0x6b5   :  { %v3749_v31 = vpop.f32.mrb[100].mxu1  ;;  %3164 = vxpose.xlu0.b32.cont [2/16] %v3104_v39, 128 }
 0x6b6   :  { %v3116_v14 = vpop.f32.mrb[101].mxu1  ;;  %v3125_v49 = vadd.f32 %v3749_v31, %v3462_v7 }
 0x6b7   :  { %v3750_v16 = vpop.f32.mrb[102].mxu1  ;;  %v3117_v0 = vadd.f32 %v3462_v7, %v3116_v14  ;;  %v5710_v14 = vld [vmem:[#allocation15_spill] sm:$0xff] }
 0x6b8   :  { %v3119_v45 = vpop.f32.mrb[103].mxu1  ;;  %v3128_v42 = vadd.f32 %v3750_v16, %v3462_v7  ;;  %v5711_v16 = vld [vmem:[#allocation16_spill] sm:$0xff] }
 0x6b9   :  { %3165 = vxpose.xlu0.b32.cont [3/16] %v3109_v35, 128  ;;  %v3120_v8 = vadd.f32 %v3462_v7, %v3119_v45 }
 0x6bd   :  { %v3753_v32 = vpop.f32.mrb[104].mxu1  ;;  %3166 = vxpose.xlu0.b32.cont [4/16] %v3112_v10, 128  ;;  %v5712_v10 = vld [vmem:[#allocation17_spill] sm:$0xff] }
 0x6be   :  { %v3132_v40 = vpop.f32.mrb[105].mxu1  ;;  %v3141_v13 = vadd.f32 %v3753_v32, %v3462_v7 }
 0x6bf   :  { %v3754_v57 = vpop.f32.mrb[106].mxu1  ;;  %v3133_v24 = vadd.f32 %v3462_v7, %v3132_v40  ;;  %v5713_v40 = vld [vmem:[#allocation18_spill] sm:$0xff] }
 0x6c0   :  { %v3135_v47 = vpop.f32.mrb[107].mxu1  ;;  %v3144_v53 = vadd.f32 %v3754_v57, %v3462_v7  ;;  %v5714_v57 = vld [vmem:[#allocation19_spill] sm:$0xff] }
 0x6c1   :  { %3167 = vxpose.xlu0.b32.cont [5/16] %v3117_v0, 128  ;;  %v3136_v41 = vadd.f32 %v3462_v7, %v3135_v47 }
 0x6c5   :  { %v3757_v33 = vpop.f32.mrb[108].mxu1  ;;  %3168 = vxpose.xlu0.b32.cont [6/16] %v3120_v8, 128  ;;  %v5715_v8 = vld [vmem:[#allocation20_spill] sm:$0xff] }
 0x6c6   :  { %v3148_v1 = vpop.f32.mrb[109].mxu1  ;;  %v3157_v11 = vadd.f32 %v3757_v33, %v3462_v7 }
 0x6c7   :  { %v3758_v17 = vpop.f32.mrb[110].mxu1  ;;  %v3149_v22 = vadd.f32 %v3462_v7, %v3148_v1  ;;  %v5716_v1 = vld [vmem:[#allocation21_spill] sm:$0xff] }
 0x6c8   :  { %v3151_v46 = vpop.f32.mrb[111].mxu1  ;;  %v3160_v15 = vadd.f32 %v3758_v17, %v3462_v7 }
 0x6c9   :  { %3169 = vxpose.xlu0.b32.cont [7/16] %v3125_v49, 128  ;;  %v3152_v12 = vadd.f32 %v3462_v7, %v3151_v46  ;;  %v5717_v49 = vld [vmem:[#allocation30_spill] sm:$0xff]  ;;  %v5718_v46 = vld [vmem:[#allocation31_spill] sm:$0xff] }
 0x6cd   :  { %3170 = vxpose.xlu0.b32.cont [8/16] %v3128_v42, 128 }
 0x6d1   :  { %3171 = vxpose.xlu0.b32.cont [9/16] %v3133_v24, 128  ;;  %v5719_v24 = vld [vmem:[#allocation32_spill] sm:$0xff] }
 0x6d5   :  { %3172 = vxpose.xlu0.b32.cont [10/16] %v3136_v41, 128 }
 0x6d9   :  { %3173 = vxpose.xlu0.b32.cont [11/16] %v3141_v13, 128  ;;  %v5720_v13 = vld [vmem:[#allocation33_spill] sm:$0xff] }
 0x6dd   :  { %3174 = vxpose.xlu0.b32.cont [12/16] %v3144_v53, 128 }
 0x6e1   :  { %3175 = vxpose.xlu0.b32.cont [13/16] %v3149_v22, 128  ;;  %v5721_v22 = vld [vmem:[#allocation36_spill] sm:$0xff] }
 0x6e5   :  { %3176 = vxpose.xlu0.b32.cont [14/16] %v3152_v12, 128 }
 0x6e9   :  { %3177 = vxpose.xlu0.b32.cont [15/16] %v3157_v11, 128  ;;  %v5722_v11 = vld [vmem:[#allocation37_spill] sm:$0xff] }
 0x6ed   :  { %3178 = vxpose.xlu0.b32.end [16/16] %v3160_v15, 128 }
 0x731   :  { %v3179_v34 = vpop.trf.xlu0 }
 0x735   :  { %v3180_v21 = vpop.trf.xlu0 }
 0x739   :  { %v3181_v18 = vpop.trf.xlu0 }
 0x73d   :  { %v3182_v5 = vpop.trf.xlu0 }
 0x741   :  { %v3183_v37 = vpop.trf.xlu0 }
 0x742   :  { %v3195_v9 = vmax.f32 %v3179_v34, %v3183_v37 }
 0x745   :  { %v3184_v50 = vpop.trf.xlu0 }
 0x746   :  { %v3196_v26 = vmax.f32 %v3180_v21, %v3184_v50 }
 0x749   :  { %v3185_v36 = vpop.trf.xlu0 }
 0x74a   :  { %v3197_v2 = vmax.f32 %v3181_v18, %v3185_v36 }
 0x74d   :  { %v3186_v51 = vpop.trf.xlu0 }
 0x74e   :  { %v3198_v3 = vmax.f32 %v3182_v5, %v3186_v51 }
 0x751   :  { %v3187_v4 = vpop.trf.xlu0 }
 0x752   :  { %v3199_v28 = vmax.f32 %v3195_v9, %v3187_v4 }
 0x755   :  { %v3188_v55 = vpop.trf.xlu0 }
 0x756   :  { %v3200_v52 = vmax.f32 %v3196_v26, %v3188_v55 }
 0x759   :  { %v3189_v38 = vpop.trf.xlu0 }
 0x75a   :  { %v3201_v23 = vmax.f32 %v3197_v2, %v3189_v38 }
 0x75d   :  { %v3190_v61 = vpop.trf.xlu0 }
 0x75e   :  { %v3202_v58 = vmax.f32 %v3198_v3, %v3190_v61 }
 0x761   :  { %v3191_v63 = vpop.trf.xlu0 }
 0x762   :  { %v3203_v27 = vmax.f32 %v3199_v28, %v3191_v63 }
 0x765   :  { %v3192_v25 = vpop.trf.xlu0 }
 0x766   :  { %v3204_v59 = vmax.f32 %v3200_v52, %v3192_v25 }
 0x768   :  { %v3207_v6 = vmax.f32 %v3203_v27, %v3204_v59 }
 0x769   :  { %v3193_v19 = vpop.trf.xlu0 }
 0x76a   :  { %v3205_v29 = vmax.f32 %v3201_v23, %v3193_v19 }
 0x76d   :  { %v3194_v62 = vpop.trf.xlu0 }
 0x76e   :  { %v3206_v56 = vmax.f32 %v3202_v58, %v3194_v62 }
 0x770   :  { %v3208_v20 = vmax.f32 %v3205_v29, %v3206_v56 }
 0x772   :  { %v3209_v7 = vmax.f32 %v3207_v6, %v3208_v20 }
 0x774   :  { %v3210_v48 = vrot.slane %v3209_v7, 4 }
 0x776   :  { %v3211_v44 = vmax.f32 %v3209_v7, %v3210_v48 }
 0x778   :  { %v3212_v43 = vrot.slane %v3211_v44, 2 }
 0x77a   :  { %v3213_v30 = vmax.f32 %v3211_v44, %v3212_v43 }
 0x77c   :  { %v3214_v54 = vrot.slane %v3213_v30, 1 }
 0x77e   :  { %v3215_v39 = vmax.f32 %v3213_v30, %v3214_v54 }
 0x780   :  { %vm3216_vm4 = vcmp.eq.f32.partialorder %v3179_v34, %v3215_v39  ;;  %vm3217_vm6 = vcmp.eq.f32.partialorder %v3180_v21, %v3215_v39  ;;  %vm3218_vm5 = vcmp.eq.f32.partialorder %v3181_v18, %v3215_v39  ;;  %vm3219_vm7 = vcmp.eq.f32.partialorder %v3182_v5, %v3215_v39  ;;  %v5723_v34 = vld [vmem:[#allocation38_spill] sm:$0xff]  ;;  %v5724_v18 = vld [vmem:[#allocation29_spill] sm:$0xff] }
 0x781   :  { %vm3220_vm8 = vcmp.eq.f32.partialorder %v3183_v37, %v3215_v39  ;;  %vm3221_vm9 = vcmp.eq.f32.partialorder %v3184_v50, %v3215_v39  ;;  %vm3222_vm10 = vcmp.eq.f32.partialorder %v3185_v36, %v3215_v39  ;;  %vm3223_vm11 = vcmp.eq.f32.partialorder %v3186_v51, %v3215_v39 }
 0x782   :  { %vm3224_vm12 = vcmp.eq.f32.partialorder %v3187_v4, %v3215_v39  ;;  %vm3225_vm13 = vcmp.eq.f32.partialorder %v3188_v55, %v3215_v39  ;;  %vm3226_vm14 = vcmp.eq.f32.partialorder %v3189_v38, %v3215_v39  ;;  %vm3227_vm15 = vcmp.eq.f32.partialorder %v3190_v61, %v3215_v39 }
 0x783   :  { %vm3228_vm0 = vcmp.eq.f32.partialorder %v3191_v63, %v3215_v39  ;;  %vm3229_vm1 = vcmp.eq.f32.partialorder %v3192_v25, %v3215_v39  ;;  %vm3230_vm2 = vcmp.eq.f32.partialorder %v3193_v19, %v3215_v39  ;;  %vm3231_vm3 = vcmp.eq.f32.partialorder %v3194_v62, %v3215_v39 }
 0x784   :  { %v3232_v31 = vsel %vm3216_vm4, %v4227_v60, 128  ;;  %v3233_v35 = vsel %vm3217_vm6, %v5710_v14, 128  ;;  %v3234_v45 = vsel %vm3218_vm5, %v5711_v16, 128  ;;  %v3235_v32 = vsel %vm3219_vm7, %v5712_v10, 128 }
 0x785   :  { %v3236_v0 = vsel %vm3220_vm8, %v5713_v40, 128  ;;  %v3237_v47 = vsel %vm3221_vm9, %v5714_v57, 128  ;;  %v3238_v33 = vsel %vm3222_vm10, %v5715_v8, 128  ;;  %v3239_v60 = vsel %vm3223_vm11, %v5716_v1, 128 }
 0x786   :  { %v3240_v17 = vsel %vm3224_vm12, %v5717_v49, 128  ;;  %v3241_v42 = vsel %vm3225_vm13, %v5718_v46, 128  ;;  %v3242_v41 = vsel %vm3226_vm14, %v5719_v24, 128  ;;  %v3243_v53 = vsel %vm3227_vm15, %v5720_v13, 128 }
 0x787   :  { %v3244_v12 = vsel %vm3228_vm0, %v5721_v22, 128  ;;  %v3245_v15 = vsel %vm3229_vm1, %v5722_v11, 128  ;;  %v3246_v21 = vsel %vm3230_vm2, %v5723_v34, 128  ;;  %v3247_v5 = vsel %vm3231_vm3, %v5724_v18, 128 }
 0x788   :  { %vm3248_vm4 = vcmp.lt.s32.totalorder %v3232_v31, %v3236_v0  ;;  %vm3250_vm6 = vcmp.lt.s32.totalorder %v3233_v35, %v3237_v47  ;;  %vm3252_vm5 = vcmp.lt.s32.totalorder %v3234_v45, %v3238_v33  ;;  %vm3254_vm7 = vcmp.lt.s32.totalorder %v3235_v32, %v3239_v60 }
 0x789   :  { %v3249_v37 = vsel %vm3248_vm4, %v3232_v31, %v3236_v0  ;;  %v3251_v50 = vsel %vm3250_vm6, %v3233_v35, %v3237_v47  ;;  %v3253_v36 = vsel %vm3252_vm5, %v3234_v45, %v3238_v33  ;;  %v3255_v51 = vsel %vm3254_vm7, %v3235_v32, %v3239_v60 }
 0x78a   :  { %vm3256_vm8 = vcmp.lt.s32.totalorder %v3249_v37, %v3240_v17  ;;  %vm3258_vm9 = vcmp.lt.s32.totalorder %v3251_v50, %v3241_v42  ;;  %vm3260_vm10 = vcmp.lt.s32.totalorder %v3253_v36, %v3242_v41  ;;  %vm3262_vm11 = vcmp.lt.s32.totalorder %v3255_v51, %v3243_v53 }
 0x78b   :  { %v3257_v4 = vsel %vm3256_vm8, %v3249_v37, %v3240_v17  ;;  %v3259_v55 = vsel %vm3258_vm9, %v3251_v50, %v3241_v42  ;;  %v3261_v38 = vsel %vm3260_vm10, %v3253_v36, %v3242_v41  ;;  %v3263_v61 = vsel %vm3262_vm11, %v3255_v51, %v3243_v53 }
 0x78c   :  { %vm3264_vm12 = vcmp.lt.s32.totalorder %v3257_v4, %v3244_v12  ;;  %vm3266_vm13 = vcmp.lt.s32.totalorder %v3259_v55, %v3245_v15  ;;  %vm3268_vm14 = vcmp.lt.s32.totalorder %v3261_v38, %v3246_v21  ;;  %vm3270_vm15 = vcmp.lt.s32.totalorder %v3263_v61, %v3247_v5 }
 0x78d   :  { %v3265_v63 = vsel %vm3264_vm12, %v3257_v4, %v3244_v12  ;;  %v3267_v25 = vsel %vm3266_vm13, %v3259_v55, %v3245_v15  ;;  %v3269_v26 = vsel %vm3268_vm14, %v3261_v38, %v3246_v21  ;;  %v3271_v19 = vsel %vm3270_vm15, %v3263_v61, %v3247_v5 }
 0x78e   :  { %vm3272_vm0 = vcmp.lt.s32.totalorder %v3265_v63, %v3267_v25  ;;  %vm3274_vm1 = vcmp.lt.s32.totalorder %v3269_v26, %v3271_v19 }
 0x78f   :  { %v3273_v9 = vsel %vm3272_vm0, %v3265_v63, %v3267_v25  ;;  %v3275_v2 = vsel %vm3274_vm1, %v3269_v26, %v3271_v19 }
 0x790   :  { %vm3276_vm2 = vcmp.lt.s32.totalorder %v3273_v9, %v3275_v2 }
 0x791   :  { %v3277_v3 = vsel %vm3276_vm2, %v3273_v9, %v3275_v2 }
 0x792   :  { %v3278_v52 = vrot.slane %v3277_v3, 4 }
 0x794   :  { %vm3279_vm3 = vcmp.lt.s32.totalorder %v3277_v3, %v3278_v52 }
 0x795   :  { %v3280_v28 = vsel %vm3279_vm3, %v3277_v3, %v3278_v52 }
 0x796   :  { %v3281_v23 = vrot.slane %v3280_v28, 2 }
 0x798   :  { %vm3282_vm4 = vcmp.lt.s32.totalorder %v3280_v28, %v3281_v23 }
 0x799   :  { %v3283_v58 = vsel %vm3282_vm4, %v3280_v28, %v3281_v23 }
 0x79a   :  { %v3284_v59 = vrot.slane %v3283_v58, 1 }
 0x79c   :  { %vm3285_vm6 = vcmp.lt.s32.totalorder %v3283_v58, %v3284_v59 }
 0x79d   :  { %v3286_v62 = vsel %vm3285_vm6, %v3283_v58, %v3284_v59 }
 0x79e   :  { %3287 = vst [vmem:[#allocation10] sm:$0x1] %v3286_v62 }
 0x79f   :  { %4053 = shalt.err (!%p4050_p8)
}
 0x7a0   :  { %s4054_s18 = scalar_lea.hbm %s5550_s9, 16 }
 0x7a1   :  { %p4055_p9 = scmp.ne.s32.totalorder %s5550_s9, %s4054_s18  ;;  %p4058_p10 = scmp.lt.u32.totalorder %s4054_s18, %s5550_s9 }
 0x7a3   :  { %p4060_p11 = pnand %p4058_p10, %p4055_p9 }
 0x7a5   :  { %4063 = shalt.err (!%p4060_p11)
}
 0x7a6   :  { %3297 = dma.vmem_to_hbm [thread:$0]  %s3295_s15, 16, %s5550_s9, [#allocation4]  }
 0x7a7   :  { %4070 = dma.done.wait [#allocation4], 16  }
 0x7a8   :  { %4071 = vsyncadd [#allocation4], 4294967280 }
 0x7a9   :  { %3301 = vsyncpa [#allocation3], 1 }
 0x7aa   :  { %3302 = vsyncpa [#allocation6], 1 }
 0x7ab   :  { %3303 = vsyncpa [#allocation9], 1 }
 0x7ac   :  { %3304 = vsyncpa [#allocation4], 1 }

</bundles_post_ra>
